<compile_context>
chip_gen: v5e
topology: v5e:2x2
jax: 0.10.0
libtpu: 0.0.40
codegen_flags: <defaults>
</compile_context>

<pallas_src>
import jax
import jax.numpy as jnp
from jax.experimental import pallas as pl
from jax.experimental.pallas import tpu as pltpu

NUM_GAT_LAYERS = 4
GAT_PARAMS_PER_LAYER = 7  # w_lin, w_res, b_res, a_i, a_j, ln_w, ln_b


# ----------------------------- in-kernel building blocks ---------------------
def _gat_layer(x, mask, neg, w_lin, w_res, b_res, a_i_vec, a_j_vec, ln_w, ln_b):
    """One GATLayer (eval mode) on dense (N, F) features + dense (N, N) edge mask."""
    xt = jnp.dot(x, w_lin, preferred_element_type=jnp.float32)              # (N, H)
    res = jnp.dot(x, w_res, preferred_element_type=jnp.float32) + b_res     # (N, H)

    # attention logit decomposes: score(i<-j) = <xt_i, a_i> + <xt_j, a_j>
    s_dst = jnp.sum(xt * a_i_vec, axis=1, keepdims=True)                    # (N, 1) XLU
    s_src = jax.lax.dot_general(a_j_vec, xt, (((1,), (1,)), ((), ())),
                                preferred_element_type=jnp.float32)         # (1, N)
    s = s_dst + s_src                                                       # (N, N)
    s = jnp.where(s > 0, s, 0.2 * s)                                        # leaky_relu(0.2)

    s = s + neg                                                             # mask non-edges
    m = jnp.max(s, axis=1, keepdims=True)
    e = jnp.where(mask, jnp.exp(s - m), 0.0)
    denom = jnp.sum(e, axis=1, keepdims=True)
    w = e * pl.reciprocal(jnp.maximum(denom, 1e-30), approx=True)           # EUP reciprocal
    # dropout on attention weights: identity in eval mode

    out = jnp.dot(w, xt, preferred_element_type=jnp.float32)                # (N, H)
    z = out + res
    mu = jnp.mean(z, axis=1, keepdims=True)
    var = jnp.mean((z - mu) ** 2, axis=1, keepdims=True)
    zn = (z - mu) * jax.lax.rsqrt(var + 1e-5)
    zn = zn * ln_w + ln_b
    return jnp.where(zn > 0, zn, jnp.exp(jnp.minimum(zn, 0.0)) - 1.0)       # ELU


# ----------------------------- fused forward kernel --------------------------
def fused_forward_kernel(*refs):
    # inputs: x, adj, sel, lengths, 4*7 GAT params, wih(4,H,H), whh(4,H,H), b(4,1,H),
    #         wout(H,C), bout(1,C)   |  output: logits (Gp, C)
    x_ref, adj_ref, sel_ref, len_ref = refs[:4]
    n_gat = NUM_GAT_LAYERS * GAT_PARAMS_PER_LAYER
    gat_refs = refs[4:4 + n_gat]
    wih_ref, whh_ref, bg_ref, wout_ref, bout_ref, o_ref = refs[4 + n_gat:]

    # adjacency mask + additive -inf mask computed ONCE, shared by all 4 layers
    adj = adj_ref[...]
    mask = adj > 0
    neg = jnp.where(mask, 0.0, jnp.float32(-1e30))

    h_nodes = x_ref[...]
    for l in range(NUM_GAT_LAYERS):
        pr = gat_refs[GAT_PARAMS_PER_LAYER * l:GAT_PARAMS_PER_LAYER * (l + 1)]
        h_nodes = _gat_layer(h_nodes, mask, neg, *(r[...] for r in pr))     # (N, H)

    Gp = len_ref.shape[0]
    H = wih_ref.shape[2]
    T = sel_ref.shape[0] // Gp

    lens = len_ref[...]                                                     # (Gp, 1) int32

    # In-kernel sequence packing: a single one-hot selection matmul replaces the
    # x[batch == g] scatter; then per-gate x-path projections for the WHOLE sequence,
    # with biases folded in, are hoisted out of the time loop.
    xpack = jnp.dot(sel_ref[...], h_nodes, preferred_element_type=jnp.float32)  # (T*Gp, H)
    xg_all = [jnp.dot(xpack, wih_ref[g], preferred_element_type=jnp.float32)
              + bg_ref[g] for g in range(4)]                                    # 4 x (T*Gp, H)

    h = jnp.zeros((Gp, H), jnp.float32)
    c = jnp.zeros((Gp, H), jnp.float32)
    # PyTorch gate order i, f, g, o; statically unrolled time loop (T fixed & small),
    # static sublane-aligned row slices (Gp = 8).
    for t in range(T):
        r0 = t * Gp
        hg = [jnp.dot(h, whh_ref[g], preferred_element_type=jnp.float32)
              for g in range(4)]
        i_t = jax.nn.sigmoid(xg_all[0][r0:r0 + Gp] + hg[0])
        f_t = jax.nn.sigmoid(xg_all[1][r0:r0 + Gp] + hg[1])
        g_t = jnp.tanh(xg_all[2][r0:r0 + Gp] + hg[2])
        o_t = jax.nn.sigmoid(xg_all[3][r0:r0 + Gp] + hg[3])
        c_new = f_t * c + i_t * g_t
        h_new = o_t * jnp.tanh(c_new)
        upd = t < lens                                                      # (Gp, 1) mask
        h = jnp.where(upd, h_new, h)
        c = jnp.where(upd, c_new, c)
    # TODO(synk): LSTM layer 1 (the second stacked layer) is never consumed because the
    # PyTorch forward only reads hn[0]; it is deliberately not computed.

    o_ref[...] = (jnp.dot(h, wout_ref[...], preferred_element_type=jnp.float32)
                  + bout_ref[...])


def fused_forward(x, adj, sel, lengths, gat_params,
                  wih_gates, whh_gates, b_gates, w_out_t, b_out):
    flat = [x, adj, sel, lengths]
    for p in gat_params:
        flat += [p["w_lin"], p["w_res"], p["b_res"],
                 p["a_i"], p["a_j"], p["ln_w"], p["ln_b"]]
    flat += [wih_gates, whh_gates, b_gates, w_out_t, b_out]

    Gp = lengths.shape[0]
    C = w_out_t.shape[1]
    return pl.pallas_call(
        fused_forward_kernel,
        in_specs=[pl.BlockSpec(memory_space=pltpu.MemorySpace.VMEM) for _ in flat],
        out_specs=pl.BlockSpec(memory_space=pltpu.MemorySpace.VMEM),
        out_shape=jax.ShapeDtypeStruct((Gp, C), jnp.float32),
    )(*flat)


# ----------------------------- parameter construction ------------------------
def xavier(key, shape, fan_in, fan_out):
    bound = (6.0 / (fan_in + fan_out)) ** 0.5
    return jax.random.uniform(key, shape, jnp.float32, -bound, bound)


def make_gat_params(key, in_dim, hidden, heads):
    C = hidden // heads
    k1, k2, k3 = jax.random.split(key, 3)
    w_lin = xavier(k1, (hidden, in_dim), in_dim, hidden)       # torch layout (out, in)
    w_res = xavier(k2, (hidden, in_dim), in_dim, hidden)
    attn = xavier(k3, (heads, 2 * C, 1), 2 * C, 1)             # (heads, 2C, 1)
    a_i = attn[:, :C, 0].reshape(1, hidden)   # matches flatten of x_t.view(N, heads, C)
    a_j = attn[:, C:, 0].reshape(1, hidden)
    return {
        "w_lin": jnp.transpose(w_lin),                         # (in, hidden)
        "w_res": jnp.transpose(w_res),
        "b_res": jnp.zeros((1, hidden), jnp.float32),          # nn.init.zeros_
        "a_i": a_i,
        "a_j": a_j,
        "ln_w": jnp.ones((1, hidden), jnp.float32),
        "ln_b": jnp.zeros((1, hidden), jnp.float32),
    }


if __name__ == "__main__":
    key = jax.random.PRNGKey(0)
    input_dim, hidden, heads, num_classes = 32, 32, 4, 8
    n_per_graph = [10, 6]
    N = sum(n_per_graph)          # 16 nodes total
    G = len(n_per_graph)          # 2 graphs
    Gp = 8                        # padded graph count (sublane multiple)
    T = max(n_per_graph)          # max sequence length

    # node features
    key, kx = jax.random.split(key)
    x = jax.random.normal(kx, (N, input_dim), jnp.float32)

    # deterministic bidirectional ring edges inside each graph -> dense adjacency
    src_list, dst_list, off = [], [], 0
    for n in n_per_graph:
        for i in range(n):
            src_list += [off + i, off + (i + 1) % n]
            dst_list += [off + (i + 1) % n, off + i]
        off += n
    edge_index = jnp.stack([jnp.array(src_list, jnp.int32),
                            jnp.array(dst_list, jnp.int32)])           # (2, E)
    adj = jnp.zeros((N, N), jnp.float32).at[edge_index[1], edge_index[0]].set(1.0)

    # one-hot selection matrix for in-kernel sequence packing: sel[t*Gp+g, off_g+t] = 1
    sel = jnp.zeros((T * Gp, N), jnp.float32)
    off = 0
    for g, n in enumerate(n_per_graph):
        for t in range(n):
            sel = sel.at[t * Gp + g, off + t].set(1.0)
        off += n
    lengths = jnp.zeros((Gp, 1), jnp.int32).at[:G, 0].set(
        jnp.array(n_per_graph, jnp.int32))

    # GAT parameters (4 layers)
    gat_params = []
    dims = [input_dim, hidden, hidden, hidden]
    for l in range(NUM_GAT_LAYERS):
        key, kl = jax.random.split(key)
        gat_params.append(make_gat_params(kl, dims[l], hidden, heads))

    # LSTM (layer 0) parameters, PyTorch gate order i, f, g, o
    std = 1.0 / hidden ** 0.5
    key, k1, k2, k3, k4, k5, k6 = jax.random.split(key, 7)
    w_ih = jax.random.uniform(k1, (4 * hidden, hidden), jnp.float32, -std, std)
    w_hh = jax.random.uniform(k2, (4 * hidden, hidden), jnp.float32, -std, std)
    b_ih = jax.random.uniform(k3, (4 * hidden,), jnp.float32, -std, std)
    b_hh = jax.random.uniform(k4, (4 * hidden,), jnp.float32, -std, std)
    w_out = jax.random.uniform(k5, (num_classes, hidden), jnp.float32, -std, std)
    b_out = jax.random.uniform(k6, (num_classes,), jnp.float32, -std, std)

    # pre-split LSTM weights per gate (avoids intra-vreg 32-lane gate slicing in-kernel)
    H = hidden
    wih_gates = jnp.stack([jnp.transpose(w_ih[g * H:(g + 1) * H]) for g in range(4)])
    whh_gates = jnp.stack([jnp.transpose(w_hh[g * H:(g + 1) * H]) for g in range(4)])
    b_comb = b_ih + b_hh
    b_gates = jnp.stack([b_comb[g * H:(g + 1) * H].reshape(1, H) for g in range(4)])

    # ---------------- fused forward (single pallas_call) ----------------
    logits_pad = fused_forward(
        x, adj, sel, lengths, gat_params,
        wih_gates, whh_gates, b_gates,
        jnp.transpose(w_out), b_out.reshape(1, num_classes))
    logits = logits_pad[:G]                                             # (G, num_classes)

    jax.block_until_ready(logits)
    assert logits.shape == (G, num_classes)
    assert bool(jnp.all(jnp.isfinite(logits)))
    print("KERNEL_OK")
</pallas_src>

<mosaic_0001>
module attributes {stable_mosaic.version = 11 : i64} {
  func.func @fused_forward_kernel(%arg0: memref<16x32xf32, #tpu.memory_space<vmem>>, %arg1: memref<16x16xf32, #tpu.memory_space<vmem>>, %arg2: memref<80x16xf32, #tpu.memory_space<vmem>>, %arg3: memref<8x1xi32, #tpu.memory_space<vmem>>, %arg4: memref<32x32xf32, #tpu.memory_space<vmem>>, %arg5: memref<32x32xf32, #tpu.memory_space<vmem>>, %arg6: memref<1x32xf32, #tpu.memory_space<vmem>>, %arg7: memref<1x32xf32, #tpu.memory_space<vmem>>, %arg8: memref<1x32xf32, #tpu.memory_space<vmem>>, %arg9: memref<1x32xf32, #tpu.memory_space<vmem>>, %arg10: memref<1x32xf32, #tpu.memory_space<vmem>>, %arg11: memref<32x32xf32, #tpu.memory_space<vmem>>, %arg12: memref<32x32xf32, #tpu.memory_space<vmem>>, %arg13: memref<1x32xf32, #tpu.memory_space<vmem>>, %arg14: memref<1x32xf32, #tpu.memory_space<vmem>>, %arg15: memref<1x32xf32, #tpu.memory_space<vmem>>, %arg16: memref<1x32xf32, #tpu.memory_space<vmem>>, %arg17: memref<1x32xf32, #tpu.memory_space<vmem>>, %arg18: memref<32x32xf32, #tpu.memory_space<vmem>>, %arg19: memref<32x32xf32, #tpu.memory_space<vmem>>, %arg20: memref<1x32xf32, #tpu.memory_space<vmem>>, %arg21: memref<1x32xf32, #tpu.memory_space<vmem>>, %arg22: memref<1x32xf32, #tpu.memory_space<vmem>>, %arg23: memref<1x32xf32, #tpu.memory_space<vmem>>, %arg24: memref<1x32xf32, #tpu.memory_space<vmem>>, %arg25: memref<32x32xf32, #tpu.memory_space<vmem>>, %arg26: memref<32x32xf32, #tpu.memory_space<vmem>>, %arg27: memref<1x32xf32, #tpu.memory_space<vmem>>, %arg28: memref<1x32xf32, #tpu.memory_space<vmem>>, %arg29: memref<1x32xf32, #tpu.memory_space<vmem>>, %arg30: memref<1x32xf32, #tpu.memory_space<vmem>>, %arg31: memref<1x32xf32, #tpu.memory_space<vmem>>, %arg32: memref<4x32x32xf32, #tpu.memory_space<vmem>>, %arg33: memref<4x32x32xf32, #tpu.memory_space<vmem>>, %arg34: memref<4x1x32xf32, #tpu.memory_space<vmem>>, %arg35: memref<32x8xf32, #tpu.memory_space<vmem>>, %arg36: memref<1x8xf32, #tpu.memory_space<vmem>>, %arg37: memref<8x8xf32, #tpu.memory_space<vmem>>) attributes {dimension_semantics = [], scalar_prefetch = 0 : i64, scratch_operands = 0 : i64, tpu.core_type = #tpu.core_type<tc>} {
    %c0 = arith.constant 0 : index
    %c0_0 = arith.constant 0 : index
    %0 = vector.load %arg1[%c0, %c0_0] : memref<16x16xf32, #tpu.memory_space<vmem>>, vector<16x16xf32>
    %cst = arith.constant 0.000000e+00 : f32
    %1 = vector.broadcast %cst : f32 to vector<16x16xf32>
    %2 = arith.cmpf ogt, %0, %1 : vector<16x16xf32>
    %cst_1 = arith.constant 0.000000e+00 : f32
    %cst_2 = arith.constant -1.000000e+30 : f32
    %3 = vector.broadcast %cst_1 : f32 to vector<16x16xf32>
    %4 = vector.broadcast %cst_2 : f32 to vector<16x16xf32>
    %5 = arith.select %2, %3, %4 : vector<16x16xi1>, vector<16x16xf32>
    %c0_3 = arith.constant 0 : index
    %c0_4 = arith.constant 0 : index
    %6 = vector.load %arg0[%c0_3, %c0_4] : memref<16x32xf32, #tpu.memory_space<vmem>>, vector<16x32xf32>
    %c0_5 = arith.constant 0 : index
    %c0_6 = arith.constant 0 : index
    %7 = vector.load %arg4[%c0_5, %c0_6] : memref<32x32xf32, #tpu.memory_space<vmem>>, vector<32x32xf32>
    %c0_7 = arith.constant 0 : index
    %c0_8 = arith.constant 0 : index
    %8 = vector.load %arg5[%c0_7, %c0_8] : memref<32x32xf32, #tpu.memory_space<vmem>>, vector<32x32xf32>
    %c0_9 = arith.constant 0 : index
    %c0_10 = arith.constant 0 : index
    %9 = vector.load %arg6[%c0_9, %c0_10] : memref<1x32xf32, #tpu.memory_space<vmem>>, vector<1x32xf32>
    %c0_11 = arith.constant 0 : index
    %c0_12 = arith.constant 0 : index
    %10 = vector.load %arg7[%c0_11, %c0_12] : memref<1x32xf32, #tpu.memory_space<vmem>>, vector<1x32xf32>
    %c0_13 = arith.constant 0 : index
    %c0_14 = arith.constant 0 : index
    %11 = vector.load %arg8[%c0_13, %c0_14] : memref<1x32xf32, #tpu.memory_space<vmem>>, vector<1x32xf32>
    %c0_15 = arith.constant 0 : index
    %c0_16 = arith.constant 0 : index
    %12 = vector.load %arg9[%c0_15, %c0_16] : memref<1x32xf32, #tpu.memory_space<vmem>>, vector<1x32xf32>
    %c0_17 = arith.constant 0 : index
    %c0_18 = arith.constant 0 : index
    %13 = vector.load %arg10[%c0_17, %c0_18] : memref<1x32xf32, #tpu.memory_space<vmem>>, vector<1x32xf32>
    %cst_19 = arith.constant dense<0.000000e+00> : vector<16x32xf32>
    %14 = tpu.matmul %6, %7, %cst_19 {dimension_numbers = #tpu.dot_dimension_numbers<[1], [0], [0], [1], [0, 0, 1, 1], [], []>} : vector<16x32xf32>, vector<32x32xf32>, vector<16x32xf32> -> vector<16x32xf32>
    %cst_20 = arith.constant dense<0.000000e+00> : vector<16x32xf32>
    %15 = tpu.matmul %6, %8, %cst_20 {dimension_numbers = #tpu.dot_dimension_numbers<[1], [0], [0], [1], [0, 0, 1, 1], [], []>} : vector<16x32xf32>, vector<32x32xf32>, vector<16x32xf32> -> vector<16x32xf32>
    %16 = vector.broadcast %9 : vector<1x32xf32> to vector<16x32xf32>
    %17 = arith.addf %15, %16 : vector<16x32xf32>
    %18 = vector.broadcast %10 : vector<1x32xf32> to vector<16x32xf32>
    %19 = arith.mulf %14, %18 : vector<16x32xf32>
    %cst_21 = arith.constant dense<0.000000e+00> : vector<16xf32>
    %20 = vector.multi_reduction <add>, %19, %cst_21 [1] : vector<16x32xf32> to vector<16xf32>
    %21 = vector.shape_cast %20 : vector<16xf32> to vector<16x1xf32>
    %cst_22 = arith.constant dense<0.000000e+00> : vector<1x16xf32>
    %22 = tpu.matmul %11, %14, %cst_22 {dimension_numbers = #tpu.dot_dimension_numbers<[1], [1], [0], [0], [0, 0, 1, 0], [], []>} : vector<1x32xf32>, vector<16x32xf32>, vector<1x16xf32> -> vector<1x16xf32>
    %23 = vector.broadcast %21 : vector<16x1xf32> to vector<16x16xf32>
    %24 = vector.broadcast %22 : vector<1x16xf32> to vector<16x16xf32>
    %25 = arith.addf %23, %24 : vector<16x16xf32>
    %cst_23 = arith.constant 0.000000e+00 : f32
    %26 = vector.broadcast %cst_23 : f32 to vector<16x16xf32>
    %27 = arith.cmpf ogt, %25, %26 : vector<16x16xf32>
    %cst_24 = arith.constant 2.000000e-01 : f32
    %28 = vector.broadcast %cst_24 : f32 to vector<16x16xf32>
    %29 = arith.mulf %28, %25 : vector<16x16xf32>
    %30 = arith.select %27, %25, %29 : vector<16x16xi1>, vector<16x16xf32>
    %31 = arith.addf %30, %5 : vector<16x16xf32>
    %cst_25 = arith.constant dense<0xFF800000> : vector<16xf32>
    %32 = vector.multi_reduction <maximumf>, %31, %cst_25 [1] : vector<16x16xf32> to vector<16xf32>
    %33 = vector.shape_cast %32 : vector<16xf32> to vector<16x1xf32>
    %34 = vector.broadcast %33 : vector<16x1xf32> to vector<16x16xf32>
    %35 = arith.subf %31, %34 : vector<16x16xf32>
    %36 = math.exp %35 : vector<16x16xf32>
    %cst_26 = arith.constant 0.000000e+00 : f32
    %37 = vector.broadcast %cst_26 : f32 to vector<16x16xf32>
    %38 = arith.select %2, %36, %37 : vector<16x16xi1>, vector<16x16xf32>
    %cst_27 = arith.constant dense<0.000000e+00> : vector<16xf32>
    %39 = vector.multi_reduction <add>, %38, %cst_27 [1] : vector<16x16xf32> to vector<16xf32>
    %40 = vector.shape_cast %39 : vector<16xf32> to vector<16x1xf32>
    %cst_28 = arith.constant 1.000000e-30 : f32
    %41 = vector.broadcast %cst_28 : f32 to vector<16x1xf32>
    %42 = arith.maximumf %40, %41 : vector<16x1xf32>
    %43 = tpu.reciprocal %42 {approx = true} : vector<16x1xf32> -> vector<16x1xf32>
    %44 = vector.broadcast %43 : vector<16x1xf32> to vector<16x16xf32>
    %45 = arith.mulf %38, %44 : vector<16x16xf32>
    %cst_29 = arith.constant dense<0.000000e+00> : vector<16x32xf32>
    %46 = tpu.matmul %45, %14, %cst_29 {dimension_numbers = #tpu.dot_dimension_numbers<[1], [0], [0], [1], [0, 0, 1, 1], [], []>} : vector<16x16xf32>, vector<16x32xf32>, vector<16x32xf32> -> vector<16x32xf32>
    %47 = arith.addf %46, %17 : vector<16x32xf32>
    %cst_30 = arith.constant dense<0.000000e+00> : vector<16xf32>
    %48 = vector.multi_reduction <add>, %47, %cst_30 [1] : vector<16x32xf32> to vector<16xf32>
    %49 = vector.shape_cast %48 : vector<16xf32> to vector<16x1xf32>
    %cst_31 = arith.constant 3.200000e+01 : f32
    %50 = vector.broadcast %cst_31 : f32 to vector<16x1xf32>
    %51 = arith.divf %49, %50 : vector<16x1xf32>
    %52 = vector.broadcast %51 : vector<16x1xf32> to vector<16x32xf32>
    %53 = arith.subf %47, %52 : vector<16x32xf32>
    %54 = arith.mulf %53, %53 : vector<16x32xf32>
    %cst_32 = arith.constant dense<0.000000e+00> : vector<16xf32>
    %55 = vector.multi_reduction <add>, %54, %cst_32 [1] : vector<16x32xf32> to vector<16xf32>
    %56 = vector.shape_cast %55 : vector<16xf32> to vector<16x1xf32>
    %cst_33 = arith.constant 3.200000e+01 : f32
    %57 = vector.broadcast %cst_33 : f32 to vector<16x1xf32>
    %58 = arith.divf %56, %57 : vector<16x1xf32>
    %59 = vector.broadcast %51 : vector<16x1xf32> to vector<16x32xf32>
    %60 = arith.subf %47, %59 : vector<16x32xf32>
    %cst_34 = arith.constant 9.99999974E-6 : f32
    %61 = vector.broadcast %cst_34 : f32 to vector<16x1xf32>
    %62 = arith.addf %58, %61 : vector<16x1xf32>
    %63 = math.rsqrt %62 : vector<16x1xf32>
    %64 = vector.broadcast %63 : vector<16x1xf32> to vector<16x32xf32>
    %65 = arith.mulf %60, %64 : vector<16x32xf32>
    %66 = vector.broadcast %12 : vector<1x32xf32> to vector<16x32xf32>
    %67 = arith.mulf %65, %66 : vector<16x32xf32>
    %68 = vector.broadcast %13 : vector<1x32xf32> to vector<16x32xf32>
    %69 = arith.addf %67, %68 : vector<16x32xf32>
    %cst_35 = arith.constant 0.000000e+00 : f32
    %70 = vector.broadcast %cst_35 : f32 to vector<16x32xf32>
    %71 = arith.cmpf ogt, %69, %70 : vector<16x32xf32>
    %cst_36 = arith.constant 0.000000e+00 : f32
    %72 = vector.broadcast %cst_36 : f32 to vector<16x32xf32>
    %73 = arith.minimumf %69, %72 : vector<16x32xf32>
    %74 = math.exp %73 : vector<16x32xf32>
    %cst_37 = arith.constant 1.000000e+00 : f32
    %75 = vector.broadcast %cst_37 : f32 to vector<16x32xf32>
    %76 = arith.subf %74, %75 : vector<16x32xf32>
    %77 = arith.select %71, %69, %76 : vector<16x32xi1>, vector<16x32xf32>
    %c0_38 = arith.constant 0 : index
    %c0_39 = arith.constant 0 : index
    %78 = vector.load %arg11[%c0_38, %c0_39] : memref<32x32xf32, #tpu.memory_space<vmem>>, vector<32x32xf32>
    %c0_40 = arith.constant 0 : index
    %c0_41 = arith.constant 0 : index
    %79 = vector.load %arg12[%c0_40, %c0_41] : memref<32x32xf32, #tpu.memory_space<vmem>>, vector<32x32xf32>
    %c0_42 = arith.constant 0 : index
    %c0_43 = arith.constant 0 : index
    %80 = vector.load %arg13[%c0_42, %c0_43] : memref<1x32xf32, #tpu.memory_space<vmem>>, vector<1x32xf32>
    %c0_44 = arith.constant 0 : index
    %c0_45 = arith.constant 0 : index
    %81 = vector.load %arg14[%c0_44, %c0_45] : memref<1x32xf32, #tpu.memory_space<vmem>>, vector<1x32xf32>
    %c0_46 = arith.constant 0 : index
    %c0_47 = arith.constant 0 : index
    %82 = vector.load %arg15[%c0_46, %c0_47] : memref<1x32xf32, #tpu.memory_space<vmem>>, vector<1x32xf32>
    %c0_48 = arith.constant 0 : index
    %c0_49 = arith.constant 0 : index
    %83 = vector.load %arg16[%c0_48, %c0_49] : memref<1x32xf32, #tpu.memory_space<vmem>>, vector<1x32xf32>
    %c0_50 = arith.constant 0 : index
    %c0_51 = arith.constant 0 : index
    %84 = vector.load %arg17[%c0_50, %c0_51] : memref<1x32xf32, #tpu.memory_space<vmem>>, vector<1x32xf32>
    %cst_52 = arith.constant dense<0.000000e+00> : vector<16x32xf32>
    %85 = tpu.matmul %77, %78, %cst_52 {dimension_numbers = #tpu.dot_dimension_numbers<[1], [0], [0], [1], [0, 0, 1, 1], [], []>} : vector<16x32xf32>, vector<32x32xf32>, vector<16x32xf32> -> vector<16x32xf32>
    %cst_53 = arith.constant dense<0.000000e+00> : vector<16x32xf32>
    %86 = tpu.matmul %77, %79, %cst_53 {dimension_numbers = #tpu.dot_dimension_numbers<[1], [0], [0], [1], [0, 0, 1, 1], [], []>} : vector<16x32xf32>, vector<32x32xf32>, vector<16x32xf32> -> vector<16x32xf32>
    %87 = vector.broadcast %80 : vector<1x32xf32> to vector<16x32xf32>
    %88 = arith.addf %86, %87 : vector<16x32xf32>
    %89 = vector.broadcast %81 : vector<1x32xf32> to vector<16x32xf32>
    %90 = arith.mulf %85, %89 : vector<16x32xf32>
    %cst_54 = arith.constant dense<0.000000e+00> : vector<16xf32>
    %91 = vector.multi_reduction <add>, %90, %cst_54 [1] : vector<16x32xf32> to vector<16xf32>
    %92 = vector.shape_cast %91 : vector<16xf32> to vector<16x1xf32>
    %cst_55 = arith.constant dense<0.000000e+00> : vector<1x16xf32>
    %93 = tpu.matmul %82, %85, %cst_55 {dimension_numbers = #tpu.dot_dimension_numbers<[1], [1], [0], [0], [0, 0, 1, 0], [], []>} : vector<1x32xf32>, vector<16x32xf32>, vector<1x16xf32> -> vector<1x16xf32>
    %94 = vector.broadcast %92 : vector<16x1xf32> to vector<16x16xf32>
    %95 = vector.broadcast %93 : vector<1x16xf32> to vector<16x16xf32>
    %96 = arith.addf %94, %95 : vector<16x16xf32>
    %cst_56 = arith.constant 0.000000e+00 : f32
    %97 = vector.broadcast %cst_56 : f32 to vector<16x16xf32>
    %98 = arith.cmpf ogt, %96, %97 : vector<16x16xf32>
    %cst_57 = arith.constant 2.000000e-01 : f32
    %99 = vector.broadcast %cst_57 : f32 to vector<16x16xf32>
    %100 = arith.mulf %99, %96 : vector<16x16xf32>
    %101 = arith.select %98, %96, %100 : vector<16x16xi1>, vector<16x16xf32>
    %102 = arith.addf %101, %5 : vector<16x16xf32>
    %cst_58 = arith.constant dense<0xFF800000> : vector<16xf32>
    %103 = vector.multi_reduction <maximumf>, %102, %cst_58 [1] : vector<16x16xf32> to vector<16xf32>
    %104 = vector.shape_cast %103 : vector<16xf32> to vector<16x1xf32>
    %105 = vector.broadcast %104 : vector<16x1xf32> to vector<16x16xf32>
    %106 = arith.subf %102, %105 : vector<16x16xf32>
    %107 = math.exp %106 : vector<16x16xf32>
    %cst_59 = arith.constant 0.000000e+00 : f32
    %108 = vector.broadcast %cst_59 : f32 to vector<16x16xf32>
    %109 = arith.select %2, %107, %108 : vector<16x16xi1>, vector<16x16xf32>
    %cst_60 = arith.constant dense<0.000000e+00> : vector<16xf32>
    %110 = vector.multi_reduction <add>, %109, %cst_60 [1] : vector<16x16xf32> to vector<16xf32>
    %111 = vector.shape_cast %110 : vector<16xf32> to vector<16x1xf32>
    %cst_61 = arith.constant 1.000000e-30 : f32
    %112 = vector.broadcast %cst_61 : f32 to vector<16x1xf32>
    %113 = arith.maximumf %111, %112 : vector<16x1xf32>
    %114 = tpu.reciprocal %113 {approx = true} : vector<16x1xf32> -> vector<16x1xf32>
    %115 = vector.broadcast %114 : vector<16x1xf32> to vector<16x16xf32>
    %116 = arith.mulf %109, %115 : vector<16x16xf32>
    %cst_62 = arith.constant dense<0.000000e+00> : vector<16x32xf32>
    %117 = tpu.matmul %116, %85, %cst_62 {dimension_numbers = #tpu.dot_dimension_numbers<[1], [0], [0], [1], [0, 0, 1, 1], [], []>} : vector<16x16xf32>, vector<16x32xf32>, vector<16x32xf32> -> vector<16x32xf32>
    %118 = arith.addf %117, %88 : vector<16x32xf32>
    %cst_63 = arith.constant dense<0.000000e+00> : vector<16xf32>
    %119 = vector.multi_reduction <add>, %118, %cst_63 [1] : vector<16x32xf32> to vector<16xf32>
    %120 = vector.shape_cast %119 : vector<16xf32> to vector<16x1xf32>
    %cst_64 = arith.constant 3.200000e+01 : f32
    %121 = vector.broadcast %cst_64 : f32 to vector<16x1xf32>
    %122 = arith.divf %120, %121 : vector<16x1xf32>
    %123 = vector.broadcast %122 : vector<16x1xf32> to vector<16x32xf32>
    %124 = arith.subf %118, %123 : vector<16x32xf32>
    %125 = arith.mulf %124, %124 : vector<16x32xf32>
    %cst_65 = arith.constant dense<0.000000e+00> : vector<16xf32>
    %126 = vector.multi_reduction <add>, %125, %cst_65 [1] : vector<16x32xf32> to vector<16xf32>
    %127 = vector.shape_cast %126 : vector<16xf32> to vector<16x1xf32>
    %cst_66 = arith.constant 3.200000e+01 : f32
    %128 = vector.broadcast %cst_66 : f32 to vector<16x1xf32>
    %129 = arith.divf %127, %128 : vector<16x1xf32>
    %130 = vector.broadcast %122 : vector<16x1xf32> to vector<16x32xf32>
    %131 = arith.subf %118, %130 : vector<16x32xf32>
    %cst_67 = arith.constant 9.99999974E-6 : f32
    %132 = vector.broadcast %cst_67 : f32 to vector<16x1xf32>
    %133 = arith.addf %129, %132 : vector<16x1xf32>
    %134 = math.rsqrt %133 : vector<16x1xf32>
    %135 = vector.broadcast %134 : vector<16x1xf32> to vector<16x32xf32>
    %136 = arith.mulf %131, %135 : vector<16x32xf32>
    %137 = vector.broadcast %83 : vector<1x32xf32> to vector<16x32xf32>
    %138 = arith.mulf %136, %137 : vector<16x32xf32>
    %139 = vector.broadcast %84 : vector<1x32xf32> to vector<16x32xf32>
    %140 = arith.addf %138, %139 : vector<16x32xf32>
    %cst_68 = arith.constant 0.000000e+00 : f32
    %141 = vector.broadcast %cst_68 : f32 to vector<16x32xf32>
    %142 = arith.cmpf ogt, %140, %141 : vector<16x32xf32>
    %cst_69 = arith.constant 0.000000e+00 : f32
    %143 = vector.broadcast %cst_69 : f32 to vector<16x32xf32>
    %144 = arith.minimumf %140, %143 : vector<16x32xf32>
    %145 = math.exp %144 : vector<16x32xf32>
    %cst_70 = arith.constant 1.000000e+00 : f32
    %146 = vector.broadcast %cst_70 : f32 to vector<16x32xf32>
    %147 = arith.subf %145, %146 : vector<16x32xf32>
    %148 = arith.select %142, %140, %147 : vector<16x32xi1>, vector<16x32xf32>
    %c0_71 = arith.constant 0 : index
    %c0_72 = arith.constant 0 : index
    %149 = vector.load %arg18[%c0_71, %c0_72] : memref<32x32xf32, #tpu.memory_space<vmem>>, vector<32x32xf32>
    %c0_73 = arith.constant 0 : index
    %c0_74 = arith.constant 0 : index
    %150 = vector.load %arg19[%c0_73, %c0_74] : memref<32x32xf32, #tpu.memory_space<vmem>>, vector<32x32xf32>
    %c0_75 = arith.constant 0 : index
    %c0_76 = arith.constant 0 : index
    %151 = vector.load %arg20[%c0_75, %c0_76] : memref<1x32xf32, #tpu.memory_space<vmem>>, vector<1x32xf32>
    %c0_77 = arith.constant 0 : index
    %c0_78 = arith.constant 0 : index
    %152 = vector.load %arg21[%c0_77, %c0_78] : memref<1x32xf32, #tpu.memory_space<vmem>>, vector<1x32xf32>
    %c0_79 = arith.constant 0 : index
    %c0_80 = arith.constant 0 : index
    %153 = vector.load %arg22[%c0_79, %c0_80] : memref<1x32xf32, #tpu.memory_space<vmem>>, vector<1x32xf32>
    %c0_81 = arith.constant 0 : index
    %c0_82 = arith.constant 0 : index
    %154 = vector.load %arg23[%c0_81, %c0_82] : memref<1x32xf32, #tpu.memory_space<vmem>>, vector<1x32xf32>
    %c0_83 = arith.constant 0 : index
    %c0_84 = arith.constant 0 : index
    %155 = vector.load %arg24[%c0_83, %c0_84] : memref<1x32xf32, #tpu.memory_space<vmem>>, vector<1x32xf32>
    %cst_85 = arith.constant dense<0.000000e+00> : vector<16x32xf32>
    %156 = tpu.matmul %148, %149, %cst_85 {dimension_numbers = #tpu.dot_dimension_numbers<[1], [0], [0], [1], [0, 0, 1, 1], [], []>} : vector<16x32xf32>, vector<32x32xf32>, vector<16x32xf32> -> vector<16x32xf32>
    %cst_86 = arith.constant dense<0.000000e+00> : vector<16x32xf32>
    %157 = tpu.matmul %148, %150, %cst_86 {dimension_numbers = #tpu.dot_dimension_numbers<[1], [0], [0], [1], [0, 0, 1, 1], [], []>} : vector<16x32xf32>, vector<32x32xf32>, vector<16x32xf32> -> vector<16x32xf32>
    %158 = vector.broadcast %151 : vector<1x32xf32> to vector<16x32xf32>
    %159 = arith.addf %157, %158 : vector<16x32xf32>
    %160 = vector.broadcast %152 : vector<1x32xf32> to vector<16x32xf32>
    %161 = arith.mulf %156, %160 : vector<16x32xf32>
    %cst_87 = arith.constant dense<0.000000e+00> : vector<16xf32>
    %162 = vector.multi_reduction <add>, %161, %cst_87 [1] : vector<16x32xf32> to vector<16xf32>
    %163 = vector.shape_cast %162 : vector<16xf32> to vector<16x1xf32>
    %cst_88 = arith.constant dense<0.000000e+00> : vector<1x16xf32>
    %164 = tpu.matmul %153, %156, %cst_88 {dimension_numbers = #tpu.dot_dimension_numbers<[1], [1], [0], [0], [0, 0, 1, 0], [], []>} : vector<1x32xf32>, vector<16x32xf32>, vector<1x16xf32> -> vector<1x16xf32>
    %165 = vector.broadcast %163 : vector<16x1xf32> to vector<16x16xf32>
    %166 = vector.broadcast %164 : vector<1x16xf32> to vector<16x16xf32>
    %167 = arith.addf %165, %166 : vector<16x16xf32>
    %cst_89 = arith.constant 0.000000e+00 : f32
    %168 = vector.broadcast %cst_89 : f32 to vector<16x16xf32>
    %169 = arith.cmpf ogt, %167, %168 : vector<16x16xf32>
    %cst_90 = arith.constant 2.000000e-01 : f32
    %170 = vector.broadcast %cst_90 : f32 to vector<16x16xf32>
    %171 = arith.mulf %170, %167 : vector<16x16xf32>
    %172 = arith.select %169, %167, %171 : vector<16x16xi1>, vector<16x16xf32>
    %173 = arith.addf %172, %5 : vector<16x16xf32>
    %cst_91 = arith.constant dense<0xFF800000> : vector<16xf32>
    %174 = vector.multi_reduction <maximumf>, %173, %cst_91 [1] : vector<16x16xf32> to vector<16xf32>
    %175 = vector.shape_cast %174 : vector<16xf32> to vector<16x1xf32>
    %176 = vector.broadcast %175 : vector<16x1xf32> to vector<16x16xf32>
    %177 = arith.subf %173, %176 : vector<16x16xf32>
    %178 = math.exp %177 : vector<16x16xf32>
    %cst_92 = arith.constant 0.000000e+00 : f32
    %179 = vector.broadcast %cst_92 : f32 to vector<16x16xf32>
    %180 = arith.select %2, %178, %179 : vector<16x16xi1>, vector<16x16xf32>
    %cst_93 = arith.constant dense<0.000000e+00> : vector<16xf32>
    %181 = vector.multi_reduction <add>, %180, %cst_93 [1] : vector<16x16xf32> to vector<16xf32>
    %182 = vector.shape_cast %181 : vector<16xf32> to vector<16x1xf32>
    %cst_94 = arith.constant 1.000000e-30 : f32
    %183 = vector.broadcast %cst_94 : f32 to vector<16x1xf32>
    %184 = arith.maximumf %182, %183 : vector<16x1xf32>
    %185 = tpu.reciprocal %184 {approx = true} : vector<16x1xf32> -> vector<16x1xf32>
    %186 = vector.broadcast %185 : vector<16x1xf32> to vector<16x16xf32>
    %187 = arith.mulf %180, %186 : vector<16x16xf32>
    %cst_95 = arith.constant dense<0.000000e+00> : vector<16x32xf32>
    %188 = tpu.matmul %187, %156, %cst_95 {dimension_numbers = #tpu.dot_dimension_numbers<[1], [0], [0], [1], [0, 0, 1, 1], [], []>} : vector<16x16xf32>, vector<16x32xf32>, vector<16x32xf32> -> vector<16x32xf32>
    %189 = arith.addf %188, %159 : vector<16x32xf32>
    %cst_96 = arith.constant dense<0.000000e+00> : vector<16xf32>
    %190 = vector.multi_reduction <add>, %189, %cst_96 [1] : vector<16x32xf32> to vector<16xf32>
    %191 = vector.shape_cast %190 : vector<16xf32> to vector<16x1xf32>
    %cst_97 = arith.constant 3.200000e+01 : f32
    %192 = vector.broadcast %cst_97 : f32 to vector<16x1xf32>
    %193 = arith.divf %191, %192 : vector<16x1xf32>
    %194 = vector.broadcast %193 : vector<16x1xf32> to vector<16x32xf32>
    %195 = arith.subf %189, %194 : vector<16x32xf32>
    %196 = arith.mulf %195, %195 : vector<16x32xf32>
    %cst_98 = arith.constant dense<0.000000e+00> : vector<16xf32>
    %197 = vector.multi_reduction <add>, %196, %cst_98 [1] : vector<16x32xf32> to vector<16xf32>
    %198 = vector.shape_cast %197 : vector<16xf32> to vector<16x1xf32>
    %cst_99 = arith.constant 3.200000e+01 : f32
    %199 = vector.broadcast %cst_99 : f32 to vector<16x1xf32>
    %200 = arith.divf %198, %199 : vector<16x1xf32>
    %201 = vector.broadcast %193 : vector<16x1xf32> to vector<16x32xf32>
    %202 = arith.subf %189, %201 : vector<16x32xf32>
    %cst_100 = arith.constant 9.99999974E-6 : f32
    %203 = vector.broadcast %cst_100 : f32 to vector<16x1xf32>
    %204 = arith.addf %200, %203 : vector<16x1xf32>
    %205 = math.rsqrt %204 : vector<16x1xf32>
    %206 = vector.broadcast %205 : vector<16x1xf32> to vector<16x32xf32>
    %207 = arith.mulf %202, %206 : vector<16x32xf32>
    %208 = vector.broadcast %154 : vector<1x32xf32> to vector<16x32xf32>
    %209 = arith.mulf %207, %208 : vector<16x32xf32>
    %210 = vector.broadcast %155 : vector<1x32xf32> to vector<16x32xf32>
    %211 = arith.addf %209, %210 : vector<16x32xf32>
    %cst_101 = arith.constant 0.000000e+00 : f32
    %212 = vector.broadcast %cst_101 : f32 to vector<16x32xf32>
    %213 = arith.cmpf ogt, %211, %212 : vector<16x32xf32>
    %cst_102 = arith.constant 0.000000e+00 : f32
    %214 = vector.broadcast %cst_102 : f32 to vector<16x32xf32>
    %215 = arith.minimumf %211, %214 : vector<16x32xf32>
    %216 = math.exp %215 : vector<16x32xf32>
    %cst_103 = arith.constant 1.000000e+00 : f32
    %217 = vector.broadcast %cst_103 : f32 to vector<16x32xf32>
    %218 = arith.subf %216, %217 : vector<16x32xf32>
    %219 = arith.select %213, %211, %218 : vector<16x32xi1>, vector<16x32xf32>
    %c0_104 = arith.constant 0 : index
    %c0_105 = arith.constant 0 : index
    %220 = vector.load %arg25[%c0_104, %c0_105] : memref<32x32xf32, #tpu.memory_space<vmem>>, vector<32x32xf32>
    %c0_106 = arith.constant 0 : index
    %c0_107 = arith.constant 0 : index
    %221 = vector.load %arg26[%c0_106, %c0_107] : memref<32x32xf32, #tpu.memory_space<vmem>>, vector<32x32xf32>
    %c0_108 = arith.constant 0 : index
    %c0_109 = arith.constant 0 : index
    %222 = vector.load %arg27[%c0_108, %c0_109] : memref<1x32xf32, #tpu.memory_space<vmem>>, vector<1x32xf32>
    %c0_110 = arith.constant 0 : index
    %c0_111 = arith.constant 0 : index
    %223 = vector.load %arg28[%c0_110, %c0_111] : memref<1x32xf32, #tpu.memory_space<vmem>>, vector<1x32xf32>
    %c0_112 = arith.constant 0 : index
    %c0_113 = arith.constant 0 : index
    %224 = vector.load %arg29[%c0_112, %c0_113] : memref<1x32xf32, #tpu.memory_space<vmem>>, vector<1x32xf32>
    %c0_114 = arith.constant 0 : index
    %c0_115 = arith.constant 0 : index
    %225 = vector.load %arg30[%c0_114, %c0_115] : memref<1x32xf32, #tpu.memory_space<vmem>>, vector<1x32xf32>
    %c0_116 = arith.constant 0 : index
    %c0_117 = arith.constant 0 : index
    %226 = vector.load %arg31[%c0_116, %c0_117] : memref<1x32xf32, #tpu.memory_space<vmem>>, vector<1x32xf32>
    %cst_118 = arith.constant dense<0.000000e+00> : vector<16x32xf32>
    %227 = tpu.matmul %219, %220, %cst_118 {dimension_numbers = #tpu.dot_dimension_numbers<[1], [0], [0], [1], [0, 0, 1, 1], [], []>} : vector<16x32xf32>, vector<32x32xf32>, vector<16x32xf32> -> vector<16x32xf32>
    %cst_119 = arith.constant dense<0.000000e+00> : vector<16x32xf32>
    %228 = tpu.matmul %219, %221, %cst_119 {dimension_numbers = #tpu.dot_dimension_numbers<[1], [0], [0], [1], [0, 0, 1, 1], [], []>} : vector<16x32xf32>, vector<32x32xf32>, vector<16x32xf32> -> vector<16x32xf32>
    %229 = vector.broadcast %222 : vector<1x32xf32> to vector<16x32xf32>
    %230 = arith.addf %228, %229 : vector<16x32xf32>
    %231 = vector.broadcast %223 : vector<1x32xf32> to vector<16x32xf32>
    %232 = arith.mulf %227, %231 : vector<16x32xf32>
    %cst_120 = arith.constant dense<0.000000e+00> : vector<16xf32>
    %233 = vector.multi_reduction <add>, %232, %cst_120 [1] : vector<16x32xf32> to vector<16xf32>
    %234 = vector.shape_cast %233 : vector<16xf32> to vector<16x1xf32>
    %cst_121 = arith.constant dense<0.000000e+00> : vector<1x16xf32>
    %235 = tpu.matmul %224, %227, %cst_121 {dimension_numbers = #tpu.dot_dimension_numbers<[1], [1], [0], [0], [0, 0, 1, 0], [], []>} : vector<1x32xf32>, vector<16x32xf32>, vector<1x16xf32> -> vector<1x16xf32>
    %236 = vector.broadcast %234 : vector<16x1xf32> to vector<16x16xf32>
    %237 = vector.broadcast %235 : vector<1x16xf32> to vector<16x16xf32>
    %238 = arith.addf %236, %237 : vector<16x16xf32>
    %cst_122 = arith.constant 0.000000e+00 : f32
    %239 = vector.broadcast %cst_122 : f32 to vector<16x16xf32>
    %240 = arith.cmpf ogt, %238, %239 : vector<16x16xf32>
    %cst_123 = arith.constant 2.000000e-01 : f32
    %241 = vector.broadcast %cst_123 : f32 to vector<16x16xf32>
    %242 = arith.mulf %241, %238 : vector<16x16xf32>
    %243 = arith.select %240, %238, %242 : vector<16x16xi1>, vector<16x16xf32>
    %244 = arith.addf %243, %5 : vector<16x16xf32>
    %cst_124 = arith.constant dense<0xFF800000> : vector<16xf32>
    %245 = vector.multi_reduction <maximumf>, %244, %cst_124 [1] : vector<16x16xf32> to vector<16xf32>
    %246 = vector.shape_cast %245 : vector<16xf32> to vector<16x1xf32>
    %247 = vector.broadcast %246 : vector<16x1xf32> to vector<16x16xf32>
    %248 = arith.subf %244, %247 : vector<16x16xf32>
    %249 = math.exp %248 : vector<16x16xf32>
    %cst_125 = arith.constant 0.000000e+00 : f32
    %250 = vector.broadcast %cst_125 : f32 to vector<16x16xf32>
    %251 = arith.select %2, %249, %250 : vector<16x16xi1>, vector<16x16xf32>
    %cst_126 = arith.constant dense<0.000000e+00> : vector<16xf32>
    %252 = vector.multi_reduction <add>, %251, %cst_126 [1] : vector<16x16xf32> to vector<16xf32>
    %253 = vector.shape_cast %252 : vector<16xf32> to vector<16x1xf32>
    %cst_127 = arith.constant 1.000000e-30 : f32
    %254 = vector.broadcast %cst_127 : f32 to vector<16x1xf32>
    %255 = arith.maximumf %253, %254 : vector<16x1xf32>
    %256 = tpu.reciprocal %255 {approx = true} : vector<16x1xf32> -> vector<16x1xf32>
    %257 = vector.broadcast %256 : vector<16x1xf32> to vector<16x16xf32>
    %258 = arith.mulf %251, %257 : vector<16x16xf32>
    %cst_128 = arith.constant dense<0.000000e+00> : vector<16x32xf32>
    %259 = tpu.matmul %258, %227, %cst_128 {dimension_numbers = #tpu.dot_dimension_numbers<[1], [0], [0], [1], [0, 0, 1, 1], [], []>} : vector<16x16xf32>, vector<16x32xf32>, vector<16x32xf32> -> vector<16x32xf32>
    %260 = arith.addf %259, %230 : vector<16x32xf32>
    %cst_129 = arith.constant dense<0.000000e+00> : vector<16xf32>
    %261 = vector.multi_reduction <add>, %260, %cst_129 [1] : vector<16x32xf32> to vector<16xf32>
    %262 = vector.shape_cast %261 : vector<16xf32> to vector<16x1xf32>
    %cst_130 = arith.constant 3.200000e+01 : f32
    %263 = vector.broadcast %cst_130 : f32 to vector<16x1xf32>
    %264 = arith.divf %262, %263 : vector<16x1xf32>
    %265 = vector.broadcast %264 : vector<16x1xf32> to vector<16x32xf32>
    %266 = arith.subf %260, %265 : vector<16x32xf32>
    %267 = arith.mulf %266, %266 : vector<16x32xf32>
    %cst_131 = arith.constant dense<0.000000e+00> : vector<16xf32>
    %268 = vector.multi_reduction <add>, %267, %cst_131 [1] : vector<16x32xf32> to vector<16xf32>
    %269 = vector.shape_cast %268 : vector<16xf32> to vector<16x1xf32>
    %cst_132 = arith.constant 3.200000e+01 : f32
    %270 = vector.broadcast %cst_132 : f32 to vector<16x1xf32>
    %271 = arith.divf %269, %270 : vector<16x1xf32>
    %272 = vector.broadcast %264 : vector<16x1xf32> to vector<16x32xf32>
    %273 = arith.subf %260, %272 : vector<16x32xf32>
    %cst_133 = arith.constant 9.99999974E-6 : f32
    %274 = vector.broadcast %cst_133 : f32 to vector<16x1xf32>
    %275 = arith.addf %271, %274 : vector<16x1xf32>
    %276 = math.rsqrt %275 : vector<16x1xf32>
    %277 = vector.broadcast %276 : vector<16x1xf32> to vector<16x32xf32>
    %278 = arith.mulf %273, %277 : vector<16x32xf32>
    %279 = vector.broadcast %225 : vector<1x32xf32> to vector<16x32xf32>
    %280 = arith.mulf %278, %279 : vector<16x32xf32>
    %281 = vector.broadcast %226 : vector<1x32xf32> to vector<16x32xf32>
    %282 = arith.addf %280, %281 : vector<16x32xf32>
    %cst_134 = arith.constant 0.000000e+00 : f32
    %283 = vector.broadcast %cst_134 : f32 to vector<16x32xf32>
    %284 = arith.cmpf ogt, %282, %283 : vector<16x32xf32>
    %cst_135 = arith.constant 0.000000e+00 : f32
    %285 = vector.broadcast %cst_135 : f32 to vector<16x32xf32>
    %286 = arith.minimumf %282, %285 : vector<16x32xf32>
    %287 = math.exp %286 : vector<16x32xf32>
    %cst_136 = arith.constant 1.000000e+00 : f32
    %288 = vector.broadcast %cst_136 : f32 to vector<16x32xf32>
    %289 = arith.subf %287, %288 : vector<16x32xf32>
    %290 = arith.select %284, %282, %289 : vector<16x32xi1>, vector<16x32xf32>
    %c0_137 = arith.constant 0 : index
    %c0_138 = arith.constant 0 : index
    %291 = vector.load %arg3[%c0_137, %c0_138] : memref<8x1xi32, #tpu.memory_space<vmem>>, vector<8x1xi32>
    %c0_139 = arith.constant 0 : index
    %c0_140 = arith.constant 0 : index
    %292 = vector.load %arg2[%c0_139, %c0_140] : memref<80x16xf32, #tpu.memory_space<vmem>>, vector<80x16xf32>
    %cst_141 = arith.constant dense<0.000000e+00> : vector<80x32xf32>
    %293 = tpu.matmul %292, %290, %cst_141 {dimension_numbers = #tpu.dot_dimension_numbers<[1], [0], [0], [1], [0, 0, 1, 1], [], []>} : vector<80x16xf32>, vector<16x32xf32>, vector<80x32xf32> -> vector<80x32xf32>
    %c0_142 = arith.constant 0 : index
    %c0_143 = arith.constant 0 : index
    %c0_144 = arith.constant 0 : index
    %294 = vector.load %arg32[%c0_142, %c0_143, %c0_144] : memref<4x32x32xf32, #tpu.memory_space<vmem>>, vector<1x32x32xf32>
    %295 = vector.shape_cast %294 : vector<1x32x32xf32> to vector<32x32xf32>
    %cst_145 = arith.constant dense<0.000000e+00> : vector<80x32xf32>
    %296 = tpu.matmul %293, %295, %cst_145 {dimension_numbers = #tpu.dot_dimension_numbers<[1], [0], [0], [1], [0, 0, 1, 1], [], []>} : vector<80x32xf32>, vector<32x32xf32>, vector<80x32xf32> -> vector<80x32xf32>
    %c0_146 = arith.constant 0 : index
    %c0_147 = arith.constant 0 : index
    %c0_148 = arith.constant 0 : index
    %297 = vector.load %arg34[%c0_146, %c0_147, %c0_148] : memref<4x1x32xf32, #tpu.memory_space<vmem>>, vector<1x1x32xf32>
    %298 = vector.shape_cast %297 : vector<1x1x32xf32> to vector<1x32xf32>
    %299 = vector.broadcast %298 : vector<1x32xf32> to vector<80x32xf32>
    %300 = arith.addf %296, %299 : vector<80x32xf32>
    %c1 = arith.constant 1 : index
    %c0_149 = arith.constant 0 : index
    %c0_150 = arith.constant 0 : index
    %301 = vector.load %arg32[%c1, %c0_149, %c0_150] : memref<4x32x32xf32, #tpu.memory_space<vmem>>, vector<1x32x32xf32>
    %302 = vector.shape_cast %301 : vector<1x32x32xf32> to vector<32x32xf32>
    %cst_151 = arith.constant dense<0.000000e+00> : vector<80x32xf32>
    %303 = tpu.matmul %293, %302, %cst_151 {dimension_numbers = #tpu.dot_dimension_numbers<[1], [0], [0], [1], [0, 0, 1, 1], [], []>} : vector<80x32xf32>, vector<32x32xf32>, vector<80x32xf32> -> vector<80x32xf32>
    %c1_152 = arith.constant 1 : index
    %c0_153 = arith.constant 0 : index
    %c0_154 = arith.constant 0 : index
    %304 = vector.load %arg34[%c1_152, %c0_153, %c0_154] : memref<4x1x32xf32, #tpu.memory_space<vmem>>, vector<1x1x32xf32>
    %305 = vector.shape_cast %304 : vector<1x1x32xf32> to vector<1x32xf32>
    %306 = vector.broadcast %305 : vector<1x32xf32> to vector<80x32xf32>
    %307 = arith.addf %303, %306 : vector<80x32xf32>
    %c2 = arith.constant 2 : index
    %c0_155 = arith.constant 0 : index
    %c0_156 = arith.constant 0 : index
    %308 = vector.load %arg32[%c2, %c0_155, %c0_156] : memref<4x32x32xf32, #tpu.memory_space<vmem>>, vector<1x32x32xf32>
    %309 = vector.shape_cast %308 : vector<1x32x32xf32> to vector<32x32xf32>
    %cst_157 = arith.constant dense<0.000000e+00> : vector<80x32xf32>
    %310 = tpu.matmul %293, %309, %cst_157 {dimension_numbers = #tpu.dot_dimension_numbers<[1], [0], [0], [1], [0, 0, 1, 1], [], []>} : vector<80x32xf32>, vector<32x32xf32>, vector<80x32xf32> -> vector<80x32xf32>
    %c2_158 = arith.constant 2 : index
    %c0_159 = arith.constant 0 : index
    %c0_160 = arith.constant 0 : index
    %311 = vector.load %arg34[%c2_158, %c0_159, %c0_160] : memref<4x1x32xf32, #tpu.memory_space<vmem>>, vector<1x1x32xf32>
    %312 = vector.shape_cast %311 : vector<1x1x32xf32> to vector<1x32xf32>
    %313 = vector.broadcast %312 : vector<1x32xf32> to vector<80x32xf32>
    %314 = arith.addf %310, %313 : vector<80x32xf32>
    %c3 = arith.constant 3 : index
    %c0_161 = arith.constant 0 : index
    %c0_162 = arith.constant 0 : index
    %315 = vector.load %arg32[%c3, %c0_161, %c0_162] : memref<4x32x32xf32, #tpu.memory_space<vmem>>, vector<1x32x32xf32>
    %316 = vector.shape_cast %315 : vector<1x32x32xf32> to vector<32x32xf32>
    %cst_163 = arith.constant dense<0.000000e+00> : vector<80x32xf32>
    %317 = tpu.matmul %293, %316, %cst_163 {dimension_numbers = #tpu.dot_dimension_numbers<[1], [0], [0], [1], [0, 0, 1, 1], [], []>} : vector<80x32xf32>, vector<32x32xf32>, vector<80x32xf32> -> vector<80x32xf32>
    %c3_164 = arith.constant 3 : index
    %c0_165 = arith.constant 0 : index
    %c0_166 = arith.constant 0 : index
    %318 = vector.load %arg34[%c3_164, %c0_165, %c0_166] : memref<4x1x32xf32, #tpu.memory_space<vmem>>, vector<1x1x32xf32>
    %319 = vector.shape_cast %318 : vector<1x1x32xf32> to vector<1x32xf32>
    %320 = vector.broadcast %319 : vector<1x32xf32> to vector<80x32xf32>
    %321 = arith.addf %317, %320 : vector<80x32xf32>
    %cst_167 = arith.constant 0.000000e+00 : f32
    %322 = vector.broadcast %cst_167 : f32 to vector<8x32xf32>
    %cst_168 = arith.constant 0.000000e+00 : f32
    %323 = vector.broadcast %cst_168 : f32 to vector<8x32xf32>
    %c0_169 = arith.constant 0 : index
    %c0_170 = arith.constant 0 : index
    %c0_171 = arith.constant 0 : index
    %324 = vector.load %arg33[%c0_169, %c0_170, %c0_171] : memref<4x32x32xf32, #tpu.memory_space<vmem>>, vector<1x32x32xf32>
    %325 = vector.shape_cast %324 : vector<1x32x32xf32> to vector<32x32xf32>
    %cst_172 = arith.constant dense<0.000000e+00> : vector<8x32xf32>
    %326 = tpu.matmul %322, %325, %cst_172 {dimension_numbers = #tpu.dot_dimension_numbers<[1], [0], [0], [1], [0, 0, 1, 1], [], []>} : vector<8x32xf32>, vector<32x32xf32>, vector<8x32xf32> -> vector<8x32xf32>
    %c1_173 = arith.constant 1 : index
    %c0_174 = arith.constant 0 : index
    %c0_175 = arith.constant 0 : index
    %327 = vector.load %arg33[%c1_173, %c0_174, %c0_175] : memref<4x32x32xf32, #tpu.memory_space<vmem>>, vector<1x32x32xf32>
    %328 = vector.shape_cast %327 : vector<1x32x32xf32> to vector<32x32xf32>
    %cst_176 = arith.constant dense<0.000000e+00> : vector<8x32xf32>
    %329 = tpu.matmul %322, %328, %cst_176 {dimension_numbers = #tpu.dot_dimension_numbers<[1], [0], [0], [1], [0, 0, 1, 1], [], []>} : vector<8x32xf32>, vector<32x32xf32>, vector<8x32xf32> -> vector<8x32xf32>
    %c2_177 = arith.constant 2 : index
    %c0_178 = arith.constant 0 : index
    %c0_179 = arith.constant 0 : index
    %330 = vector.load %arg33[%c2_177, %c0_178, %c0_179] : memref<4x32x32xf32, #tpu.memory_space<vmem>>, vector<1x32x32xf32>
    %331 = vector.shape_cast %330 : vector<1x32x32xf32> to vector<32x32xf32>
    %cst_180 = arith.constant dense<0.000000e+00> : vector<8x32xf32>
    %332 = tpu.matmul %322, %331, %cst_180 {dimension_numbers = #tpu.dot_dimension_numbers<[1], [0], [0], [1], [0, 0, 1, 1], [], []>} : vector<8x32xf32>, vector<32x32xf32>, vector<8x32xf32> -> vector<8x32xf32>
    %c3_181 = arith.constant 3 : index
    %c0_182 = arith.constant 0 : index
    %c0_183 = arith.constant 0 : index
    %333 = vector.load %arg33[%c3_181, %c0_182, %c0_183] : memref<4x32x32xf32, #tpu.memory_space<vmem>>, vector<1x32x32xf32>
    %334 = vector.shape_cast %333 : vector<1x32x32xf32> to vector<32x32xf32>
    %cst_184 = arith.constant dense<0.000000e+00> : vector<8x32xf32>
    %335 = tpu.matmul %322, %334, %cst_184 {dimension_numbers = #tpu.dot_dimension_numbers<[1], [0], [0], [1], [0, 0, 1, 1], [], []>} : vector<8x32xf32>, vector<32x32xf32>, vector<8x32xf32> -> vector<8x32xf32>
    %336 = vector.extract_strided_slice %300 {offsets = [0, 0], sizes = [8, 32], strides = [1, 1]} : vector<80x32xf32> to vector<8x32xf32>
    %337 = arith.addf %336, %326 : vector<8x32xf32>
    %338 = arith.negf %337 : vector<8x32xf32>
    %339 = math.exp %338 : vector<8x32xf32>
    %cst_185 = arith.constant 1.000000e+00 : f32
    %340 = vector.broadcast %cst_185 : f32 to vector<8x32xf32>
    %341 = arith.addf %340, %339 : vector<8x32xf32>
    %342 = arith.divf %340, %341 : vector<8x32xf32>
    %343 = vector.extract_strided_slice %307 {offsets = [0, 0], sizes = [8, 32], strides = [1, 1]} : vector<80x32xf32> to vector<8x32xf32>
    %344 = arith.addf %343, %329 : vector<8x32xf32>
    %345 = arith.negf %344 : vector<8x32xf32>
    %346 = math.exp %345 : vector<8x32xf32>
    %cst_186 = arith.constant 1.000000e+00 : f32
    %347 = vector.broadcast %cst_186 : f32 to vector<8x32xf32>
    %348 = arith.addf %347, %346 : vector<8x32xf32>
    %349 = arith.divf %347, %348 : vector<8x32xf32>
    %350 = vector.extract_strided_slice %314 {offsets = [0, 0], sizes = [8, 32], strides = [1, 1]} : vector<80x32xf32> to vector<8x32xf32>
    %351 = arith.addf %350, %332 : vector<8x32xf32>
    %352 = math.tanh %351 : vector<8x32xf32>
    %353 = vector.extract_strided_slice %321 {offsets = [0, 0], sizes = [8, 32], strides = [1, 1]} : vector<80x32xf32> to vector<8x32xf32>
    %354 = arith.addf %353, %335 : vector<8x32xf32>
    %355 = arith.negf %354 : vector<8x32xf32>
    %356 = math.exp %355 : vector<8x32xf32>
    %cst_187 = arith.constant 1.000000e+00 : f32
    %357 = vector.broadcast %cst_187 : f32 to vector<8x32xf32>
    %358 = arith.addf %357, %356 : vector<8x32xf32>
    %359 = arith.divf %357, %358 : vector<8x32xf32>
    %360 = arith.mulf %349, %323 : vector<8x32xf32>
    %361 = arith.mulf %342, %352 : vector<8x32xf32>
    %362 = arith.addf %360, %361 : vector<8x32xf32>
    %363 = math.tanh %362 : vector<8x32xf32>
    %364 = arith.mulf %359, %363 : vector<8x32xf32>
    %c0_i32 = arith.constant 0 : i32
    %365 = vector.broadcast %c0_i32 : i32 to vector<8x1xi32>
    %366 = arith.cmpi sgt, %291, %365 : vector<8x1xi32>
    %367 = vector.shape_cast %366 : vector<8x1xi1> to vector<8x1xi1>
    %368 = vector.broadcast %367 : vector<8x1xi1> to vector<8x32xi1>
    %369 = arith.select %368, %364, %322 : vector<8x32xi1>, vector<8x32xf32>
    %370 = vector.shape_cast %366 : vector<8x1xi1> to vector<8x1xi1>
    %371 = vector.broadcast %370 : vector<8x1xi1> to vector<8x32xi1>
    %372 = arith.select %371, %362, %323 : vector<8x32xi1>, vector<8x32xf32>
    %c0_188 = arith.constant 0 : index
    %c0_189 = arith.constant 0 : index
    %c0_190 = arith.constant 0 : index
    %373 = vector.load %arg33[%c0_188, %c0_189, %c0_190] : memref<4x32x32xf32, #tpu.memory_space<vmem>>, vector<1x32x32xf32>
    %374 = vector.shape_cast %373 : vector<1x32x32xf32> to vector<32x32xf32>
    %cst_191 = arith.constant dense<0.000000e+00> : vector<8x32xf32>
    %375 = tpu.matmul %369, %374, %cst_191 {dimension_numbers = #tpu.dot_dimension_numbers<[1], [0], [0], [1], [0, 0, 1, 1], [], []>} : vector<8x32xf32>, vector<32x32xf32>, vector<8x32xf32> -> vector<8x32xf32>
    %c1_192 = arith.constant 1 : index
    %c0_193 = arith.constant 0 : index
    %c0_194 = arith.constant 0 : index
    %376 = vector.load %arg33[%c1_192, %c0_193, %c0_194] : memref<4x32x32xf32, #tpu.memory_space<vmem>>, vector<1x32x32xf32>
    %377 = vector.shape_cast %376 : vector<1x32x32xf32> to vector<32x32xf32>
    %cst_195 = arith.constant dense<0.000000e+00> : vector<8x32xf32>
    %378 = tpu.matmul %369, %377, %cst_195 {dimension_numbers = #tpu.dot_dimension_numbers<[1], [0], [0], [1], [0, 0, 1, 1], [], []>} : vector<8x32xf32>, vector<32x32xf32>, vector<8x32xf32> -> vector<8x32xf32>
    %c2_196 = arith.constant 2 : index
    %c0_197 = arith.constant 0 : index
    %c0_198 = arith.constant 0 : index
    %379 = vector.load %arg33[%c2_196, %c0_197, %c0_198] : memref<4x32x32xf32, #tpu.memory_space<vmem>>, vector<1x32x32xf32>
    %380 = vector.shape_cast %379 : vector<1x32x32xf32> to vector<32x32xf32>
    %cst_199 = arith.constant dense<0.000000e+00> : vector<8x32xf32>
    %381 = tpu.matmul %369, %380, %cst_199 {dimension_numbers = #tpu.dot_dimension_numbers<[1], [0], [0], [1], [0, 0, 1, 1], [], []>} : vector<8x32xf32>, vector<32x32xf32>, vector<8x32xf32> -> vector<8x32xf32>
    %c3_200 = arith.constant 3 : index
    %c0_201 = arith.constant 0 : index
    %c0_202 = arith.constant 0 : index
    %382 = vector.load %arg33[%c3_200, %c0_201, %c0_202] : memref<4x32x32xf32, #tpu.memory_space<vmem>>, vector<1x32x32xf32>
    %383 = vector.shape_cast %382 : vector<1x32x32xf32> to vector<32x32xf32>
    %cst_203 = arith.constant dense<0.000000e+00> : vector<8x32xf32>
    %384 = tpu.matmul %369, %383, %cst_203 {dimension_numbers = #tpu.dot_dimension_numbers<[1], [0], [0], [1], [0, 0, 1, 1], [], []>} : vector<8x32xf32>, vector<32x32xf32>, vector<8x32xf32> -> vector<8x32xf32>
    %385 = vector.extract_strided_slice %300 {offsets = [8, 0], sizes = [8, 32], strides = [1, 1]} : vector<80x32xf32> to vector<8x32xf32>
    %386 = arith.addf %385, %375 : vector<8x32xf32>
    %387 = arith.negf %386 : vector<8x32xf32>
    %388 = math.exp %387 : vector<8x32xf32>
    %cst_204 = arith.constant 1.000000e+00 : f32
    %389 = vector.broadcast %cst_204 : f32 to vector<8x32xf32>
    %390 = arith.addf %389, %388 : vector<8x32xf32>
    %391 = arith.divf %389, %390 : vector<8x32xf32>
    %392 = vector.extract_strided_slice %307 {offsets = [8, 0], sizes = [8, 32], strides = [1, 1]} : vector<80x32xf32> to vector<8x32xf32>
    %393 = arith.addf %392, %378 : vector<8x32xf32>
    %394 = arith.negf %393 : vector<8x32xf32>
    %395 = math.exp %394 : vector<8x32xf32>
    %cst_205 = arith.constant 1.000000e+00 : f32
    %396 = vector.broadcast %cst_205 : f32 to vector<8x32xf32>
    %397 = arith.addf %396, %395 : vector<8x32xf32>
    %398 = arith.divf %396, %397 : vector<8x32xf32>
    %399 = vector.extract_strided_slice %314 {offsets = [8, 0], sizes = [8, 32], strides = [1, 1]} : vector<80x32xf32> to vector<8x32xf32>
    %400 = arith.addf %399, %381 : vector<8x32xf32>
    %401 = math.tanh %400 : vector<8x32xf32>
    %402 = vector.extract_strided_slice %321 {offsets = [8, 0], sizes = [8, 32], strides = [1, 1]} : vector<80x32xf32> to vector<8x32xf32>
    %403 = arith.addf %402, %384 : vector<8x32xf32>
    %404 = arith.negf %403 : vector<8x32xf32>
    %405 = math.exp %404 : vector<8x32xf32>
    %cst_206 = arith.constant 1.000000e+00 : f32
    %406 = vector.broadcast %cst_206 : f32 to vector<8x32xf32>
    %407 = arith.addf %406, %405 : vector<8x32xf32>
    %408 = arith.divf %406, %407 : vector<8x32xf32>
    %409 = arith.mulf %398, %372 : vector<8x32xf32>
    %410 = arith.mulf %391, %401 : vector<8x32xf32>
    %411 = arith.addf %409, %410 : vector<8x32xf32>
    %412 = math.tanh %411 : vector<8x32xf32>
    %413 = arith.mulf %408, %412 : vector<8x32xf32>
    %c1_i32 = arith.constant 1 : i32
    %414 = vector.broadcast %c1_i32 : i32 to vector<8x1xi32>
    %415 = arith.cmpi sgt, %291, %414 : vector<8x1xi32>
    %416 = vector.shape_cast %415 : vector<8x1xi1> to vector<8x1xi1>
    %417 = vector.broadcast %416 : vector<8x1xi1> to vector<8x32xi1>
    %418 = arith.select %417, %413, %369 : vector<8x32xi1>, vector<8x32xf32>
    %419 = vector.shape_cast %415 : vector<8x1xi1> to vector<8x1xi1>
    %420 = vector.broadcast %419 : vector<8x1xi1> to vector<8x32xi1>
    %421 = arith.select %420, %411, %372 : vector<8x32xi1>, vector<8x32xf32>
    %c0_207 = arith.constant 0 : index
    %c0_208 = arith.constant 0 : index
    %c0_209 = arith.constant 0 : index
    %422 = vector.load %arg33[%c0_207, %c0_208, %c0_209] : memref<4x32x32xf32, #tpu.memory_space<vmem>>, vector<1x32x32xf32>
    %423 = vector.shape_cast %422 : vector<1x32x32xf32> to vector<32x32xf32>
    %cst_210 = arith.constant dense<0.000000e+00> : vector<8x32xf32>
    %424 = tpu.matmul %418, %423, %cst_210 {dimension_numbers = #tpu.dot_dimension_numbers<[1], [0], [0], [1], [0, 0, 1, 1], [], []>} : vector<8x32xf32>, vector<32x32xf32>, vector<8x32xf32> -> vector<8x32xf32>
    %c1_211 = arith.constant 1 : index
    %c0_212 = arith.constant 0 : index
    %c0_213 = arith.constant 0 : index
    %425 = vector.load %arg33[%c1_211, %c0_212, %c0_213] : memref<4x32x32xf32, #tpu.memory_space<vmem>>, vector<1x32x32xf32>
    %426 = vector.shape_cast %425 : vector<1x32x32xf32> to vector<32x32xf32>
    %cst_214 = arith.constant dense<0.000000e+00> : vector<8x32xf32>
    %427 = tpu.matmul %418, %426, %cst_214 {dimension_numbers = #tpu.dot_dimension_numbers<[1], [0], [0], [1], [0, 0, 1, 1], [], []>} : vector<8x32xf32>, vector<32x32xf32>, vector<8x32xf32> -> vector<8x32xf32>
    %c2_215 = arith.constant 2 : index
    %c0_216 = arith.constant 0 : index
    %c0_217 = arith.constant 0 : index
    %428 = vector.load %arg33[%c2_215, %c0_216, %c0_217] : memref<4x32x32xf32, #tpu.memory_space<vmem>>, vector<1x32x32xf32>
    %429 = vector.shape_cast %428 : vector<1x32x32xf32> to vector<32x32xf32>
    %cst_218 = arith.constant dense<0.000000e+00> : vector<8x32xf32>
    %430 = tpu.matmul %418, %429, %cst_218 {dimension_numbers = #tpu.dot_dimension_numbers<[1], [0], [0], [1], [0, 0, 1, 1], [], []>} : vector<8x32xf32>, vector<32x32xf32>, vector<8x32xf32> -> vector<8x32xf32>
    %c3_219 = arith.constant 3 : index
    %c0_220 = arith.constant 0 : index
    %c0_221 = arith.constant 0 : index
    %431 = vector.load %arg33[%c3_219, %c0_220, %c0_221] : memref<4x32x32xf32, #tpu.memory_space<vmem>>, vector<1x32x32xf32>
    %432 = vector.shape_cast %431 : vector<1x32x32xf32> to vector<32x32xf32>
    %cst_222 = arith.constant dense<0.000000e+00> : vector<8x32xf32>
    %433 = tpu.matmul %418, %432, %cst_222 {dimension_numbers = #tpu.dot_dimension_numbers<[1], [0], [0], [1], [0, 0, 1, 1], [], []>} : vector<8x32xf32>, vector<32x32xf32>, vector<8x32xf32> -> vector<8x32xf32>
    %434 = vector.extract_strided_slice %300 {offsets = [16, 0], sizes = [8, 32], strides = [1, 1]} : vector<80x32xf32> to vector<8x32xf32>
    %435 = arith.addf %434, %424 : vector<8x32xf32>
    %436 = arith.negf %435 : vector<8x32xf32>
    %437 = math.exp %436 : vector<8x32xf32>
    %cst_223 = arith.constant 1.000000e+00 : f32
    %438 = vector.broadcast %cst_223 : f32 to vector<8x32xf32>
    %439 = arith.addf %438, %437 : vector<8x32xf32>
    %440 = arith.divf %438, %439 : vector<8x32xf32>
    %441 = vector.extract_strided_slice %307 {offsets = [16, 0], sizes = [8, 32], strides = [1, 1]} : vector<80x32xf32> to vector<8x32xf32>
    %442 = arith.addf %441, %427 : vector<8x32xf32>
    %443 = arith.negf %442 : vector<8x32xf32>
    %444 = math.exp %443 : vector<8x32xf32>
    %cst_224 = arith.constant 1.000000e+00 : f32
    %445 = vector.broadcast %cst_224 : f32 to vector<8x32xf32>
    %446 = arith.addf %445, %444 : vector<8x32xf32>
    %447 = arith.divf %445, %446 : vector<8x32xf32>
    %448 = vector.extract_strided_slice %314 {offsets = [16, 0], sizes = [8, 32], strides = [1, 1]} : vector<80x32xf32> to vector<8x32xf32>
    %449 = arith.addf %448, %430 : vector<8x32xf32>
    %450 = math.tanh %449 : vector<8x32xf32>
    %451 = vector.extract_strided_slice %321 {offsets = [16, 0], sizes = [8, 32], strides = [1, 1]} : vector<80x32xf32> to vector<8x32xf32>
    %452 = arith.addf %451, %433 : vector<8x32xf32>
    %453 = arith.negf %452 : vector<8x32xf32>
    %454 = math.exp %453 : vector<8x32xf32>
    %cst_225 = arith.constant 1.000000e+00 : f32
    %455 = vector.broadcast %cst_225 : f32 to vector<8x32xf32>
    %456 = arith.addf %455, %454 : vector<8x32xf32>
    %457 = arith.divf %455, %456 : vector<8x32xf32>
    %458 = arith.mulf %447, %421 : vector<8x32xf32>
    %459 = arith.mulf %440, %450 : vector<8x32xf32>
    %460 = arith.addf %458, %459 : vector<8x32xf32>
    %461 = math.tanh %460 : vector<8x32xf32>
    %462 = arith.mulf %457, %461 : vector<8x32xf32>
    %c2_i32 = arith.constant 2 : i32
    %463 = vector.broadcast %c2_i32 : i32 to vector<8x1xi32>
    %464 = arith.cmpi sgt, %291, %463 : vector<8x1xi32>
    %465 = vector.shape_cast %464 : vector<8x1xi1> to vector<8x1xi1>
    %466 = vector.broadcast %465 : vector<8x1xi1> to vector<8x32xi1>
    %467 = arith.select %466, %462, %418 : vector<8x32xi1>, vector<8x32xf32>
    %468 = vector.shape_cast %464 : vector<8x1xi1> to vector<8x1xi1>
    %469 = vector.broadcast %468 : vector<8x1xi1> to vector<8x32xi1>
    %470 = arith.select %469, %460, %421 : vector<8x32xi1>, vector<8x32xf32>
    %c0_226 = arith.constant 0 : index
    %c0_227 = arith.constant 0 : index
    %c0_228 = arith.constant 0 : index
    %471 = vector.load %arg33[%c0_226, %c0_227, %c0_228] : memref<4x32x32xf32, #tpu.memory_space<vmem>>, vector<1x32x32xf32>
    %472 = vector.shape_cast %471 : vector<1x32x32xf32> to vector<32x32xf32>
    %cst_229 = arith.constant dense<0.000000e+00> : vector<8x32xf32>
    %473 = tpu.matmul %467, %472, %cst_229 {dimension_numbers = #tpu.dot_dimension_numbers<[1], [0], [0], [1], [0, 0, 1, 1], [], []>} : vector<8x32xf32>, vector<32x32xf32>, vector<8x32xf32> -> vector<8x32xf32>
    %c1_230 = arith.constant 1 : index
    %c0_231 = arith.constant 0 : index
    %c0_232 = arith.constant 0 : index
    %474 = vector.load %arg33[%c1_230, %c0_231, %c0_232] : memref<4x32x32xf32, #tpu.memory_space<vmem>>, vector<1x32x32xf32>
    %475 = vector.shape_cast %474 : vector<1x32x32xf32> to vector<32x32xf32>
    %cst_233 = arith.constant dense<0.000000e+00> : vector<8x32xf32>
    %476 = tpu.matmul %467, %475, %cst_233 {dimension_numbers = #tpu.dot_dimension_numbers<[1], [0], [0], [1], [0, 0, 1, 1], [], []>} : vector<8x32xf32>, vector<32x32xf32>, vector<8x32xf32> -> vector<8x32xf32>
    %c2_234 = arith.constant 2 : index
    %c0_235 = arith.constant 0 : index
    %c0_236 = arith.constant 0 : index
    %477 = vector.load %arg33[%c2_234, %c0_235, %c0_236] : memref<4x32x32xf32, #tpu.memory_space<vmem>>, vector<1x32x32xf32>
    %478 = vector.shape_cast %477 : vector<1x32x32xf32> to vector<32x32xf32>
    %cst_237 = arith.constant dense<0.000000e+00> : vector<8x32xf32>
    %479 = tpu.matmul %467, %478, %cst_237 {dimension_numbers = #tpu.dot_dimension_numbers<[1], [0], [0], [1], [0, 0, 1, 1], [], []>} : vector<8x32xf32>, vector<32x32xf32>, vector<8x32xf32> -> vector<8x32xf32>
    %c3_238 = arith.constant 3 : index
    %c0_239 = arith.constant 0 : index
    %c0_240 = arith.constant 0 : index
    %480 = vector.load %arg33[%c3_238, %c0_239, %c0_240] : memref<4x32x32xf32, #tpu.memory_space<vmem>>, vector<1x32x32xf32>
    %481 = vector.shape_cast %480 : vector<1x32x32xf32> to vector<32x32xf32>
    %cst_241 = arith.constant dense<0.000000e+00> : vector<8x32xf32>
    %482 = tpu.matmul %467, %481, %cst_241 {dimension_numbers = #tpu.dot_dimension_numbers<[1], [0], [0], [1], [0, 0, 1, 1], [], []>} : vector<8x32xf32>, vector<32x32xf32>, vector<8x32xf32> -> vector<8x32xf32>
    %483 = vector.extract_strided_slice %300 {offsets = [24, 0], sizes = [8, 32], strides = [1, 1]} : vector<80x32xf32> to vector<8x32xf32>
    %484 = arith.addf %483, %473 : vector<8x32xf32>
    %485 = arith.negf %484 : vector<8x32xf32>
    %486 = math.exp %485 : vector<8x32xf32>
    %cst_242 = arith.constant 1.000000e+00 : f32
    %487 = vector.broadcast %cst_242 : f32 to vector<8x32xf32>
    %488 = arith.addf %487, %486 : vector<8x32xf32>
    %489 = arith.divf %487, %488 : vector<8x32xf32>
    %490 = vector.extract_strided_slice %307 {offsets = [24, 0], sizes = [8, 32], strides = [1, 1]} : vector<80x32xf32> to vector<8x32xf32>
    %491 = arith.addf %490, %476 : vector<8x32xf32>
    %492 = arith.negf %491 : vector<8x32xf32>
    %493 = math.exp %492 : vector<8x32xf32>
    %cst_243 = arith.constant 1.000000e+00 : f32
    %494 = vector.broadcast %cst_243 : f32 to vector<8x32xf32>
    %495 = arith.addf %494, %493 : vector<8x32xf32>
    %496 = arith.divf %494, %495 : vector<8x32xf32>
    %497 = vector.extract_strided_slice %314 {offsets = [24, 0], sizes = [8, 32], strides = [1, 1]} : vector<80x32xf32> to vector<8x32xf32>
    %498 = arith.addf %497, %479 : vector<8x32xf32>
    %499 = math.tanh %498 : vector<8x32xf32>
    %500 = vector.extract_strided_slice %321 {offsets = [24, 0], sizes = [8, 32], strides = [1, 1]} : vector<80x32xf32> to vector<8x32xf32>
    %501 = arith.addf %500, %482 : vector<8x32xf32>
    %502 = arith.negf %501 : vector<8x32xf32>
    %503 = math.exp %502 : vector<8x32xf32>
    %cst_244 = arith.constant 1.000000e+00 : f32
    %504 = vector.broadcast %cst_244 : f32 to vector<8x32xf32>
    %505 = arith.addf %504, %503 : vector<8x32xf32>
    %506 = arith.divf %504, %505 : vector<8x32xf32>
    %507 = arith.mulf %496, %470 : vector<8x32xf32>
    %508 = arith.mulf %489, %499 : vector<8x32xf32>
    %509 = arith.addf %507, %508 : vector<8x32xf32>
    %510 = math.tanh %509 : vector<8x32xf32>
    %511 = arith.mulf %506, %510 : vector<8x32xf32>
    %c3_i32 = arith.constant 3 : i32
    %512 = vector.broadcast %c3_i32 : i32 to vector<8x1xi32>
    %513 = arith.cmpi sgt, %291, %512 : vector<8x1xi32>
    %514 = vector.shape_cast %513 : vector<8x1xi1> to vector<8x1xi1>
    %515 = vector.broadcast %514 : vector<8x1xi1> to vector<8x32xi1>
    %516 = arith.select %515, %511, %467 : vector<8x32xi1>, vector<8x32xf32>
    %517 = vector.shape_cast %513 : vector<8x1xi1> to vector<8x1xi1>
    %518 = vector.broadcast %517 : vector<8x1xi1> to vector<8x32xi1>
    %519 = arith.select %518, %509, %470 : vector<8x32xi1>, vector<8x32xf32>
    %c0_245 = arith.constant 0 : index
    %c0_246 = arith.constant 0 : index
    %c0_247 = arith.constant 0 : index
    %520 = vector.load %arg33[%c0_245, %c0_246, %c0_247] : memref<4x32x32xf32, #tpu.memory_space<vmem>>, vector<1x32x32xf32>
    %521 = vector.shape_cast %520 : vector<1x32x32xf32> to vector<32x32xf32>
    %cst_248 = arith.constant dense<0.000000e+00> : vector<8x32xf32>
    %522 = tpu.matmul %516, %521, %cst_248 {dimension_numbers = #tpu.dot_dimension_numbers<[1], [0], [0], [1], [0, 0, 1, 1], [], []>} : vector<8x32xf32>, vector<32x32xf32>, vector<8x32xf32> -> vector<8x32xf32>
    %c1_249 = arith.constant 1 : index
    %c0_250 = arith.constant 0 : index
    %c0_251 = arith.constant 0 : index
    %523 = vector.load %arg33[%c1_249, %c0_250, %c0_251] : memref<4x32x32xf32, #tpu.memory_space<vmem>>, vector<1x32x32xf32>
    %524 = vector.shape_cast %523 : vector<1x32x32xf32> to vector<32x32xf32>
    %cst_252 = arith.constant dense<0.000000e+00> : vector<8x32xf32>
    %525 = tpu.matmul %516, %524, %cst_252 {dimension_numbers = #tpu.dot_dimension_numbers<[1], [0], [0], [1], [0, 0, 1, 1], [], []>} : vector<8x32xf32>, vector<32x32xf32>, vector<8x32xf32> -> vector<8x32xf32>
    %c2_253 = arith.constant 2 : index
    %c0_254 = arith.constant 0 : index
    %c0_255 = arith.constant 0 : index
    %526 = vector.load %arg33[%c2_253, %c0_254, %c0_255] : memref<4x32x32xf32, #tpu.memory_space<vmem>>, vector<1x32x32xf32>
    %527 = vector.shape_cast %526 : vector<1x32x32xf32> to vector<32x32xf32>
    %cst_256 = arith.constant dense<0.000000e+00> : vector<8x32xf32>
    %528 = tpu.matmul %516, %527, %cst_256 {dimension_numbers = #tpu.dot_dimension_numbers<[1], [0], [0], [1], [0, 0, 1, 1], [], []>} : vector<8x32xf32>, vector<32x32xf32>, vector<8x32xf32> -> vector<8x32xf32>
    %c3_257 = arith.constant 3 : index
    %c0_258 = arith.constant 0 : index
    %c0_259 = arith.constant 0 : index
    %529 = vector.load %arg33[%c3_257, %c0_258, %c0_259] : memref<4x32x32xf32, #tpu.memory_space<vmem>>, vector<1x32x32xf32>
    %530 = vector.shape_cast %529 : vector<1x32x32xf32> to vector<32x32xf32>
    %cst_260 = arith.constant dense<0.000000e+00> : vector<8x32xf32>
    %531 = tpu.matmul %516, %530, %cst_260 {dimension_numbers = #tpu.dot_dimension_numbers<[1], [0], [0], [1], [0, 0, 1, 1], [], []>} : vector<8x32xf32>, vector<32x32xf32>, vector<8x32xf32> -> vector<8x32xf32>
    %532 = vector.extract_strided_slice %300 {offsets = [32, 0], sizes = [8, 32], strides = [1, 1]} : vector<80x32xf32> to vector<8x32xf32>
    %533 = arith.addf %532, %522 : vector<8x32xf32>
    %534 = arith.negf %533 : vector<8x32xf32>
    %535 = math.exp %534 : vector<8x32xf32>
    %cst_261 = arith.constant 1.000000e+00 : f32
    %536 = vector.broadcast %cst_261 : f32 to vector<8x32xf32>
    %537 = arith.addf %536, %535 : vector<8x32xf32>
    %538 = arith.divf %536, %537 : vector<8x32xf32>
    %539 = vector.extract_strided_slice %307 {offsets = [32, 0], sizes = [8, 32], strides = [1, 1]} : vector<80x32xf32> to vector<8x32xf32>
    %540 = arith.addf %539, %525 : vector<8x32xf32>
    %541 = arith.negf %540 : vector<8x32xf32>
    %542 = math.exp %541 : vector<8x32xf32>
    %cst_262 = arith.constant 1.000000e+00 : f32
    %543 = vector.broadcast %cst_262 : f32 to vector<8x32xf32>
    %544 = arith.addf %543, %542 : vector<8x32xf32>
    %545 = arith.divf %543, %544 : vector<8x32xf32>
    %546 = vector.extract_strided_slice %314 {offsets = [32, 0], sizes = [8, 32], strides = [1, 1]} : vector<80x32xf32> to vector<8x32xf32>
    %547 = arith.addf %546, %528 : vector<8x32xf32>
    %548 = math.tanh %547 : vector<8x32xf32>
    %549 = vector.extract_strided_slice %321 {offsets = [32, 0], sizes = [8, 32], strides = [1, 1]} : vector<80x32xf32> to vector<8x32xf32>
    %550 = arith.addf %549, %531 : vector<8x32xf32>
    %551 = arith.negf %550 : vector<8x32xf32>
    %552 = math.exp %551 : vector<8x32xf32>
    %cst_263 = arith.constant 1.000000e+00 : f32
    %553 = vector.broadcast %cst_263 : f32 to vector<8x32xf32>
    %554 = arith.addf %553, %552 : vector<8x32xf32>
    %555 = arith.divf %553, %554 : vector<8x32xf32>
    %556 = arith.mulf %545, %519 : vector<8x32xf32>
    %557 = arith.mulf %538, %548 : vector<8x32xf32>
    %558 = arith.addf %556, %557 : vector<8x32xf32>
    %559 = math.tanh %558 : vector<8x32xf32>
    %560 = arith.mulf %555, %559 : vector<8x32xf32>
    %c4_i32 = arith.constant 4 : i32
    %561 = vector.broadcast %c4_i32 : i32 to vector<8x1xi32>
    %562 = arith.cmpi sgt, %291, %561 : vector<8x1xi32>
    %563 = vector.shape_cast %562 : vector<8x1xi1> to vector<8x1xi1>
    %564 = vector.broadcast %563 : vector<8x1xi1> to vector<8x32xi1>
    %565 = arith.select %564, %560, %516 : vector<8x32xi1>, vector<8x32xf32>
    %566 = vector.shape_cast %562 : vector<8x1xi1> to vector<8x1xi1>
    %567 = vector.broadcast %566 : vector<8x1xi1> to vector<8x32xi1>
    %568 = arith.select %567, %558, %519 : vector<8x32xi1>, vector<8x32xf32>
    %c0_264 = arith.constant 0 : index
    %c0_265 = arith.constant 0 : index
    %c0_266 = arith.constant 0 : index
    %569 = vector.load %arg33[%c0_264, %c0_265, %c0_266] : memref<4x32x32xf32, #tpu.memory_space<vmem>>, vector<1x32x32xf32>
    %570 = vector.shape_cast %569 : vector<1x32x32xf32> to vector<32x32xf32>
    %cst_267 = arith.constant dense<0.000000e+00> : vector<8x32xf32>
    %571 = tpu.matmul %565, %570, %cst_267 {dimension_numbers = #tpu.dot_dimension_numbers<[1], [0], [0], [1], [0, 0, 1, 1], [], []>} : vector<8x32xf32>, vector<32x32xf32>, vector<8x32xf32> -> vector<8x32xf32>
    %c1_268 = arith.constant 1 : index
    %c0_269 = arith.constant 0 : index
    %c0_270 = arith.constant 0 : index
    %572 = vector.load %arg33[%c1_268, %c0_269, %c0_270] : memref<4x32x32xf32, #tpu.memory_space<vmem>>, vector<1x32x32xf32>
    %573 = vector.shape_cast %572 : vector<1x32x32xf32> to vector<32x32xf32>
    %cst_271 = arith.constant dense<0.000000e+00> : vector<8x32xf32>
    %574 = tpu.matmul %565, %573, %cst_271 {dimension_numbers = #tpu.dot_dimension_numbers<[1], [0], [0], [1], [0, 0, 1, 1], [], []>} : vector<8x32xf32>, vector<32x32xf32>, vector<8x32xf32> -> vector<8x32xf32>
    %c2_272 = arith.constant 2 : index
    %c0_273 = arith.constant 0 : index
    %c0_274 = arith.constant 0 : index
    %575 = vector.load %arg33[%c2_272, %c0_273, %c0_274] : memref<4x32x32xf32, #tpu.memory_space<vmem>>, vector<1x32x32xf32>
    %576 = vector.shape_cast %575 : vector<1x32x32xf32> to vector<32x32xf32>
    %cst_275 = arith.constant dense<0.000000e+00> : vector<8x32xf32>
    %577 = tpu.matmul %565, %576, %cst_275 {dimension_numbers = #tpu.dot_dimension_numbers<[1], [0], [0], [1], [0, 0, 1, 1], [], []>} : vector<8x32xf32>, vector<32x32xf32>, vector<8x32xf32> -> vector<8x32xf32>
    %c3_276 = arith.constant 3 : index
    %c0_277 = arith.constant 0 : index
    %c0_278 = arith.constant 0 : index
    %578 = vector.load %arg33[%c3_276, %c0_277, %c0_278] : memref<4x32x32xf32, #tpu.memory_space<vmem>>, vector<1x32x32xf32>
    %579 = vector.shape_cast %578 : vector<1x32x32xf32> to vector<32x32xf32>
    %cst_279 = arith.constant dense<0.000000e+00> : vector<8x32xf32>
    %580 = tpu.matmul %565, %579, %cst_279 {dimension_numbers = #tpu.dot_dimension_numbers<[1], [0], [0], [1], [0, 0, 1, 1], [], []>} : vector<8x32xf32>, vector<32x32xf32>, vector<8x32xf32> -> vector<8x32xf32>
    %581 = vector.extract_strided_slice %300 {offsets = [40, 0], sizes = [8, 32], strides = [1, 1]} : vector<80x32xf32> to vector<8x32xf32>
    %582 = arith.addf %581, %571 : vector<8x32xf32>
    %583 = arith.negf %582 : vector<8x32xf32>
    %584 = math.exp %583 : vector<8x32xf32>
    %cst_280 = arith.constant 1.000000e+00 : f32
    %585 = vector.broadcast %cst_280 : f32 to vector<8x32xf32>
    %586 = arith.addf %585, %584 : vector<8x32xf32>
    %587 = arith.divf %585, %586 : vector<8x32xf32>
    %588 = vector.extract_strided_slice %307 {offsets = [40, 0], sizes = [8, 32], strides = [1, 1]} : vector<80x32xf32> to vector<8x32xf32>
    %589 = arith.addf %588, %574 : vector<8x32xf32>
    %590 = arith.negf %589 : vector<8x32xf32>
    %591 = math.exp %590 : vector<8x32xf32>
    %cst_281 = arith.constant 1.000000e+00 : f32
    %592 = vector.broadcast %cst_281 : f32 to vector<8x32xf32>
    %593 = arith.addf %592, %591 : vector<8x32xf32>
    %594 = arith.divf %592, %593 : vector<8x32xf32>
    %595 = vector.extract_strided_slice %314 {offsets = [40, 0], sizes = [8, 32], strides = [1, 1]} : vector<80x32xf32> to vector<8x32xf32>
    %596 = arith.addf %595, %577 : vector<8x32xf32>
    %597 = math.tanh %596 : vector<8x32xf32>
    %598 = vector.extract_strided_slice %321 {offsets = [40, 0], sizes = [8, 32], strides = [1, 1]} : vector<80x32xf32> to vector<8x32xf32>
    %599 = arith.addf %598, %580 : vector<8x32xf32>
    %600 = arith.negf %599 : vector<8x32xf32>
    %601 = math.exp %600 : vector<8x32xf32>
    %cst_282 = arith.constant 1.000000e+00 : f32
    %602 = vector.broadcast %cst_282 : f32 to vector<8x32xf32>
    %603 = arith.addf %602, %601 : vector<8x32xf32>
    %604 = arith.divf %602, %603 : vector<8x32xf32>
    %605 = arith.mulf %594, %568 : vector<8x32xf32>
    %606 = arith.mulf %587, %597 : vector<8x32xf32>
    %607 = arith.addf %605, %606 : vector<8x32xf32>
    %608 = math.tanh %607 : vector<8x32xf32>
    %609 = arith.mulf %604, %608 : vector<8x32xf32>
    %c5_i32 = arith.constant 5 : i32
    %610 = vector.broadcast %c5_i32 : i32 to vector<8x1xi32>
    %611 = arith.cmpi sgt, %291, %610 : vector<8x1xi32>
    %612 = vector.shape_cast %611 : vector<8x1xi1> to vector<8x1xi1>
    %613 = vector.broadcast %612 : vector<8x1xi1> to vector<8x32xi1>
    %614 = arith.select %613, %609, %565 : vector<8x32xi1>, vector<8x32xf32>
    %615 = vector.shape_cast %611 : vector<8x1xi1> to vector<8x1xi1>
    %616 = vector.broadcast %615 : vector<8x1xi1> to vector<8x32xi1>
    %617 = arith.select %616, %607, %568 : vector<8x32xi1>, vector<8x32xf32>
    %c0_283 = arith.constant 0 : index
    %c0_284 = arith.constant 0 : index
    %c0_285 = arith.constant 0 : index
    %618 = vector.load %arg33[%c0_283, %c0_284, %c0_285] : memref<4x32x32xf32, #tpu.memory_space<vmem>>, vector<1x32x32xf32>
    %619 = vector.shape_cast %618 : vector<1x32x32xf32> to vector<32x32xf32>
    %cst_286 = arith.constant dense<0.000000e+00> : vector<8x32xf32>
    %620 = tpu.matmul %614, %619, %cst_286 {dimension_numbers = #tpu.dot_dimension_numbers<[1], [0], [0], [1], [0, 0, 1, 1], [], []>} : vector<8x32xf32>, vector<32x32xf32>, vector<8x32xf32> -> vector<8x32xf32>
    %c1_287 = arith.constant 1 : index
    %c0_288 = arith.constant 0 : index
    %c0_289 = arith.constant 0 : index
    %621 = vector.load %arg33[%c1_287, %c0_288, %c0_289] : memref<4x32x32xf32, #tpu.memory_space<vmem>>, vector<1x32x32xf32>
    %622 = vector.shape_cast %621 : vector<1x32x32xf32> to vector<32x32xf32>
    %cst_290 = arith.constant dense<0.000000e+00> : vector<8x32xf32>
    %623 = tpu.matmul %614, %622, %cst_290 {dimension_numbers = #tpu.dot_dimension_numbers<[1], [0], [0], [1], [0, 0, 1, 1], [], []>} : vector<8x32xf32>, vector<32x32xf32>, vector<8x32xf32> -> vector<8x32xf32>
    %c2_291 = arith.constant 2 : index
    %c0_292 = arith.constant 0 : index
    %c0_293 = arith.constant 0 : index
    %624 = vector.load %arg33[%c2_291, %c0_292, %c0_293] : memref<4x32x32xf32, #tpu.memory_space<vmem>>, vector<1x32x32xf32>
    %625 = vector.shape_cast %624 : vector<1x32x32xf32> to vector<32x32xf32>
    %cst_294 = arith.constant dense<0.000000e+00> : vector<8x32xf32>
    %626 = tpu.matmul %614, %625, %cst_294 {dimension_numbers = #tpu.dot_dimension_numbers<[1], [0], [0], [1], [0, 0, 1, 1], [], []>} : vector<8x32xf32>, vector<32x32xf32>, vector<8x32xf32> -> vector<8x32xf32>
    %c3_295 = arith.constant 3 : index
    %c0_296 = arith.constant 0 : index
    %c0_297 = arith.constant 0 : index
    %627 = vector.load %arg33[%c3_295, %c0_296, %c0_297] : memref<4x32x32xf32, #tpu.memory_space<vmem>>, vector<1x32x32xf32>
    %628 = vector.shape_cast %627 : vector<1x32x32xf32> to vector<32x32xf32>
    %cst_298 = arith.constant dense<0.000000e+00> : vector<8x32xf32>
    %629 = tpu.matmul %614, %628, %cst_298 {dimension_numbers = #tpu.dot_dimension_numbers<[1], [0], [0], [1], [0, 0, 1, 1], [], []>} : vector<8x32xf32>, vector<32x32xf32>, vector<8x32xf32> -> vector<8x32xf32>
    %630 = vector.extract_strided_slice %300 {offsets = [48, 0], sizes = [8, 32], strides = [1, 1]} : vector<80x32xf32> to vector<8x32xf32>
    %631 = arith.addf %630, %620 : vector<8x32xf32>
    %632 = arith.negf %631 : vector<8x32xf32>
    %633 = math.exp %632 : vector<8x32xf32>
    %cst_299 = arith.constant 1.000000e+00 : f32
    %634 = vector.broadcast %cst_299 : f32 to vector<8x32xf32>
    %635 = arith.addf %634, %633 : vector<8x32xf32>
    %636 = arith.divf %634, %635 : vector<8x32xf32>
    %637 = vector.extract_strided_slice %307 {offsets = [48, 0], sizes = [8, 32], strides = [1, 1]} : vector<80x32xf32> to vector<8x32xf32>
    %638 = arith.addf %637, %623 : vector<8x32xf32>
    %639 = arith.negf %638 : vector<8x32xf32>
    %640 = math.exp %639 : vector<8x32xf32>
    %cst_300 = arith.constant 1.000000e+00 : f32
    %641 = vector.broadcast %cst_300 : f32 to vector<8x32xf32>
    %642 = arith.addf %641, %640 : vector<8x32xf32>
    %643 = arith.divf %641, %642 : vector<8x32xf32>
    %644 = vector.extract_strided_slice %314 {offsets = [48, 0], sizes = [8, 32], strides = [1, 1]} : vector<80x32xf32> to vector<8x32xf32>
    %645 = arith.addf %644, %626 : vector<8x32xf32>
    %646 = math.tanh %645 : vector<8x32xf32>
    %647 = vector.extract_strided_slice %321 {offsets = [48, 0], sizes = [8, 32], strides = [1, 1]} : vector<80x32xf32> to vector<8x32xf32>
    %648 = arith.addf %647, %629 : vector<8x32xf32>
    %649 = arith.negf %648 : vector<8x32xf32>
    %650 = math.exp %649 : vector<8x32xf32>
    %cst_301 = arith.constant 1.000000e+00 : f32
    %651 = vector.broadcast %cst_301 : f32 to vector<8x32xf32>
    %652 = arith.addf %651, %650 : vector<8x32xf32>
    %653 = arith.divf %651, %652 : vector<8x32xf32>
    %654 = arith.mulf %643, %617 : vector<8x32xf32>
    %655 = arith.mulf %636, %646 : vector<8x32xf32>
    %656 = arith.addf %654, %655 : vector<8x32xf32>
    %657 = math.tanh %656 : vector<8x32xf32>
    %658 = arith.mulf %653, %657 : vector<8x32xf32>
    %c6_i32 = arith.constant 6 : i32
    %659 = vector.broadcast %c6_i32 : i32 to vector<8x1xi32>
    %660 = arith.cmpi sgt, %291, %659 : vector<8x1xi32>
    %661 = vector.shape_cast %660 : vector<8x1xi1> to vector<8x1xi1>
    %662 = vector.broadcast %661 : vector<8x1xi1> to vector<8x32xi1>
    %663 = arith.select %662, %658, %614 : vector<8x32xi1>, vector<8x32xf32>
    %664 = vector.shape_cast %660 : vector<8x1xi1> to vector<8x1xi1>
    %665 = vector.broadcast %664 : vector<8x1xi1> to vector<8x32xi1>
    %666 = arith.select %665, %656, %617 : vector<8x32xi1>, vector<8x32xf32>
    %c0_302 = arith.constant 0 : index
    %c0_303 = arith.constant 0 : index
    %c0_304 = arith.constant 0 : index
    %667 = vector.load %arg33[%c0_302, %c0_303, %c0_304] : memref<4x32x32xf32, #tpu.memory_space<vmem>>, vector<1x32x32xf32>
    %668 = vector.shape_cast %667 : vector<1x32x32xf32> to vector<32x32xf32>
    %cst_305 = arith.constant dense<0.000000e+00> : vector<8x32xf32>
    %669 = tpu.matmul %663, %668, %cst_305 {dimension_numbers = #tpu.dot_dimension_numbers<[1], [0], [0], [1], [0, 0, 1, 1], [], []>} : vector<8x32xf32>, vector<32x32xf32>, vector<8x32xf32> -> vector<8x32xf32>
    %c1_306 = arith.constant 1 : index
    %c0_307 = arith.constant 0 : index
    %c0_308 = arith.constant 0 : index
    %670 = vector.load %arg33[%c1_306, %c0_307, %c0_308] : memref<4x32x32xf32, #tpu.memory_space<vmem>>, vector<1x32x32xf32>
    %671 = vector.shape_cast %670 : vector<1x32x32xf32> to vector<32x32xf32>
    %cst_309 = arith.constant dense<0.000000e+00> : vector<8x32xf32>
    %672 = tpu.matmul %663, %671, %cst_309 {dimension_numbers = #tpu.dot_dimension_numbers<[1], [0], [0], [1], [0, 0, 1, 1], [], []>} : vector<8x32xf32>, vector<32x32xf32>, vector<8x32xf32> -> vector<8x32xf32>
    %c2_310 = arith.constant 2 : index
    %c0_311 = arith.constant 0 : index
    %c0_312 = arith.constant 0 : index
    %673 = vector.load %arg33[%c2_310, %c0_311, %c0_312] : memref<4x32x32xf32, #tpu.memory_space<vmem>>, vector<1x32x32xf32>
    %674 = vector.shape_cast %673 : vector<1x32x32xf32> to vector<32x32xf32>
    %cst_313 = arith.constant dense<0.000000e+00> : vector<8x32xf32>
    %675 = tpu.matmul %663, %674, %cst_313 {dimension_numbers = #tpu.dot_dimension_numbers<[1], [0], [0], [1], [0, 0, 1, 1], [], []>} : vector<8x32xf32>, vector<32x32xf32>, vector<8x32xf32> -> vector<8x32xf32>
    %c3_314 = arith.constant 3 : index
    %c0_315 = arith.constant 0 : index
    %c0_316 = arith.constant 0 : index
    %676 = vector.load %arg33[%c3_314, %c0_315, %c0_316] : memref<4x32x32xf32, #tpu.memory_space<vmem>>, vector<1x32x32xf32>
    %677 = vector.shape_cast %676 : vector<1x32x32xf32> to vector<32x32xf32>
    %cst_317 = arith.constant dense<0.000000e+00> : vector<8x32xf32>
    %678 = tpu.matmul %663, %677, %cst_317 {dimension_numbers = #tpu.dot_dimension_numbers<[1], [0], [0], [1], [0, 0, 1, 1], [], []>} : vector<8x32xf32>, vector<32x32xf32>, vector<8x32xf32> -> vector<8x32xf32>
    %679 = vector.extract_strided_slice %300 {offsets = [56, 0], sizes = [8, 32], strides = [1, 1]} : vector<80x32xf32> to vector<8x32xf32>
    %680 = arith.addf %679, %669 : vector<8x32xf32>
    %681 = arith.negf %680 : vector<8x32xf32>
    %682 = math.exp %681 : vector<8x32xf32>
    %cst_318 = arith.constant 1.000000e+00 : f32
    %683 = vector.broadcast %cst_318 : f32 to vector<8x32xf32>
    %684 = arith.addf %683, %682 : vector<8x32xf32>
    %685 = arith.divf %683, %684 : vector<8x32xf32>
    %686 = vector.extract_strided_slice %307 {offsets = [56, 0], sizes = [8, 32], strides = [1, 1]} : vector<80x32xf32> to vector<8x32xf32>
    %687 = arith.addf %686, %672 : vector<8x32xf32>
    %688 = arith.negf %687 : vector<8x32xf32>
    %689 = math.exp %688 : vector<8x32xf32>
    %cst_319 = arith.constant 1.000000e+00 : f32
    %690 = vector.broadcast %cst_319 : f32 to vector<8x32xf32>
    %691 = arith.addf %690, %689 : vector<8x32xf32>
    %692 = arith.divf %690, %691 : vector<8x32xf32>
    %693 = vector.extract_strided_slice %314 {offsets = [56, 0], sizes = [8, 32], strides = [1, 1]} : vector<80x32xf32> to vector<8x32xf32>
    %694 = arith.addf %693, %675 : vector<8x32xf32>
    %695 = math.tanh %694 : vector<8x32xf32>
    %696 = vector.extract_strided_slice %321 {offsets = [56, 0], sizes = [8, 32], strides = [1, 1]} : vector<80x32xf32> to vector<8x32xf32>
    %697 = arith.addf %696, %678 : vector<8x32xf32>
    %698 = arith.negf %697 : vector<8x32xf32>
    %699 = math.exp %698 : vector<8x32xf32>
    %cst_320 = arith.constant 1.000000e+00 : f32
    %700 = vector.broadcast %cst_320 : f32 to vector<8x32xf32>
    %701 = arith.addf %700, %699 : vector<8x32xf32>
    %702 = arith.divf %700, %701 : vector<8x32xf32>
    %703 = arith.mulf %692, %666 : vector<8x32xf32>
    %704 = arith.mulf %685, %695 : vector<8x32xf32>
    %705 = arith.addf %703, %704 : vector<8x32xf32>
    %706 = math.tanh %705 : vector<8x32xf32>
    %707 = arith.mulf %702, %706 : vector<8x32xf32>
    %c7_i32 = arith.constant 7 : i32
    %708 = vector.broadcast %c7_i32 : i32 to vector<8x1xi32>
    %709 = arith.cmpi sgt, %291, %708 : vector<8x1xi32>
    %710 = vector.shape_cast %709 : vector<8x1xi1> to vector<8x1xi1>
    %711 = vector.broadcast %710 : vector<8x1xi1> to vector<8x32xi1>
    %712 = arith.select %711, %707, %663 : vector<8x32xi1>, vector<8x32xf32>
    %713 = vector.shape_cast %709 : vector<8x1xi1> to vector<8x1xi1>
    %714 = vector.broadcast %713 : vector<8x1xi1> to vector<8x32xi1>
    %715 = arith.select %714, %705, %666 : vector<8x32xi1>, vector<8x32xf32>
    %c0_321 = arith.constant 0 : index
    %c0_322 = arith.constant 0 : index
    %c0_323 = arith.constant 0 : index
    %716 = vector.load %arg33[%c0_321, %c0_322, %c0_323] : memref<4x32x32xf32, #tpu.memory_space<vmem>>, vector<1x32x32xf32>
    %717 = vector.shape_cast %716 : vector<1x32x32xf32> to vector<32x32xf32>
    %cst_324 = arith.constant dense<0.000000e+00> : vector<8x32xf32>
    %718 = tpu.matmul %712, %717, %cst_324 {dimension_numbers = #tpu.dot_dimension_numbers<[1], [0], [0], [1], [0, 0, 1, 1], [], []>} : vector<8x32xf32>, vector<32x32xf32>, vector<8x32xf32> -> vector<8x32xf32>
    %c1_325 = arith.constant 1 : index
    %c0_326 = arith.constant 0 : index
    %c0_327 = arith.constant 0 : index
    %719 = vector.load %arg33[%c1_325, %c0_326, %c0_327] : memref<4x32x32xf32, #tpu.memory_space<vmem>>, vector<1x32x32xf32>
    %720 = vector.shape_cast %719 : vector<1x32x32xf32> to vector<32x32xf32>
    %cst_328 = arith.constant dense<0.000000e+00> : vector<8x32xf32>
    %721 = tpu.matmul %712, %720, %cst_328 {dimension_numbers = #tpu.dot_dimension_numbers<[1], [0], [0], [1], [0, 0, 1, 1], [], []>} : vector<8x32xf32>, vector<32x32xf32>, vector<8x32xf32> -> vector<8x32xf32>
    %c2_329 = arith.constant 2 : index
    %c0_330 = arith.constant 0 : index
    %c0_331 = arith.constant 0 : index
    %722 = vector.load %arg33[%c2_329, %c0_330, %c0_331] : memref<4x32x32xf32, #tpu.memory_space<vmem>>, vector<1x32x32xf32>
    %723 = vector.shape_cast %722 : vector<1x32x32xf32> to vector<32x32xf32>
    %cst_332 = arith.constant dense<0.000000e+00> : vector<8x32xf32>
    %724 = tpu.matmul %712, %723, %cst_332 {dimension_numbers = #tpu.dot_dimension_numbers<[1], [0], [0], [1], [0, 0, 1, 1], [], []>} : vector<8x32xf32>, vector<32x32xf32>, vector<8x32xf32> -> vector<8x32xf32>
    %c3_333 = arith.constant 3 : index
    %c0_334 = arith.constant 0 : index
    %c0_335 = arith.constant 0 : index
    %725 = vector.load %arg33[%c3_333, %c0_334, %c0_335] : memref<4x32x32xf32, #tpu.memory_space<vmem>>, vector<1x32x32xf32>
    %726 = vector.shape_cast %725 : vector<1x32x32xf32> to vector<32x32xf32>
    %cst_336 = arith.constant dense<0.000000e+00> : vector<8x32xf32>
    %727 = tpu.matmul %712, %726, %cst_336 {dimension_numbers = #tpu.dot_dimension_numbers<[1], [0], [0], [1], [0, 0, 1, 1], [], []>} : vector<8x32xf32>, vector<32x32xf32>, vector<8x32xf32> -> vector<8x32xf32>
    %728 = vector.extract_strided_slice %300 {offsets = [64, 0], sizes = [8, 32], strides = [1, 1]} : vector<80x32xf32> to vector<8x32xf32>
    %729 = arith.addf %728, %718 : vector<8x32xf32>
    %730 = arith.negf %729 : vector<8x32xf32>
    %731 = math.exp %730 : vector<8x32xf32>
    %cst_337 = arith.constant 1.000000e+00 : f32
    %732 = vector.broadcast %cst_337 : f32 to vector<8x32xf32>
    %733 = arith.addf %732, %731 : vector<8x32xf32>
    %734 = arith.divf %732, %733 : vector<8x32xf32>
    %735 = vector.extract_strided_slice %307 {offsets = [64, 0], sizes = [8, 32], strides = [1, 1]} : vector<80x32xf32> to vector<8x32xf32>
    %736 = arith.addf %735, %721 : vector<8x32xf32>
    %737 = arith.negf %736 : vector<8x32xf32>
    %738 = math.exp %737 : vector<8x32xf32>
    %cst_338 = arith.constant 1.000000e+00 : f32
    %739 = vector.broadcast %cst_338 : f32 to vector<8x32xf32>
    %740 = arith.addf %739, %738 : vector<8x32xf32>
    %741 = arith.divf %739, %740 : vector<8x32xf32>
    %742 = vector.extract_strided_slice %314 {offsets = [64, 0], sizes = [8, 32], strides = [1, 1]} : vector<80x32xf32> to vector<8x32xf32>
    %743 = arith.addf %742, %724 : vector<8x32xf32>
    %744 = math.tanh %743 : vector<8x32xf32>
    %745 = vector.extract_strided_slice %321 {offsets = [64, 0], sizes = [8, 32], strides = [1, 1]} : vector<80x32xf32> to vector<8x32xf32>
    %746 = arith.addf %745, %727 : vector<8x32xf32>
    %747 = arith.negf %746 : vector<8x32xf32>
    %748 = math.exp %747 : vector<8x32xf32>
    %cst_339 = arith.constant 1.000000e+00 : f32
    %749 = vector.broadcast %cst_339 : f32 to vector<8x32xf32>
    %750 = arith.addf %749, %748 : vector<8x32xf32>
    %751 = arith.divf %749, %750 : vector<8x32xf32>
    %752 = arith.mulf %741, %715 : vector<8x32xf32>
    %753 = arith.mulf %734, %744 : vector<8x32xf32>
    %754 = arith.addf %752, %753 : vector<8x32xf32>
    %755 = math.tanh %754 : vector<8x32xf32>
    %756 = arith.mulf %751, %755 : vector<8x32xf32>
    %c8_i32 = arith.constant 8 : i32
    %757 = vector.broadcast %c8_i32 : i32 to vector<8x1xi32>
    %758 = arith.cmpi sgt, %291, %757 : vector<8x1xi32>
    %759 = vector.shape_cast %758 : vector<8x1xi1> to vector<8x1xi1>
    %760 = vector.broadcast %759 : vector<8x1xi1> to vector<8x32xi1>
    %761 = arith.select %760, %756, %712 : vector<8x32xi1>, vector<8x32xf32>
    %762 = vector.shape_cast %758 : vector<8x1xi1> to vector<8x1xi1>
    %763 = vector.broadcast %762 : vector<8x1xi1> to vector<8x32xi1>
    %764 = arith.select %763, %754, %715 : vector<8x32xi1>, vector<8x32xf32>
    %c0_340 = arith.constant 0 : index
    %c0_341 = arith.constant 0 : index
    %c0_342 = arith.constant 0 : index
    %765 = vector.load %arg33[%c0_340, %c0_341, %c0_342] : memref<4x32x32xf32, #tpu.memory_space<vmem>>, vector<1x32x32xf32>
    %766 = vector.shape_cast %765 : vector<1x32x32xf32> to vector<32x32xf32>
    %cst_343 = arith.constant dense<0.000000e+00> : vector<8x32xf32>
    %767 = tpu.matmul %761, %766, %cst_343 {dimension_numbers = #tpu.dot_dimension_numbers<[1], [0], [0], [1], [0, 0, 1, 1], [], []>} : vector<8x32xf32>, vector<32x32xf32>, vector<8x32xf32> -> vector<8x32xf32>
    %c1_344 = arith.constant 1 : index
    %c0_345 = arith.constant 0 : index
    %c0_346 = arith.constant 0 : index
    %768 = vector.load %arg33[%c1_344, %c0_345, %c0_346] : memref<4x32x32xf32, #tpu.memory_space<vmem>>, vector<1x32x32xf32>
    %769 = vector.shape_cast %768 : vector<1x32x32xf32> to vector<32x32xf32>
    %cst_347 = arith.constant dense<0.000000e+00> : vector<8x32xf32>
    %770 = tpu.matmul %761, %769, %cst_347 {dimension_numbers = #tpu.dot_dimension_numbers<[1], [0], [0], [1], [0, 0, 1, 1], [], []>} : vector<8x32xf32>, vector<32x32xf32>, vector<8x32xf32> -> vector<8x32xf32>
    %c2_348 = arith.constant 2 : index
    %c0_349 = arith.constant 0 : index
    %c0_350 = arith.constant 0 : index
    %771 = vector.load %arg33[%c2_348, %c0_349, %c0_350] : memref<4x32x32xf32, #tpu.memory_space<vmem>>, vector<1x32x32xf32>
    %772 = vector.shape_cast %771 : vector<1x32x32xf32> to vector<32x32xf32>
    %cst_351 = arith.constant dense<0.000000e+00> : vector<8x32xf32>
    %773 = tpu.matmul %761, %772, %cst_351 {dimension_numbers = #tpu.dot_dimension_numbers<[1], [0], [0], [1], [0, 0, 1, 1], [], []>} : vector<8x32xf32>, vector<32x32xf32>, vector<8x32xf32> -> vector<8x32xf32>
    %c3_352 = arith.constant 3 : index
    %c0_353 = arith.constant 0 : index
    %c0_354 = arith.constant 0 : index
    %774 = vector.load %arg33[%c3_352, %c0_353, %c0_354] : memref<4x32x32xf32, #tpu.memory_space<vmem>>, vector<1x32x32xf32>
    %775 = vector.shape_cast %774 : vector<1x32x32xf32> to vector<32x32xf32>
    %cst_355 = arith.constant dense<0.000000e+00> : vector<8x32xf32>
    %776 = tpu.matmul %761, %775, %cst_355 {dimension_numbers = #tpu.dot_dimension_numbers<[1], [0], [0], [1], [0, 0, 1, 1], [], []>} : vector<8x32xf32>, vector<32x32xf32>, vector<8x32xf32> -> vector<8x32xf32>
    %777 = vector.extract_strided_slice %300 {offsets = [72, 0], sizes = [8, 32], strides = [1, 1]} : vector<80x32xf32> to vector<8x32xf32>
    %778 = arith.addf %777, %767 : vector<8x32xf32>
    %779 = arith.negf %778 : vector<8x32xf32>
    %780 = math.exp %779 : vector<8x32xf32>
    %cst_356 = arith.constant 1.000000e+00 : f32
    %781 = vector.broadcast %cst_356 : f32 to vector<8x32xf32>
    %782 = arith.addf %781, %780 : vector<8x32xf32>
    %783 = arith.divf %781, %782 : vector<8x32xf32>
    %784 = vector.extract_strided_slice %307 {offsets = [72, 0], sizes = [8, 32], strides = [1, 1]} : vector<80x32xf32> to vector<8x32xf32>
    %785 = arith.addf %784, %770 : vector<8x32xf32>
    %786 = arith.negf %785 : vector<8x32xf32>
    %787 = math.exp %786 : vector<8x32xf32>
    %cst_357 = arith.constant 1.000000e+00 : f32
    %788 = vector.broadcast %cst_357 : f32 to vector<8x32xf32>
    %789 = arith.addf %788, %787 : vector<8x32xf32>
    %790 = arith.divf %788, %789 : vector<8x32xf32>
    %791 = vector.extract_strided_slice %314 {offsets = [72, 0], sizes = [8, 32], strides = [1, 1]} : vector<80x32xf32> to vector<8x32xf32>
    %792 = arith.addf %791, %773 : vector<8x32xf32>
    %793 = math.tanh %792 : vector<8x32xf32>
    %794 = vector.extract_strided_slice %321 {offsets = [72, 0], sizes = [8, 32], strides = [1, 1]} : vector<80x32xf32> to vector<8x32xf32>
    %795 = arith.addf %794, %776 : vector<8x32xf32>
    %796 = arith.negf %795 : vector<8x32xf32>
    %797 = math.exp %796 : vector<8x32xf32>
    %cst_358 = arith.constant 1.000000e+00 : f32
    %798 = vector.broadcast %cst_358 : f32 to vector<8x32xf32>
    %799 = arith.addf %798, %797 : vector<8x32xf32>
    %800 = arith.divf %798, %799 : vector<8x32xf32>
    %801 = arith.mulf %790, %764 : vector<8x32xf32>
    %802 = arith.mulf %783, %793 : vector<8x32xf32>
    %803 = arith.addf %801, %802 : vector<8x32xf32>
    %804 = math.tanh %803 : vector<8x32xf32>
    %805 = arith.mulf %800, %804 : vector<8x32xf32>
    %c9_i32 = arith.constant 9 : i32
    %806 = vector.broadcast %c9_i32 : i32 to vector<8x1xi32>
    %807 = arith.cmpi sgt, %291, %806 : vector<8x1xi32>
    %808 = vector.shape_cast %807 : vector<8x1xi1> to vector<8x1xi1>
    %809 = vector.broadcast %808 : vector<8x1xi1> to vector<8x32xi1>
    %810 = arith.select %809, %805, %761 : vector<8x32xi1>, vector<8x32xf32>
    %c0_359 = arith.constant 0 : index
    %c0_360 = arith.constant 0 : index
    %811 = vector.load %arg35[%c0_359, %c0_360] : memref<32x8xf32, #tpu.memory_space<vmem>>, vector<32x8xf32>
    %cst_361 = arith.constant dense<0.000000e+00> : vector<8x8xf32>
    %812 = tpu.matmul %810, %811, %cst_361 {dimension_numbers = #tpu.dot_dimension_numbers<[1], [0], [0], [1], [0, 0, 1, 1], [], []>} : vector<8x32xf32>, vector<32x8xf32>, vector<8x8xf32> -> vector<8x8xf32>
    %c0_362 = arith.constant 0 : index
    %c0_363 = arith.constant 0 : index
    %813 = vector.load %arg36[%c0_362, %c0_363] : memref<1x8xf32, #tpu.memory_space<vmem>>, vector<1x8xf32>
    %814 = vector.broadcast %813 : vector<1x8xf32> to vector<8x8xf32>
    %815 = arith.addf %812, %814 : vector<8x8xf32>
    %c0_364 = arith.constant 0 : index
    %c0_365 = arith.constant 0 : index
    %816 = vector.load %arg37[%c0_364, %c0_365] : memref<8x8xf32, #tpu.memory_space<vmem>>, vector<8x8xf32>
    tpu.vector_store %arg37[%c0_364, %c0_365], %815 {strides = array<i32>} : memref<8x8xf32, #tpu.memory_space<vmem>>, vector<8x8xf32>,
    return
  }
}

</mosaic_0001>

<bundles_post_ra>
// kernel: tpu_custom_call.1
= control target key start
LH: loop header
LB: loop body
LE: loop exit
PB: predicated region body
PF: predicated region fallthrough
CT: control target
= control target key end

     0   :  { %s4004_s6 = smov 1   ;;  %s4005_s10 = smov 2   ;;  %s5111_s0 = inlined_call_operand.smem [shape: u32[38], index: -1, kind: input, shape index: {}] }
   0x1   :  { %s4064_s5 = sld [smem:[%s5111_s0]]   ;;  %s4006_s14 = smov 3  }
   0x2   :  { %s4069_s9 = sld [smem:[%s5111_s0 + %s4004_s6]]   ;;  %s4007_s18 = smov 4  }
   0x3   :  { %s4074_s13 = sld [smem:[%s5111_s0 + %s4005_s10]]   ;;  %s4008_s22 = smov 5  }
   0x4   :  { %s4079_s17 = sld [smem:[%s5111_s0 + %s4006_s14]]   ;;  %s4009_s26 = smov 6  }
   0x5   :  { %s4084_s21 = sld [smem:[%s5111_s0 + %s4007_s18]]   ;;  %s4010_s30 = smov 7  }
   0x6   :  { %s4089_s25 = sld [smem:[%s5111_s0 + %s4008_s22]]   ;;  %s4011_s4 = smov 8  }
   0x7   :  { %s4094_s29 = sld [smem:[%s5111_s0 + %s4009_s26]]   ;;  %s4012_s10 = smov 9  }
   0x8   :  { %s4099_s3 = sld [smem:[%s5111_s0 + %s4010_s30]]   ;;  %s4013_s15 = smov 10  }
   0x9   :  { %5116 = sst [smem:[#allocation23_spill]] %s4074_s13  ;;  %s4014_s20 = smov 11  }
   0xa   :  { %5117 = sst [smem:[#allocation24_spill]] %s4079_s17  ;;  %s4015_s26 = smov 12  }
   0xb   :  { %s4104_s8 = sld [smem:[%s5111_s0 + %s4011_s4]]   ;;  %s4016_s1 = smov 13  }
   0xc   :  { %s4109_s14 = sld [smem:[%s5111_s0 + %s4012_s10]]   ;;  %s4017_s7 = smov 14  }
   0xd   :  { %s4114_s19 = sld [smem:[%s5111_s0 + %s4013_s15]]   ;;  %s4018_s15 = smov 15  }
   0xe   :  { %s4119_s24 = sld [smem:[%s5111_s0 + %s4014_s20]]   ;;  %s4019_s22 = smov 16  }
   0xf   :  { %s4124_s30 = sld [smem:[%s5111_s0 + %s4015_s26]]   ;;  %s4020_s28 = smov 17  }
  0x10   :  { %s4129_s6 = sld [smem:[%s5111_s0 + %s4016_s1]]  }
  0x11   :  { %s4134_s12 = sld [smem:[%s5111_s0 + %s4017_s7]]   ;;  %s4021_s7 = smov 18  }
  0x12   :  { %5118 = sst [smem:[#allocation25_spill]] %s4109_s14 }
  0x13   :  { %5119 = sst [smem:[#allocation26_spill]] %s4114_s19 }
  0x14   :  { %5120 = sst [smem:[#allocation27_spill]] %s4119_s24 }
  0x15   :  { %s4139_s20 = sld [smem:[%s5111_s0 + %s4018_s15]]   ;;  %s4022_s15 = smov 19  }
  0x16   :  { %5121 = sst [smem:[#allocation28_spill]] %s4129_s6 }
  0x17   :  { %5122 = sst [smem:[#allocation29_spill]] %s4134_s12 }
  0x18   :  { %s4144_s27 = sld [smem:[%s5111_s0 + %s4019_s22]]   ;;  %s4023_s22 = smov 20  }
  0x19   :  { %s4149_s4 = sld [smem:[%s5111_s0 + %s4020_s28]]   ;;  %s4024_s28 = smov 21  }
  0x1a   :  { %s4154_s17 = sld [smem:[%s5111_s0 + %s4021_s7]]   ;;  %s4025_s7 = smov 22  }
  0x1b   :  { %5123 = sst [smem:[#allocation30_spill]] %s4139_s20 }
  0x1c   :  { %s4159_s13 = sld [smem:[%s5111_s0 + %s4022_s15]]   ;;  %s4026_s15 = smov 23  }
  0x1d   :  { %s4174_s6 = sld [smem:[%s5111_s0 + %s4025_s7]]   ;;  %s4029_s7 = smov 26  }
  0x1e   :  { %5124 = sst [smem:[#allocation31_spill]] %s4144_s27 }
  0x1f   :  { %5125 = sst [smem:[#allocation32_spill]] %s4149_s4 }
  0x20   :  { %s4164_s27 = sld [smem:[%s5111_s0 + %s4023_s22]]   ;;  %s4027_s22 = smov 24  }
  0x21   :  { %s4169_s4 = sld [smem:[%s5111_s0 + %s4024_s28]]   ;;  %s4028_s28 = smov 25  }
  0x22   :  { %s4179_s20 = sld [smem:[%s5111_s0 + %s4026_s15]]   ;;  %s4030_s15 = smov 27  }
  0x23   :  { %5128 = sst [smem:[#allocation35_spill]] %s4174_s6 }
  0x24   :  { %s4194_s6 = sld [smem:[%s5111_s0 + %s4029_s7]]   ;;  %s4033_s7 = smov 30  }
  0x25   :  { %s4214_s19 = sld [smem:[%s5111_s0 + %s4033_s7]]   ;;  %s4037_s7 = smov 34  }
  0x26   :  { %5126 = sst [smem:[#allocation33_spill]] %s4164_s27 }
  0x27   :  { %5127 = sst [smem:[#allocation34_spill]] %s4169_s4 }
  0x28   :  { %5129 = sst [smem:[#allocation36_spill]] %s4179_s20 }
  0x29   :  { %s4184_s27 = sld [smem:[%s5111_s0 + %s4027_s22]]   ;;  %s4031_s22 = smov 28  }
  0x2a   :  { %s4189_s4 = sld [smem:[%s5111_s0 + %s4028_s28]]   ;;  %s4032_s28 = smov 29  }
  0x2b   :  { %s4199_s20 = sld [smem:[%s5111_s0 + %s4030_s15]]   ;;  %s4034_s15 = smov 31  }
  0x2c   :  { %s4209_s12 = sld [smem:[%s5111_s0 + %s4032_s28]]   ;;  %s4036_s28 = smov 33  }
  0x2d   :  { %5134 = sst [smem:[#allocation41_spill]] %s4214_s19 }
  0x2e   :  { %s4234_s19 = sld [smem:[%s5111_s0 + %s4037_s7]]  }
  0x2f   :  { %5130 = sst [smem:[#allocation37_spill]] %s4184_s27 }
  0x30   :  { %s4204_s27 = sld [smem:[%s5111_s0 + %s4031_s22]]   ;;  %s4035_s22 = smov 32  }
  0x31   :  { %5131 = sst [smem:[#allocation38_spill]] %s4199_s20 }
  0x32   :  { %5133 = sst [smem:[#allocation40_spill]] %s4209_s12 }
  0x33   :  { %s4219_s20 = sld [smem:[%s5111_s0 + %s4034_s15]]   ;;  %s4038_s15 = smov 35  }
  0x34   :  { %s4229_s12 = sld [smem:[%s5111_s0 + %s4036_s28]]   ;;  %s4040_s28 = smov 37  }
  0x35   :  { %s4249_s24 = sld [smem:[%s5111_s0 + %s4040_s28]]  }
  0x36   :  { %5132 = sst [smem:[#allocation39_spill]] %s4204_s27 }
  0x37   :  { %s4224_s27 = sld [smem:[%s5111_s0 + %s4035_s22]]   ;;  %s4039_s22 = smov 36  }
  0x38   :  { %s4244_s14 = sld [smem:[%s5111_s0 + %s4039_s22]]  }
  0x39   :  { %5135 = sst [smem:[#allocation42_spill]] %s4219_s20 }
  0x3a   :  { %s4239_s20 = sld [smem:[%s5111_s0 + %s4038_s15]]  }
  0x3b   :  { %80 = vsyncpa [#allocation3], 0 }
  0x3c   :  { %81 = vsyncpa [#allocation6], 0 }
  0x3d   :  { %82 = vsyncpa [#allocation9], 0 }
  0x3e   :  { %83 = vsyncpa [#allocation12], 0 }
  0x3f   :  { %84 = vsyncpa [#allocation15], 0 }
  0x40   :  { %85 = vsyncpa [#allocation4], 0  ;;  %s125_s7 = sshll.u32 %s4124_s30, 4  ;;  %s4041_s10 = smov [#allocation5]   ;;  %s126_s7 = int_to_ptr.hbm [resolvable:$true] %s125_s7 }
  0x41   :  { %s127_s11 = sshll.u32 %s4041_s10, 4  ;;  %s161_s15 = sshll.u32 %s4159_s13, 4  ;;  %s128_s11 = int_to_ptr.vmem [resolvable:$true] %s127_s11  ;;  %s162_s15 = int_to_ptr.hbm [resolvable:$true] %s161_s15 }
  0x42   :  { %s3776_s16 = sshra.s32 %s126_s7, 4  ;;  %s3780_s18 = scalar_lea.hbm %s4124_s30, 32  ;;  %s3777_s16 = int_to_ptr.hbm [resolvable:$true] %s3776_s16 }
  0x43   :  { %s3778_s0 = scalar_lea.hbm %s3777_s16, 32  ;;  %p3781_p1 = scmp.lt.s32.totalorder %s3777_s16, %s4124_s30 }
  0x44   :  { %p3779_p0 = scmp.ne.s32.totalorder %s3777_s16, %s3778_s0  ;;  %p3782_p2 = scmp.lt.s32.totalorder %s3780_s18, %s3778_s0 }
  0x46   :  { %p3783_p3 = por %p3782_p2, %p3781_p1 }
  0x48   :  { %p3784_p4 = pnand %p3783_p3, %p3779_p0 }
  0x4a   :  { %3787 = shalt.err (!%p3784_p4)
}
  0x4b   :  { %s4042_s22 = smov 128   ;;  %s4043_s23 = smov 8  }
  0x4c   :  { %133 = dma.hbm_to_vmem [thread:$0]  %s126_s7, 512, %s128_s11, [#allocation6], %s4042_s22, %s4042_s22, %s4043_s23  }
  0x4d   :  { %s4044_s26 = smov [#allocation8]   ;;  %s197_s1 = sshll.u32 %s4194_s6, 4  ;;  %s4259_s1 = int_to_ptr.hbm [resolvable:$true] %s197_s1 }
  0x4e   :  { %s163_s28 = sshll.u32 %s4044_s26, 4  ;;  %s3800_s30 = sshra.s32 %s162_s15, 4  ;;  %s164_s28 = int_to_ptr.vmem [resolvable:$true] %s163_s28  ;;  %s3801_s30 = int_to_ptr.hbm [resolvable:$true] %s3800_s30 }
  0x4f   :  { %s3802_s2 = scalar_lea.hbm %s3801_s30, 32  ;;  %s3804_s10 = scalar_lea.hbm %s4159_s13, 32 }
  0x50   :  { %p3803_p5 = scmp.ne.s32.totalorder %s3801_s30, %s3802_s2  ;;  %p3805_p6 = scmp.lt.s32.totalorder %s3801_s30, %s4159_s13 }
  0x51   :  { %p3806_p7 = scmp.lt.s32.totalorder %s3804_s10, %s3802_s2 }
  0x53   :  { %p3807_p8 = por %p3806_p7, %p3805_p6 }
  0x55   :  { %p3808_p9 = pnand %p3807_p8, %p3803_p5 }
  0x57   :  { %3811 = shalt.err (!%p3808_p9)
}
  0x58   :  { %169 = dma.hbm_to_vmem [thread:$0]  %s162_s15, 512, %s164_s28, [#allocation9], %s4042_s22, %s4042_s22, %s4043_s23  }
  0x59   :  { %s92_s7 = sshll.u32 %s4069_s9, 4  ;;  %s4045_s11 = smov [#allocation11]   ;;  %s4267_s7 = int_to_ptr.hbm [resolvable:$true] %s92_s7 }
  0x5a   :  { %s199_s16 = sshll.u32 %s4045_s11, 4  ;;  %s3824_s0 = sshra.s32 %s4259_s1, 4  ;;  %s200_s16 = int_to_ptr.vmem [resolvable:$true] %s199_s16  ;;  %s3825_s0 = int_to_ptr.hbm [resolvable:$true] %s3824_s0 }
  0x5b   :  { %s3826_s13 = scalar_lea.hbm %s3825_s0, 32  ;;  %s3828_s18 = scalar_lea.hbm %s4194_s6, 32 }
  0x5c   :  { %p3827_p10 = scmp.ne.s32.totalorder %s3825_s0, %s3826_s13  ;;  %p3829_p11 = scmp.lt.s32.totalorder %s3825_s0, %s4194_s6 }
  0x5d   :  { %p3830_p12 = scmp.lt.s32.totalorder %s3828_s18, %s3826_s13 }
  0x5f   :  { %p3831_p13 = por %p3830_p12, %p3829_p11 }
  0x61   :  { %p3832_p0 = pnand %p3831_p13, %p3827_p10 }
  0x63   :  { %3835 = shalt.err (!%p3832_p0)
}
  0x64   :  { %205 = dma.hbm_to_vmem [thread:$0]  %s4259_s1, 512, %s200_s16, [#allocation12], %s4042_s22, %s4042_s22, %s4043_s23  }
  0x65   :  { %s4046_s15 = smov [#allocation2]   ;;  %s148_s28 = sshll.u32 %s4154_s17, 4  ;;  %s4277_s28 = int_to_ptr.hbm [resolvable:$true] %s148_s28 }
  0x66   :  { %s94_s26 = sshll.u32 %s4046_s15, 4  ;;  %s3848_s6 = sshra.s32 %s4267_s7, 4  ;;  %s95_s26 = int_to_ptr.vmem [resolvable:$true] %s94_s26  ;;  %s3849_s6 = int_to_ptr.hbm [resolvable:$true] %s3848_s6 }
  0x67   :  { %s3850_s30 = scalar_lea.hbm %s3849_s6, 16  ;;  %s3852_s2 = scalar_lea.hbm %s4069_s9, 16 }
  0x68   :  { %p3851_p1 = scmp.ne.s32.totalorder %s3849_s6, %s3850_s30  ;;  %p3853_p2 = scmp.lt.s32.totalorder %s3849_s6, %s4069_s9 }
  0x69   :  { %p3854_p3 = scmp.lt.s32.totalorder %s3852_s2, %s3850_s30 }
  0x6b   :  { %p3855_p4 = por %p3854_p3, %p3853_p2 }
  0x6d   :  { %p3856_p5 = pnand %p3855_p4, %p3851_p1 }
  0x6f   :  { %3859 = shalt.err (!%p3856_p5)
}
  0x70   :  { %100 = dma.hbm_to_vmem [thread:$0]  %s4267_s7, 256, %s95_s26, [#allocation3], %s4042_s22, %s4042_s22, %s4043_s23  }
  0x71   :  { %s184_s1 = sshll.u32 %s4189_s4, 4  ;;  %s4047_s10 = smov [#allocation7]   ;;  %s4287_s1 = int_to_ptr.hbm [resolvable:$true] %s184_s1 }
  0x72   :  { %s150_s11 = sshll.u32 %s4047_s10, 4  ;;  %s3872_s9 = sshra.s32 %s4277_s28, 4  ;;  %s151_s11 = int_to_ptr.vmem [resolvable:$true] %s150_s11  ;;  %s3873_s9 = int_to_ptr.hbm [resolvable:$true] %s3872_s9 }
  0x73   :  { %s3874_s16 = scalar_lea.hbm %s3873_s9, 32  ;;  %s3876_s0 = scalar_lea.hbm %s4154_s17, 32 }
  0x74   :  { %p3875_p6 = scmp.ne.s32.totalorder %s3873_s9, %s3874_s16  ;;  %p3877_p7 = scmp.lt.s32.totalorder %s3873_s9, %s4154_s17 }
  0x75   :  { %p3878_p8 = scmp.lt.s32.totalorder %s3876_s0, %s3874_s16 }
  0x77   :  { %p3879_p9 = por %p3878_p8, %p3877_p7 }
  0x79   :  { %p3880_p10 = pnand %p3879_p9, %p3875_p6 }
  0x7b   :  { %3883 = shalt.err (!%p3880_p10)
}
  0x7c   :  { %156 = dma.hbm_to_vmem [thread:$0]  %s4277_s28, 512, %s151_s11, [#allocation6], %s4042_s22, %s4042_s22, %s4043_s23  }
  0x7d   :  { %s4048_s7 = smov [#allocation10]   ;;  %s220_s18 = sshll.u32 %s4224_s27, 4  ;;  %s4297_s18 = int_to_ptr.hbm [resolvable:$true] %s220_s18 }
  0x7e   :  { %s186_s13 = sshll.u32 %s4048_s7, 4  ;;  %s3896_s17 = sshra.s32 %s4287_s1, 4  ;;  %s187_s13 = int_to_ptr.vmem [resolvable:$true] %s186_s13  ;;  %s3897_s17 = int_to_ptr.hbm [resolvable:$true] %s3896_s17 }
  0x7f   :  { %s3898_s15 = scalar_lea.hbm %s3897_s17, 32  ;;  %s3900_s26 = scalar_lea.hbm %s4189_s4, 32 }
  0x80   :  { %p3899_p11 = scmp.ne.s32.totalorder %s3897_s17, %s3898_s15  ;;  %p3901_p12 = scmp.lt.s32.totalorder %s3897_s17, %s4189_s4 }
  0x81   :  { %p3902_p13 = scmp.lt.s32.totalorder %s3900_s26, %s3898_s15 }
  0x83   :  { %p3903_p0 = por %p3902_p13, %p3901_p12 }
  0x85   :  { %p3904_p1 = pnand %p3903_p0, %p3899_p11 }
  0x87   :  { %3907 = shalt.err (!%p3904_p1)
}
  0x88   :  { %192 = dma.hbm_to_vmem [thread:$0]  %s4287_s1, 512, %s187_s13, [#allocation9], %s4042_s22, %s4042_s22, %s4043_s23  }
  0x89   :  { %s233_s28 = sshll.u32 %s4229_s12, 4  ;;  %s4049_s6 = smov [#allocation13]   ;;  %s4307_s28 = int_to_ptr.hbm [resolvable:$true] %s233_s28 }
  0x8a   :  { %s222_s30 = sshll.u32 %s4049_s6, 4  ;;  %s3920_s4 = sshra.s32 %s4297_s18, 4  ;;  %s223_s30 = int_to_ptr.vmem [resolvable:$true] %s222_s30  ;;  %s3921_s4 = int_to_ptr.hbm [resolvable:$true] %s3920_s4 }
  0x8b   :  { %s3922_s2 = scalar_lea.hbm %s3921_s4, 128  ;;  %s3924_s10 = scalar_lea.hbm %s4224_s27, 128 }
  0x8c   :  { %p3923_p2 = scmp.ne.s32.totalorder %s3921_s4, %s3922_s2  ;;  %p3925_p3 = scmp.lt.s32.totalorder %s3921_s4, %s4224_s27 }
  0x8d   :  { %p3926_p4 = scmp.lt.s32.totalorder %s3924_s10, %s3922_s2 }
  0x8f   :  { %p3927_p5 = por %p3926_p4, %p3925_p3 }
  0x91   :  { %p3928_p6 = pnand %p3927_p5, %p3923_p2 }
  0x93   :  { %3931 = shalt.err (!%p3928_p6)
}
  0x94   :  { %228 = dma.hbm_to_vmem [thread:$0]  %s4297_s18, 2048, %s223_s30, [#allocation12], %s4042_s22, %s4042_s22, %s4043_s23  }
  0x95   :  { %s4050_s1 = smov [#allocation14]   ;;  %s3944_s9 = sshra.s32 %s4307_s28, 4  ;;  %s3945_s9 = int_to_ptr.hbm [resolvable:$true] %s3944_s9 }
  0x96   :  { %s235_s11 = sshll.u32 %s4050_s1, 4  ;;  %s3946_s16 = scalar_lea.hbm %s3945_s9, 128  ;;  %s236_s11 = int_to_ptr.vmem [resolvable:$true] %s235_s11 }
  0x97   :  { %p3947_p7 = scmp.ne.s32.totalorder %s3945_s9, %s3946_s16  ;;  %s3948_s27 = scalar_lea.hbm %s4229_s12, 128 }
  0x98   :  { %p3949_p8 = scmp.lt.s32.totalorder %s3945_s9, %s4229_s12  ;;  %p3950_p9 = scmp.lt.s32.totalorder %s3948_s27, %s3946_s16 }
  0x9a   :  { %p3951_p10 = por %p3950_p9, %p3949_p8 }
  0x9c   :  { %p3952_p11 = pnand %p3951_p10, %p3947_p7 }
  0x9e   :  { %3955 = shalt.err (!%p3952_p11)
}
  0x9f   :  { %241 = dma.hbm_to_vmem [thread:$0]  %s4307_s28, 2048, %s236_s11, [#allocation15], %s4042_s22, %s4042_s22, %s4043_s23  }
  0xa0   :  { %3992 = dma.done.wait [#allocation3], 256  }
  0xa1   :  { %3993 = vsyncadd [#allocation3], 4294967040 }
  0xa2   :  { %3994 = dma.done.wait [#allocation6], 1024  }
  0xa3   :  { %3995 = vsyncadd [#allocation6], 4294966272 }
  0xa4   :  { %3996 = dma.done.wait [#allocation9], 1024  }
  0xa5   :  { %3997 = vsyncadd [#allocation9], 4294966272 }
  0xa6   :  { %3998 = dma.done.wait [#allocation12], 2560  }
  0xa7   :  { %3999 = vsyncadd [#allocation12], 4294964736 }
  0xa8   :  { %4000 = dma.done.wait [#allocation15], 2048  }
  0xa9   :  { %4001 = vsyncadd [#allocation15], 4294965248  ;;  %v291_v0 = vld [vmem:[%s4084_s21 + $0x18] sm:$0xff]  ;;  %v290_v1 = vld [vmem:[%s4084_s21 + $0x10] sm:$0xff]  ;;  %vm301_vm0 = vcmask 261120   ;;  %vm408_vm3 = vcmask 130048  }
  0xaa   :  { %320 = vmatpush.msra.mxu0 %v291_v0  ;;  %v289_v2 = vld [vmem:[%s4084_s21 + $0x8] sm:$0xff]  ;;  %v288_v3 = vld [vmem:[%s4084_s21] sm:$0xff]  ;;  %v4051_v21 = vmov -1e+30   ;;  %v295_v45 = vld [vmem:[%s4089_s25 + $0x18] sm:$0xff]  ;;  %s5137_s21 = sld [smem:[#allocation25_spill]] }
  0xab   :  { %v4328_v4 = vld [vmem:[%s4064_s5] sm:$0xff]  ;;  %v4333_v5 = vld [vmem:[%s4064_s5 + $0x8] sm:$0xff]  ;;  %346 = vmatpush.msra.mxu1 %v295_v45  ;;  %v294_v46 = vld [vmem:[%s4089_s25 + $0x10] sm:$0xff]  ;;  %s5136_s5 = sld [smem:[#allocation27_spill]]  ;;  %s3239_s2 = sshll.u32 %s4249_s24, 4  ;;  %s3240_s2 = int_to_ptr.hbm [resolvable:$true] %s3239_s2 }
  0xac   :  { %321 = vmatpush.msra.mxu0 %v290_v1  ;;  %v3509_v6 = vld [vmem:[%s4099_s3] ss:$0 sm:$0xff]  ;;  %v4351_v24 = vld [vmem:[#allocation2 + $0x8] sm:$0xff]  ;;  %s5140_s3 = sld [smem:[#allocation30_spill]]  ;;  %s3980_s10 = sshra.s32 %s3240_s2, 4  ;;  %s3981_s10 = int_to_ptr.hbm [resolvable:$true] %s3980_s10 }
  0xad   :  { %v298_v13 = vld [vmem:[%s4104_s8] sm:$0x1]  ;;  %vm283_vm4 = vcmp.gt.f32.partialorder %v4351_v24, 0.0  ;;  %347 = vmatpush.msra.mxu1 %v294_v46  ;;  %v293_v47 = vld [vmem:[%s4089_s25 + $0x8] sm:$0xff]  ;;  %s5141_s8 = sld [smem:[#allocation28_spill]]  ;;  %s3982_s1 = scalar_lea.hbm %s3981_s10, 8 }
  0xae   :  { %322 = vmatpush.msra.mxu0 %v289_v2  ;;  %v4344_v15 = vld [vmem:[#allocation2] sm:$0xff]  ;;  %v4358_v29 = vsel %vm283_vm4, 0.0, %v4051_v21  ;;  %s5142_s12 = sld [smem:[#allocation31_spill]]  ;;  %p3983_p12 = scmp.ne.s32.totalorder %s3981_s10, %s3982_s1 }
  0xaf   :  { %vm282_vm1 = vcmp.gt.f32.partialorder %v4344_v15, 0.0  ;;  %v292_v48 = vld [vmem:[%s4089_s25] sm:$0xff]  ;;  %348 = vmatpush.msra.mxu1 %v293_v47  ;;  %s5138_s25 = sld [smem:[#allocation26_spill]]  ;;  %s3984_s11 = scalar_lea.hbm %s4249_s24, 8 }
  0xb0   :  { %323 = vmatpush.msra.mxu0 %v288_v3  ;;  %v4349_v22 = vsel %vm282_vm1, 0.0, %v4051_v21  ;;  %v3510_v58 = vld [vmem:[%s4094_s29] ss:$0 sm:$0xff]  ;;  %s5139_s29 = sld [smem:[#allocation29_spill]]  ;;  %p3985_p13 = scmp.lt.s32.totalorder %s3981_s10, %s4249_s24 }
  0xb1   :  { %3290 = vmatmul.msk.f32.vlgmr.msra.gmra.mxu0 %vm301_vm0, %v4328_v4  ;;  %349 = vmatpush.msra.mxu1 %v292_v48  ;;  %v3511_v47 = vld [vmem:[%s5137_s21] ss:$0 sm:$0xff]  ;;  %s5143_s22 = sld [smem:[#allocation32_spill]]  ;;  %p3986_p0 = scmp.lt.s32.totalorder %s3984_s11, %s3982_s1 }
  0xb2   :  { %3292 = vmatmul.msk.f32.vlgmr.msra.gmra.mxu1 %vm301_vm0, %v4328_v4  ;;  %v4052_v4 = vmov 32.0   ;;  %s5144_s23 = sld [smem:[#allocation34_spill]] }
  0xb3   :  { %s5145_s0 = sld [smem:[#allocation35_spill]]  ;;  %p3987_p1 = por %p3986_p0, %p3985_p13 }
  0xb4   :  { %s5146_s7 = sld [smem:[#allocation33_spill]] }
  0xb5   :  { %s5147_s13 = sld [smem:[#allocation36_spill]]  ;;  %p3988_p2 = pnand %p3987_p1, %p3983_p12 }
  0xb6   :  { %s5148_s18 = sld [smem:[#allocation37_spill]] }
  0xb7   :  { %s5149_s17 = sld [smem:[#allocation39_spill]] }
  0xb8   :  { %s5150_s15 = sld [smem:[#allocation40_spill]] }
  0xb9   :  { %3291 = vmatmul.msk.f32.gmra.mxu0 %vm301_vm0, %v4333_v5  ;;  %s5151_s26 = sld [smem:[#allocation38_spill]] }
  0xba   :  { %3293 = vmatmul.msk.f32.gmra.mxu1 %vm301_vm0, %v4333_v5  ;;  %s5152_s28 = sld [smem:[#allocation41_spill]] }
  0xbb   :  { %s5153_s6 = sld [smem:[#allocation42_spill]] }
  0xbc   :  { %s5154_s30 = sld [smem:[#allocation23_spill]] }
  0xbd   :  { %s5155_s4 = sld [smem:[#allocation24_spill]] }
 0x12e   :  { %v325_v7 = vpop.f32.mrf.mxu0 }
 0x12f   :  { %v360_v8 = vmul.f32 %v3509_v6, %v325_v7  ;;  %v351_v57 = vpop.f32.mrf.mxu1 }
 0x130   :  { %v352_v59 = vadd.f32 %v3510_v58, %v351_v57 }
 0x131   :  { %v362_v9 = vsel %vm301_vm0, %v360_v8, 0.0 }
 0x132   :  { %363 = vadd.xlane.f32.xlu0 %v362_v9 }
 0x136   :  { %v328_v10 = vpop.f32.mrf.mxu0 }
 0x137   :  { %3294 = vmatpush.xpose.msk.msra.mxu2 %vm301_vm0, %v328_v10  ;;  %455 = vmatpush.msra.mxu3 %v328_v10  ;;  %v361_v11 = vmul.f32 %v3509_v6, %v328_v10  ;;  %v354_v62 = vpop.f32.mrf.mxu1 }
 0x138   :  { %v355_v0 = vadd.f32 %v3510_v58, %v354_v62 }
 0x139   :  { %456 = vmatpush.msra.mxu3 %v325_v7  ;;  %v365_v12 = vsel %vm301_vm0, %v361_v11, 0.0 }
 0x13a   :  { %366 = vadd.xlane.f32.xlu0 %v365_v12 }
 0x13b   :  { %3295 = vmatpush.xpose.msk.msra.mxu2 %vm301_vm0, %v325_v7 }
 0x13e   :  { %3296 = vmatmul.msk.f32.vlgmr.msra.gmra.mxu2 %vm301_vm0, %v298_v13 }
 0x1a5   :  { %v364_v14 = vpop.xlane.xlu0 %363 }
 0x1ad   :  { %v367_v18 = vpop.xlane.xlu0 %366 }
 0x1c1   :  { %v394_v16 = vpop.f32.mrf.mxu2 }
 0x1c2   :  { %v397_v17 = vperm.slane %v394_v16, 0 }
 0x1c4   :  { %v398_v19 = vadd.f32 %v397_v17, %v364_v14  ;;  %v399_v20 = vadd.f32 %v397_v17, %v367_v18 }
 0x1c6   :  { %vm400_vm2 = vcmp.gt.f32.partialorder %v398_v19, 0.0  ;;  %v402_v23 = vmul.f32 0.2, %v398_v19  ;;  %v403_v26 = vmul.f32 0.2, %v399_v20  ;;  %vm401_vm5 = vcmp.gt.f32.partialorder %v399_v20, 0.0 }
 0x1c8   :  { %v404_v25 = vsel %vm400_vm2, %v398_v19, %v402_v23  ;;  %v405_v30 = vsel %vm401_vm5, %v399_v20, %v403_v26  ;;  %v540_v23 = vld [vmem:[%s5136_s5 + $0x18] sm:$0xff]  ;;  %v539_v26 = vld [vmem:[%s5136_s5 + $0x10] sm:$0xff] }
 0x1c9   :  { %v406_v27 = vadd.f32 %v404_v25, %v4349_v22  ;;  %v407_v31 = vadd.f32 %v405_v30, %v4358_v29  ;;  %v544_v25 = vld [vmem:[#allocation5 + $0x18] sm:$0xff]  ;;  %568 = vmatpush.msrb.mxu2 %v540_v23 }
 0x1ca   :  { %594 = vmatpush.msrb.mxu3 %v544_v25 }
 0x1cb   :  { %v409_v28 = vsel %vm408_vm3, %v406_v27, -inf  ;;  %v412_v32 = vsel %vm408_vm3, %v407_v31, -inf  ;;  %569 = vmatpush.msrb.mxu2 %v539_v26 }
 0x1cc   :  { %410 = vmax.xlane.f32.xlu1 %v409_v28  ;;  %v543_v28 = vld [vmem:[#allocation5 + $0x10] sm:$0xff] }
 0x1cd   :  { %595 = vmatpush.msrb.mxu3 %v543_v28 }
 0x1d4   :  { %413 = vmax.xlane.f32.xlu1 %v412_v32  ;;  %v542_v32 = vld [vmem:[#allocation5 + $0x8] sm:$0xff] }
 0x1d5   :  { %596 = vmatpush.msrb.mxu3 %v542_v32 }
 0x23f   :  { %v411_v33 = vpop.xlane.xlu1 %410 }
 0x240   :  { %v415_v34 = vsub.f32 %v406_v27, %v411_v33 }
 0x242   :  { %v417_v35 = vmul.f32 1.442695, %v415_v34  ;;  %v537_v34 = vld [vmem:[%s5136_s5] sm:$0xff] }
 0x244   :  { %3530 = vpow2.f32 %v417_v35  ;;  %v541_v35 = vld [vmem:[#allocation5] sm:$0xff] }
 0x245   :  { %597 = vmatpush.msrb.mxu3 %v541_v35 }
 0x247   :  { %v414_v36 = vpop.xlane.xlu1 %413 }
 0x248   :  { %v416_v37 = vsub.f32 %v407_v31, %v414_v36  ;;  %v538_v31 = vld [vmem:[%s5136_s5 + $0x8] sm:$0xff] }
 0x249   :  { %570 = vmatpush.msrb.mxu2 %v538_v31 }
 0x24a   :  { %v3531_v38 = vpop.eup %3530  ;;  %v419_v39 = vmul.f32 1.442695, %v416_v37 }
 0x24b   :  { %v421_v40 = vsel %vm282_vm1, %v3531_v38, 0.0  ;;  %571 = vmatpush.msrb.mxu2 %v537_v34 }
 0x24c   :  { %3532 = vpow2.f32 %v419_v39  ;;  %v423_v41 = vsel %vm408_vm3, %v421_v40, 0.0 }
 0x24d   :  { %424 = vadd.xlane.f32.xlu2 %v423_v41 }
 0x252   :  { %v3533_v42 = vpop.eup %3532 }
 0x253   :  { %v422_v43 = vsel %vm283_vm4, %v3533_v42, 0.0 }
 0x254   :  { %v426_v44 = vsel %vm408_vm3, %v422_v43, 0.0 }
 0x255   :  { %427 = vadd.xlane.f32.xlu2 %v426_v44 }
 0x2c0   :  { %v425_v49 = vpop.xlane.xlu2 %424 }
 0x2c1   :  { %v429_v50 = vmax.f32 %v425_v49, 1e-30 }
 0x2c3   :  { %3534 = vrcp.f32 %v429_v50 }
 0x2c8   :  { %v428_v51 = vpop.xlane.xlu2 %427 }
 0x2c9   :  { %v3535_v52 = vpop.eup %3534  ;;  %v430_v53 = vmax.f32 %v428_v51, 1e-30  ;;  %v3512_v51 = vld [vmem:[%s5138_s25] ss:$0 sm:$0xff] }
 0x2ca   :  { %v433_v54 = vmul.f32 %v3535_v52, %v421_v40 }
 0x2cb   :  { %3536 = vrcp.f32 %v430_v53 }
 0x2cc   :  { %3297 = vmatmul.msk.f32.vlgmr.msra.gmra.mxu3 %vm408_vm3, %v433_v54  ;;  %3538 = vrcp.f32 %v4052_v4 }
 0x2d1   :  { %v3537_v55 = vpop.eup %3536 }
 0x2d2   :  { %v434_v56 = vmul.f32 %v3537_v55, %v422_v43  ;;  %v3539_v5 = vpop.eup %3538 }
 0x2d3   :  { %v471_v6 = vmul.f32 32.0, %v3539_v5  ;;  %vm475_vm6 = vweird.f32 %v3539_v5 }
 0x2d4   :  { %3298 = vmatmul.msk.f32.gmra.mxu3 %vm408_vm3, %v434_v56 }
 0x2d5   :  { %v472_v7 = vsub.f32 1.0, %v471_v6 }
 0x2d7   :  { %v473_v8 = vmul.f32 %v3539_v5, %v472_v7  ;;  %v3514_v7 = vld [vmem:[%s5139_s29] ss:$0 sm:$0xff] }
 0x2d9   :  { %v474_v9 = vadd.f32 %v3539_v5, %v473_v8 }
 0x2db   :  { %v4381_v10 = vsel %vm475_vm6, %v3539_v5, %v474_v9 }
 0x34f   :  { %v458_v60 = vpop.f32.mrf.mxu3 }
 0x350   :  { %v459_v61 = vadd.f32 %v458_v60, %v352_v59 }
 0x352   :  { %v464_v63 = vsel %vm301_vm0, %v459_v61, 0.0 }
 0x353   :  { %465 = vadd.xlane.f32.xlu0 %v464_v63 }
 0x357   :  { %v461_v1 = vpop.f32.mrf.mxu3 }
 0x358   :  { %v462_v2 = vadd.f32 %v461_v1, %v355_v0 }
 0x35a   :  { %v467_v3 = vsel %vm301_vm0, %v462_v2, 0.0 }
 0x35b   :  { %468 = vadd.xlane.f32.xlu1 %v467_v3 }
 0x3c6   :  { %v466_v11 = vpop.xlane.xlu0 %465 }
 0x3c7   :  { %v477_v12 = vmul.f32 %v4381_v10, %v466_v11 }
 0x3c9   :  { %v479_v13 = vsub.f32 %v459_v61, %v477_v12 }
 0x3cb   :  { %v481_v14 = vmul.f32 %v479_v13, %v479_v13 }
 0x3cd   :  { %v483_v16 = vsel %vm301_vm0, %v481_v14, 0.0 }
 0x3ce   :  { %484 = vadd.xlane.f32.xlu2 %v483_v16  ;;  %v469_v17 = vpop.xlane.xlu1 %468  ;;  %v547_v16 = vld [vmem:[%s5140_s3] sm:$0x1] }
 0x3cf   :  { %v478_v18 = vmul.f32 %v4381_v10, %v469_v17 }
 0x3d1   :  { %v480_v19 = vsub.f32 %v462_v2, %v478_v18 }
 0x3d3   :  { %v482_v20 = vmul.f32 %v480_v19, %v480_v19 }
 0x3d5   :  { %v486_v21 = vsel %vm301_vm0, %v482_v20, 0.0 }
 0x3d6   :  { %487 = vadd.xlane.f32.xlu0 %v486_v21 }
 0x441   :  { %v485_v27 = vpop.xlane.xlu2 %484 }
 0x442   :  { %v489_v30 = vmul.f32 %v485_v27, %v4381_v10 }
 0x444   :  { %v491_v33 = vadd.f32 1e-05, %v489_v30 }
 0x446   :  { %3540 = vrsqrt.f32 %v491_v33  ;;  %vm499_vm8 = vweird.f32 %v491_v33 }
 0x449   :  { %v488_v36 = vpop.xlane.xlu0 %487 }
 0x44a   :  { %v490_v37 = vmul.f32 %v488_v36, %v4381_v10 }
 0x44c   :  { %v3541_v38 = vpop.eup %3540  ;;  %v492_v39 = vadd.f32 1e-05, %v490_v37 }
 0x44d   :  { %v494_v40 = vmul.f32 %v3541_v38, %v491_v33  ;;  %vm500_vm7 = vweird.f32 %v3541_v38 }
 0x44e   :  { %3542 = vrsqrt.f32 %v492_v39  ;;  %vm501_vm9 = vmor %vm499_vm8, %vm500_vm7  ;;  %vm509_vm11 = vweird.f32 %v492_v39 }
 0x44f   :  { %v495_v41 = vmul.f32 %v3541_v38, %v494_v40 }
 0x451   :  { %v496_v42 = vmul.f32 0.5, %v495_v41 }
 0x453   :  { %v497_v43 = vsub.f32 1.5, %v496_v42 }
 0x454   :  { %v3543_v44 = vpop.eup %3542 }
 0x455   :  { %v498_v45 = vmul.f32 %v3541_v38, %v497_v43  ;;  %v504_v46 = vmul.f32 %v3543_v44, %v492_v39  ;;  %vm510_vm10 = vweird.f32 %v3543_v44 }
 0x456   :  { %vm511_vm12 = vmor %vm509_vm11, %vm510_vm10 }
 0x457   :  { %v502_v48 = vsel %vm501_vm9, %v3541_v38, %v498_v45  ;;  %v505_v49 = vmul.f32 %v3543_v44, %v504_v46 }
 0x458   :  { %v513_v50 = vmul.f32 %v502_v48, %v479_v13 }
 0x459   :  { %v506_v52 = vmul.f32 0.5, %v505_v49 }
 0x45a   :  { %v518_v53 = vmul.f32 %v3511_v47, %v513_v50 }
 0x45b   :  { %v507_v54 = vsub.f32 1.5, %v506_v52 }
 0x45c   :  { %v523_v55 = vadd.f32 %v3512_v51, %v518_v53 }
 0x45d   :  { %v508_v56 = vmul.f32 %v3543_v44, %v507_v54 }
 0x45e   :  { %v527_v57 = vmin.f32 %v523_v55, 0.0  ;;  %vm525_vm13 = vcmp.gt.f32.partialorder %v523_v55, 0.0 }
 0x45f   :  { %v512_v58 = vsel %vm511_vm12, %v3543_v44, %v508_v56 }
 0x460   :  { %v514_v59 = vmul.f32 %v512_v58, %v480_v19  ;;  %v529_v60 = vmul.f32 1.442695, %v527_v57 }
 0x462   :  { %3544 = vpow2.f32 %v529_v60  ;;  %v519_v61 = vmul.f32 %v3511_v47, %v514_v59 }
 0x464   :  { %v524_v62 = vadd.f32 %v3512_v51, %v519_v61 }
 0x466   :  { %v528_v63 = vmin.f32 %v524_v62, 0.0  ;;  %vm526_vm14 = vcmp.gt.f32.partialorder %v524_v62, 0.0 }
 0x468   :  { %v3545_v0 = vpop.eup %3544  ;;  %v531_v1 = vmul.f32 1.442695, %v528_v63 }
 0x469   :  { %v3299_v2 = vadd.f32 -1.0, %v3545_v0 }
 0x46a   :  { %3546 = vpow2.f32 %v531_v1 }
 0x46b   :  { %v535_v3 = vsel %vm525_vm13, %v523_v55, %v3299_v2  ;;  %v3513_v55 = vld [vmem:[%s5141_s8] ss:$0 sm:$0xff] }
 0x46c   :  { %3301 = vmatmul.msk.f32.vlgmr.msrb.gmra.mxu2 %vm301_vm0, %v535_v3  ;;  %3303 = vmatmul.msk.f32.vlgmr.msrb.gmra.mxu3 %vm301_vm0, %v535_v3 }
 0x470   :  { %v3547_v4 = vpop.eup %3546 }
 0x471   :  { %v3300_v5 = vadd.f32 -1.0, %v3547_v4 }
 0x473   :  { %v536_v6 = vsel %vm526_vm14, %v524_v62, %v3300_v5 }
 0x474   :  { %3302 = vmatmul.msk.f32.gmra.mxu2 %vm301_vm0, %v536_v6  ;;  %3304 = vmatmul.msk.f32.gmra.mxu3 %vm301_vm0, %v536_v6 }
 0x4ef   :  { %v573_v8 = vpop.f32.mrf.mxu2  ;;  %v599_v54 = vpop.f32.mrf.mxu3 }
 0x4f0   :  { %v608_v9 = vmul.f32 %v3514_v7, %v573_v8  ;;  %v600_v56 = vadd.f32 %v3513_v55, %v599_v54 }
 0x4f2   :  { %v610_v11 = vsel %vm301_vm0, %v608_v9, 0.0 }
 0x4f3   :  { %611 = vadd.xlane.f32.xlu1 %v610_v11 }
 0x4f7   :  { %v576_v12 = vpop.f32.mrf.mxu2  ;;  %v602_v60 = vpop.f32.mrf.mxu3 }
 0x4f8   :  { %3305 = vmatpush.xpose.msk.msrb.mxu0 %vm301_vm0, %v576_v12  ;;  %702 = vmatpush.msrb.mxu1 %v576_v12  ;;  %v609_v13 = vmul.f32 %v3514_v7, %v576_v12  ;;  %v603_v61 = vadd.f32 %v3513_v55, %v602_v60  ;;  %v780_v12 = vld [vmem:[#allocation7 + $0x18] sm:$0xff] }
 0x4fa   :  { %703 = vmatpush.msrb.mxu1 %v573_v8  ;;  %v613_v14 = vsel %vm301_vm0, %v609_v13, 0.0  ;;  %v784_v13 = vld [vmem:[#allocation8 + $0x18] sm:$0xff] }
 0x4fb   :  { %614 = vadd.xlane.f32.xlu2 %v613_v14  ;;  %v779_v14 = vld [vmem:[#allocation7 + $0x10] sm:$0xff]  ;;  %834 = vmatpush.msra.mxu2 %v784_v13 }
 0x4fc   :  { %3306 = vmatpush.xpose.msk.msrb.mxu0 %vm301_vm0, %v573_v8 }
 0x4ff   :  { %3307 = vmatmul.msk.f32.vlgmr.msrb.gmra.mxu0 %vm301_vm0, %v547_v16 }
 0x500   :  { %808 = vmatpush.msra.mxu0 %v780_v12 }
 0x502   :  { %809 = vmatpush.msra.mxu0 %v779_v14 }
 0x566   :  { %v612_v19 = vpop.xlane.xlu1 %611 }
 0x56e   :  { %v615_v20 = vpop.xlane.xlu2 %614 }
 0x57c   :  { %v642_v17 = vpop.f32.mrf.mxu0 }
 0x57d   :  { %v645_v18 = vperm.slane %v642_v17, 0  ;;  %v783_v17 = vld [vmem:[#allocation8 + $0x10] sm:$0xff] }
 0x57e   :  { %835 = vmatpush.msra.mxu2 %v783_v17 }
 0x57f   :  { %v646_v21 = vadd.f32 %v645_v18, %v612_v19  ;;  %v647_v23 = vadd.f32 %v645_v18, %v615_v20  ;;  %v778_v19 = vld [vmem:[#allocation7 + $0x8] sm:$0xff] }
 0x580   :  { %v782_v20 = vld [vmem:[#allocation8 + $0x8] sm:$0xff]  ;;  %810 = vmatpush.msra.mxu0 %v778_v19 }
 0x581   :  { %vm648_vm15 = vcmp.gt.f32.partialorder %v646_v21, 0.0  ;;  %v650_v25 = vmul.f32 0.2, %v646_v21  ;;  %vm649_vm2 = vcmp.gt.f32.partialorder %v647_v23, 0.0  ;;  %v651_v26 = vmul.f32 0.2, %v647_v23  ;;  %836 = vmatpush.msra.mxu2 %v782_v20 }
 0x583   :  { %v652_v27 = vsel %vm648_vm15, %v646_v21, %v650_v25  ;;  %v653_v28 = vsel %vm649_vm2, %v647_v23, %v651_v26  ;;  %v777_v23 = vld [vmem:[#allocation7] sm:$0xff] }
 0x584   :  { %v654_v30 = vadd.f32 %v652_v27, %v4349_v22  ;;  %v655_v31 = vadd.f32 %v653_v28, %v4358_v29  ;;  %v781_v25 = vld [vmem:[#allocation8] sm:$0xff]  ;;  %811 = vmatpush.msra.mxu0 %v777_v23 }
 0x585   :  { %837 = vmatpush.msra.mxu2 %v781_v25 }
 0x586   :  { %v656_v32 = vsel %vm408_vm3, %v654_v30, -inf  ;;  %v659_v33 = vsel %vm408_vm3, %v655_v31, -inf }
 0x587   :  { %657 = vmax.xlane.f32.xlu0 %v656_v32  ;;  %660 = vmax.xlane.f32.xlu1 %v659_v33 }
 0x5fa   :  { %v658_v34 = vpop.xlane.xlu0 %657  ;;  %v661_v35 = vpop.xlane.xlu1 %660 }
 0x5fb   :  { %v662_v36 = vsub.f32 %v654_v30, %v658_v34  ;;  %v663_v37 = vsub.f32 %v655_v31, %v661_v35 }
 0x5fd   :  { %v664_v38 = vmul.f32 1.442695, %v662_v36  ;;  %v666_v39 = vmul.f32 1.442695, %v663_v37 }
 0x5ff   :  { %3548 = vpow2.f32 %v664_v38  ;;  %v3515_v38 = vld [vmem:[%s5142_s12] ss:$0 sm:$0xff] }
 0x600   :  { %3550 = vpow2.f32 %v666_v39 }
 0x605   :  { %v3549_v40 = vpop.eup %3548 }
 0x606   :  { %v3551_v41 = vpop.eup %3550  ;;  %v668_v42 = vsel %vm282_vm1, %v3549_v40, 0.0 }
 0x607   :  { %v670_v43 = vsel %vm408_vm3, %v668_v42, 0.0  ;;  %v669_v44 = vsel %vm283_vm4, %v3551_v41, 0.0 }
 0x608   :  { %671 = vadd.xlane.f32.xlu2 %v670_v43  ;;  %v673_v45 = vsel %vm408_vm3, %v669_v44, 0.0 }
 0x609   :  { %674 = vadd.xlane.f32.xlu0 %v673_v45 }
 0x67b   :  { %v672_v46 = vpop.xlane.xlu2 %671 }
 0x67c   :  { %v676_v47 = vmax.f32 %v672_v46, 1e-30  ;;  %v675_v48 = vpop.xlane.xlu0 %674 }
 0x67d   :  { %v677_v49 = vmax.f32 %v675_v48, 1e-30 }
 0x67e   :  { %3552 = vrcp.f32 %v676_v47 }
 0x67f   :  { %3554 = vrcp.f32 %v677_v49 }
 0x684   :  { %v3553_v50 = vpop.eup %3552 }
 0x685   :  { %v680_v51 = vmul.f32 %v3553_v50, %v668_v42  ;;  %v3555_v52 = vpop.eup %3554  ;;  %v3516_v42 = vld [vmem:[%s5143_s22] ss:$0 sm:$0xff] }
 0x686   :  { %v681_v53 = vmul.f32 %v3555_v52, %v669_v44 }
 0x687   :  { %3308 = vmatmul.msk.f32.vlgmr.msrb.gmra.mxu1 %vm408_vm3, %v680_v51 }
 0x68f   :  { %3309 = vmatmul.msk.f32.gmra.mxu1 %vm408_vm3, %v681_v53 }
 0x704   :  { %v705_v57 = vpop.f32.mrf.mxu1 }
 0x705   :  { %v706_v58 = vadd.f32 %v705_v57, %v600_v56 }
 0x707   :  { %v711_v59 = vsel %vm301_vm0, %v706_v58, 0.0 }
 0x708   :  { %712 = vadd.xlane.f32.xlu1 %v711_v59 }
 0x70c   :  { %v708_v62 = vpop.f32.mrf.mxu1 }
 0x70d   :  { %v709_v63 = vadd.f32 %v708_v62, %v603_v61  ;;  %v3517_v62 = vld [vmem:[%s5144_s23] ss:$0 sm:$0xff] }
 0x70f   :  { %v714_v0 = vsel %vm301_vm0, %v709_v63, 0.0 }
 0x710   :  { %715 = vadd.xlane.f32.xlu2 %v714_v0 }
 0x77b   :  { %v713_v1 = vpop.xlane.xlu1 %712 }
 0x77c   :  { %v717_v2 = vmul.f32 %v713_v1, %v4381_v10 }
 0x77e   :  { %v719_v3 = vsub.f32 %v706_v58, %v717_v2 }
 0x780   :  { %v721_v4 = vmul.f32 %v719_v3, %v719_v3 }
 0x782   :  { %v723_v5 = vsel %vm301_vm0, %v721_v4, 0.0 }
 0x783   :  { %v716_v6 = vpop.xlane.xlu2 %715  ;;  %724 = vadd.xlane.f32.xlu0 %v723_v5  ;;  %v787_v5 = vld [vmem:[%s5145_s0] sm:$0x1] }
 0x784   :  { %v718_v7 = vmul.f32 %v716_v6, %v4381_v10 }
 0x786   :  { %v720_v8 = vsub.f32 %v709_v63, %v718_v7 }
 0x788   :  { %v722_v9 = vmul.f32 %v720_v8, %v720_v8 }
 0x78a   :  { %v726_v11 = vsel %vm301_vm0, %v722_v9, 0.0 }
 0x78b   :  { %727 = vadd.xlane.f32.xlu1 %v726_v11 }
 0x7f6   :  { %v725_v16 = vpop.xlane.xlu0 %724 }
 0x7f7   :  { %v729_v18 = vmul.f32 %v725_v16, %v4381_v10 }
 0x7f9   :  { %v731_v21 = vadd.f32 1e-05, %v729_v18 }
 0x7fb   :  { %3556 = vrsqrt.f32 %v731_v21  ;;  %vm739_vm6 = vweird.f32 %v731_v21 }
 0x7fe   :  { %v728_v26 = vpop.xlane.xlu1 %727 }
 0x7ff   :  { %v730_v27 = vmul.f32 %v728_v26, %v4381_v10 }
 0x801   :  { %v3557_v28 = vpop.eup %3556  ;;  %v732_v30 = vadd.f32 1e-05, %v730_v27 }
 0x802   :  { %v734_v31 = vmul.f32 %v3557_v28, %v731_v21  ;;  %vm740_vm5 = vweird.f32 %v3557_v28 }
 0x803   :  { %3558 = vrsqrt.f32 %v732_v30  ;;  %vm741_vm7 = vmor %vm739_vm6, %vm740_vm5  ;;  %vm749_vm9 = vweird.f32 %v732_v30 }
 0x804   :  { %v735_v32 = vmul.f32 %v3557_v28, %v734_v31 }
 0x806   :  { %v736_v33 = vmul.f32 0.5, %v735_v32 }
 0x808   :  { %v737_v34 = vsub.f32 1.5, %v736_v33 }
 0x809   :  { %v3559_v35 = vpop.eup %3558 }
 0x80a   :  { %v738_v36 = vmul.f32 %v3557_v28, %v737_v34  ;;  %v744_v37 = vmul.f32 %v3559_v35, %v732_v30  ;;  %vm750_vm8 = vweird.f32 %v3559_v35 }
 0x80b   :  { %vm751_vm10 = vmor %vm749_vm9, %vm750_vm8 }
 0x80c   :  { %v742_v39 = vsel %vm741_vm7, %v3557_v28, %v738_v36  ;;  %v745_v40 = vmul.f32 %v3559_v35, %v744_v37 }
 0x80d   :  { %v753_v41 = vmul.f32 %v742_v39, %v719_v3 }
 0x80e   :  { %v746_v43 = vmul.f32 0.5, %v745_v40 }
 0x80f   :  { %v758_v44 = vmul.f32 %v3515_v38, %v753_v41 }
 0x810   :  { %v747_v45 = vsub.f32 1.5, %v746_v43 }
 0x811   :  { %v763_v46 = vadd.f32 %v3516_v42, %v758_v44 }
 0x812   :  { %v748_v47 = vmul.f32 %v3559_v35, %v747_v45 }
 0x813   :  { %v767_v48 = vmin.f32 %v763_v46, 0.0  ;;  %vm765_vm11 = vcmp.gt.f32.partialorder %v763_v46, 0.0 }
 0x814   :  { %v752_v49 = vsel %vm751_vm10, %v3559_v35, %v748_v47 }
 0x815   :  { %v754_v50 = vmul.f32 %v752_v49, %v720_v8  ;;  %v769_v51 = vmul.f32 1.442695, %v767_v48 }
 0x817   :  { %3560 = vpow2.f32 %v769_v51  ;;  %v759_v52 = vmul.f32 %v3515_v38, %v754_v50 }
 0x819   :  { %v764_v53 = vadd.f32 %v3516_v42, %v759_v52 }
 0x81b   :  { %v768_v54 = vmin.f32 %v764_v53, 0.0  ;;  %vm766_vm12 = vcmp.gt.f32.partialorder %v764_v53, 0.0 }
 0x81d   :  { %v3561_v55 = vpop.eup %3560  ;;  %v771_v56 = vmul.f32 1.442695, %v768_v54 }
 0x81e   :  { %v3310_v57 = vadd.f32 -1.0, %v3561_v55 }
 0x81f   :  { %3562 = vpow2.f32 %v771_v56 }
 0x820   :  { %v775_v58 = vsel %vm765_vm11, %v763_v46, %v3310_v57  ;;  %v3518_v46 = vld [vmem:[%s5146_s7] ss:$0 sm:$0xff] }
 0x821   :  { %3312 = vmatmul.msk.f32.vlgmr.msra.gmra.mxu0 %vm301_vm0, %v775_v58  ;;  %3314 = vmatmul.msk.f32.vlgmr.msra.gmra.mxu2 %vm301_vm0, %v775_v58 }
 0x825   :  { %v3563_v59 = vpop.eup %3562 }
 0x826   :  { %v3311_v60 = vadd.f32 -1.0, %v3563_v59 }
 0x828   :  { %v776_v61 = vsel %vm766_vm12, %v764_v53, %v3311_v60 }
 0x829   :  { %3313 = vmatmul.msk.f32.gmra.mxu0 %vm301_vm0, %v776_v61  ;;  %3315 = vmatmul.msk.f32.gmra.mxu2 %vm301_vm0, %v776_v61 }
 0x89e   :  { %v813_v63 = vpop.f32.mrf.mxu0 }
 0x89f   :  { %v848_v0 = vmul.f32 %v3517_v62, %v813_v63 }
 0x8a1   :  { %v850_v1 = vsel %vm301_vm0, %v848_v0, 0.0 }
 0x8a2   :  { %851 = vadd.xlane.f32.xlu2 %v850_v1 }
 0x8a4   :  { %v839_v45 = vpop.f32.mrf.mxu2 }
 0x8a5   :  { %v840_v47 = vadd.f32 %v3518_v46, %v839_v45 }
 0x8a6   :  { %v816_v2 = vpop.f32.mrf.mxu0 }
 0x8a7   :  { %3316 = vmatpush.xpose.msk.msra.mxu3 %vm301_vm0, %v816_v2  ;;  %942 = vmatpush.msra.mxu1 %v816_v2  ;;  %v849_v3 = vmul.f32 %v3517_v62, %v816_v2  ;;  %v1020_v2 = vld [vmem:[#allocation10 + $0x18] sm:$0xff] }
 0x8a9   :  { %943 = vmatpush.msra.mxu1 %v813_v63  ;;  %v853_v4 = vsel %vm301_vm0, %v849_v3, 0.0  ;;  %v1024_v3 = vld [vmem:[#allocation11 + $0x18] sm:$0xff] }
 0x8aa   :  { %854 = vadd.xlane.f32.xlu0 %v853_v4  ;;  %v1019_v4 = vld [vmem:[#allocation10 + $0x10] sm:$0xff]  ;;  %1074 = vmatpush.msrb.mxu0 %v1024_v3 }
 0x8ab   :  { %3317 = vmatpush.xpose.msk.msra.mxu3 %vm301_vm0, %v813_v63 }
 0x8ac   :  { %v842_v51 = vpop.f32.mrf.mxu2 }
 0x8ad   :  { %v843_v52 = vadd.f32 %v3518_v46, %v842_v51 }
 0x8ae   :  { %3318 = vmatmul.msk.f32.vlgmr.msra.gmra.mxu3 %vm301_vm0, %v787_v5 }
 0x8af   :  { %1048 = vmatpush.msrb.mxu3 %v1020_v2 }
 0x8b1   :  { %1049 = vmatpush.msrb.mxu3 %v1019_v4 }
 0x915   :  { %v852_v8 = vpop.xlane.xlu2 %851 }
 0x91d   :  { %v855_v9 = vpop.xlane.xlu0 %854 }
 0x931   :  { %v882_v6 = vpop.f32.mrf.mxu3 }
 0x932   :  { %v885_v7 = vperm.slane %v882_v6, 0  ;;  %v1023_v6 = vld [vmem:[#allocation11 + $0x10] sm:$0xff] }
 0x933   :  { %1075 = vmatpush.msrb.mxu0 %v1023_v6 }
 0x934   :  { %v886_v11 = vadd.f32 %v885_v7, %v852_v8  ;;  %v887_v12 = vadd.f32 %v885_v7, %v855_v9  ;;  %v1018_v8 = vld [vmem:[#allocation10 + $0x8] sm:$0xff] }
 0x935   :  { %v1022_v9 = vld [vmem:[#allocation11 + $0x8] sm:$0xff]  ;;  %1050 = vmatpush.msrb.mxu3 %v1018_v8 }
 0x936   :  { %vm888_vm13 = vcmp.gt.f32.partialorder %v886_v11, 0.0  ;;  %v890_v13 = vmul.f32 0.2, %v886_v11  ;;  %vm889_vm14 = vcmp.gt.f32.partialorder %v887_v12, 0.0  ;;  %v891_v14 = vmul.f32 0.2, %v887_v12  ;;  %1076 = vmatpush.msrb.mxu0 %v1022_v9 }
 0x938   :  { %v892_v16 = vsel %vm888_vm13, %v886_v11, %v890_v13  ;;  %v893_v17 = vsel %vm889_vm14, %v887_v12, %v891_v14  ;;  %v1017_v12 = vld [vmem:[#allocation10] sm:$0xff] }
 0x939   :  { %v894_v18 = vadd.f32 %v892_v16, %v4349_v22  ;;  %v895_v19 = vadd.f32 %v893_v17, %v4358_v29  ;;  %v1021_v13 = vld [vmem:[#allocation11] sm:$0xff]  ;;  %1051 = vmatpush.msrb.mxu3 %v1017_v12 }
 0x93a   :  { %1077 = vmatpush.msrb.mxu0 %v1021_v13 }
 0x93b   :  { %v896_v20 = vsel %vm408_vm3, %v894_v18, -inf  ;;  %v899_v21 = vsel %vm408_vm3, %v895_v19, -inf }
 0x93c   :  { %897 = vmax.xlane.f32.xlu1 %v896_v20  ;;  %900 = vmax.xlane.f32.xlu2 %v899_v21 }
 0x9af   :  { %v898_v23 = vpop.xlane.xlu1 %897  ;;  %v901_v25 = vpop.xlane.xlu2 %900 }
 0x9b0   :  { %v902_v26 = vsub.f32 %v894_v18, %v898_v23  ;;  %v903_v27 = vsub.f32 %v895_v19, %v901_v25 }
 0x9b2   :  { %v904_v28 = vmul.f32 1.442695, %v902_v26  ;;  %v906_v30 = vmul.f32 1.442695, %v903_v27 }
 0x9b4   :  { %3564 = vpow2.f32 %v904_v28  ;;  %v3519_v28 = vld [vmem:[%s5147_s13] ss:$0 sm:$0xff] }
 0x9b5   :  { %3566 = vpow2.f32 %v906_v30 }
 0x9ba   :  { %v3565_v31 = vpop.eup %3564 }
 0x9bb   :  { %v3567_v32 = vpop.eup %3566  ;;  %v908_v33 = vsel %vm282_vm1, %v3565_v31, 0.0 }
 0x9bc   :  { %v910_v34 = vsel %vm408_vm3, %v908_v33, 0.0  ;;  %v909_v35 = vsel %vm283_vm4, %v3567_v32, 0.0 }
 0x9bd   :  { %911 = vadd.xlane.f32.xlu0 %v910_v34  ;;  %v913_v36 = vsel %vm408_vm3, %v909_v35, 0.0 }
 0x9be   :  { %914 = vadd.xlane.f32.xlu1 %v913_v36 }
 0xa30   :  { %v912_v37 = vpop.xlane.xlu0 %911 }
 0xa31   :  { %v916_v38 = vmax.f32 %v912_v37, 1e-30  ;;  %v915_v39 = vpop.xlane.xlu1 %914 }
 0xa32   :  { %v917_v40 = vmax.f32 %v915_v39, 1e-30 }
 0xa33   :  { %3568 = vrcp.f32 %v916_v38 }
 0xa34   :  { %3570 = vrcp.f32 %v917_v40 }
 0xa39   :  { %v3569_v41 = vpop.eup %3568 }
 0xa3a   :  { %v920_v42 = vmul.f32 %v3569_v41, %v908_v33  ;;  %v3571_v43 = vpop.eup %3570  ;;  %v3520_v33 = vld [vmem:[%s5148_s18] ss:$0 sm:$0xff] }
 0xa3b   :  { %v921_v44 = vmul.f32 %v3571_v43, %v909_v35 }
 0xa3c   :  { %3319 = vmatmul.msk.f32.vlgmr.msra.gmra.mxu1 %vm408_vm3, %v920_v42 }
 0xa44   :  { %3320 = vmatmul.msk.f32.gmra.mxu1 %vm408_vm3, %v921_v44 }
 0xab9   :  { %v945_v48 = vpop.f32.mrf.mxu1 }
 0xaba   :  { %v946_v49 = vadd.f32 %v945_v48, %v840_v47 }
 0xabc   :  { %v951_v50 = vsel %vm301_vm0, %v946_v49, 0.0 }
 0xabd   :  { %952 = vadd.xlane.f32.xlu2 %v951_v50 }
 0xac1   :  { %v948_v53 = vpop.f32.mrf.mxu1 }
 0xac2   :  { %v949_v54 = vadd.f32 %v948_v53, %v843_v52  ;;  %v3522_v53 = vld [vmem:[%s5149_s17] ss:$0 sm:$0xff] }
 0xac4   :  { %v954_v55 = vsel %vm301_vm0, %v949_v54, 0.0 }
 0xac5   :  { %955 = vadd.xlane.f32.xlu0 %v954_v55 }
 0xb30   :  { %v953_v56 = vpop.xlane.xlu2 %952 }
 0xb31   :  { %v957_v57 = vmul.f32 %v953_v56, %v4381_v10 }
 0xb33   :  { %v959_v58 = vsub.f32 %v946_v49, %v957_v57 }
 0xb35   :  { %v961_v59 = vmul.f32 %v959_v58, %v959_v58 }
 0xb37   :  { %v963_v60 = vsel %vm301_vm0, %v961_v59, 0.0 }
 0xb38   :  { %v956_v61 = vpop.xlane.xlu0 %955  ;;  %964 = vadd.xlane.f32.xlu1 %v963_v60  ;;  %v1027_v60 = vld [vmem:[%s5150_s15] sm:$0x1] }
 0xb39   :  { %v958_v62 = vmul.f32 %v956_v61, %v4381_v10 }
 0xb3b   :  { %v960_v63 = vsub.f32 %v949_v54, %v958_v62 }
 0xb3d   :  { %v962_v0 = vmul.f32 %v960_v63, %v960_v63 }
 0xb3f   :  { %v966_v1 = vsel %vm301_vm0, %v962_v0, 0.0 }
 0xb40   :  { %967 = vadd.xlane.f32.xlu2 %v966_v1 }
 0xbab   :  { %v965_v5 = vpop.xlane.xlu1 %964 }
 0xbac   :  { %v969_v7 = vmul.f32 %v965_v5, %v4381_v10 }
 0xbae   :  { %v971_v11 = vadd.f32 1e-05, %v969_v7 }
 0xbb0   :  { %3572 = vrsqrt.f32 %v971_v11  ;;  %vm979_vm2 = vweird.f32 %v971_v11 }
 0xbb3   :  { %v968_v14 = vpop.xlane.xlu2 %967 }
 0xbb4   :  { %v970_v16 = vmul.f32 %v968_v14, %v4381_v10 }
 0xbb6   :  { %v3573_v17 = vpop.eup %3572  ;;  %v972_v18 = vadd.f32 1e-05, %v970_v16 }
 0xbb7   :  { %v974_v19 = vmul.f32 %v3573_v17, %v971_v11  ;;  %vm980_vm15 = vweird.f32 %v3573_v17 }
 0xbb8   :  { %3574 = vrsqrt.f32 %v972_v18  ;;  %vm981_vm5 = vmor %vm979_vm2, %vm980_vm15  ;;  %vm989_vm7 = vweird.f32 %v972_v18 }
 0xbb9   :  { %v975_v20 = vmul.f32 %v3573_v17, %v974_v19 }
 0xbbb   :  { %v976_v21 = vmul.f32 0.5, %v975_v20 }
 0xbbd   :  { %v977_v23 = vsub.f32 1.5, %v976_v21 }
 0xbbe   :  { %v3575_v25 = vpop.eup %3574 }
 0xbbf   :  { %v978_v26 = vmul.f32 %v3573_v17, %v977_v23  ;;  %v984_v27 = vmul.f32 %v3575_v25, %v972_v18  ;;  %vm990_vm6 = vweird.f32 %v3575_v25 }
 0xbc0   :  { %vm991_vm8 = vmor %vm989_vm7, %vm990_vm6 }
 0xbc1   :  { %v982_v30 = vsel %vm981_vm5, %v3573_v17, %v978_v26  ;;  %v985_v31 = vmul.f32 %v3575_v25, %v984_v27 }
 0xbc2   :  { %v993_v32 = vmul.f32 %v982_v30, %v959_v58 }
 0xbc3   :  { %v986_v34 = vmul.f32 0.5, %v985_v31 }
 0xbc4   :  { %v998_v35 = vmul.f32 %v3519_v28, %v993_v32 }
 0xbc5   :  { %v987_v36 = vsub.f32 1.5, %v986_v34 }
 0xbc6   :  { %v1003_v37 = vadd.f32 %v3520_v33, %v998_v35 }
 0xbc7   :  { %v988_v38 = vmul.f32 %v3575_v25, %v987_v36 }
 0xbc8   :  { %v1007_v39 = vmin.f32 %v1003_v37, 0.0  ;;  %vm1005_vm9 = vcmp.gt.f32.partialorder %v1003_v37, 0.0 }
 0xbc9   :  { %v992_v40 = vsel %vm991_vm8, %v3575_v25, %v988_v38 }
 0xbca   :  { %v994_v41 = vmul.f32 %v992_v40, %v960_v63  ;;  %v1009_v42 = vmul.f32 1.442695, %v1007_v39 }
 0xbcc   :  { %3576 = vpow2.f32 %v1009_v42  ;;  %v999_v43 = vmul.f32 %v3519_v28, %v994_v41 }
 0xbce   :  { %v1004_v44 = vadd.f32 %v3520_v33, %v999_v43  ;;  %v3521_v33 = vld [vmem:[%s5151_s26] ss:$0 sm:$0xff] }
 0xbd0   :  { %v1008_v45 = vmin.f32 %v1004_v44, 0.0  ;;  %vm1006_vm10 = vcmp.gt.f32.partialorder %v1004_v44, 0.0 }
 0xbd2   :  { %v3577_v46 = vpop.eup %3576  ;;  %v1011_v47 = vmul.f32 1.442695, %v1008_v45 }
 0xbd3   :  { %v3321_v48 = vadd.f32 -1.0, %v3577_v46 }
 0xbd4   :  { %3578 = vpow2.f32 %v1011_v47 }
 0xbd5   :  { %v1015_v49 = vsel %vm1005_vm9, %v1003_v37, %v3321_v48 }
 0xbd6   :  { %3323 = vmatmul.msk.f32.vlgmr.msrb.gmra.mxu3 %vm301_vm0, %v1015_v49  ;;  %3325 = vmatmul.msk.f32.vlgmr.msrb.gmra.mxu0 %vm301_vm0, %v1015_v49 }
 0xbda   :  { %v3579_v50 = vpop.eup %3578 }
 0xbdb   :  { %v3322_v51 = vadd.f32 -1.0, %v3579_v50 }
 0xbdd   :  { %v1016_v52 = vsel %vm1006_vm10, %v1004_v44, %v3322_v51 }
 0xbde   :  { %3324 = vmatmul.msk.f32.gmra.mxu3 %vm301_vm0, %v1016_v52  ;;  %3326 = vmatmul.msk.f32.gmra.mxu0 %vm301_vm0, %v1016_v52 }
 0xc53   :  { %v1079_v24 = vpop.f32.mrf.mxu0 }
 0xc54   :  { %v1080_v34 = vadd.f32 %v3521_v33, %v1079_v24  ;;  %v1263_v24 = vld [vmem:[%s5154_s30 + $0x28] sm:$0xff] }
 0xc59   :  { %v1053_v54 = vpop.f32.mrf.mxu3 }
 0xc5a   :  { %v1088_v55 = vmul.f32 %v3522_v53, %v1053_v54 }
 0xc5b   :  { %v1082_v38 = vpop.f32.mrf.mxu0 }
 0xc5c   :  { %v1090_v56 = vsel %vm301_vm0, %v1088_v55, 0.0  ;;  %v1083_v39 = vadd.f32 %v3521_v33, %v1082_v38  ;;  %v1348_v33 = vld [vmem:[#allocation13 + $0x18] sm:$0xff]  ;;  %v1432_v38 = vld [vmem:[#allocation13 + $0x28] sm:$0xff] }
 0xc5d   :  { %1091 = vadd.xlane.f32.xlu0 %v1090_v56  ;;  %1395 = vmatpush.msra.mxu3 %v1348_v33 }
 0xc61   :  { %v1056_v57 = vpop.f32.mrf.mxu3 }
 0xc62   :  { %3327 = vmatpush.xpose.msk.msrb.mxu2 %vm301_vm0, %v1056_v57  ;;  %1182 = vmatpush.msrb.mxu1 %v1056_v57  ;;  %v1089_v58 = vmul.f32 %v3522_v53, %v1056_v57 }
 0xc64   :  { %1183 = vmatpush.msrb.mxu1 %v1053_v54  ;;  %v1093_v59 = vsel %vm301_vm0, %v1089_v58, 0.0 }
 0xc65   :  { %1094 = vadd.xlane.f32.xlu1 %v1093_v59 }
 0xc66   :  { %3328 = vmatpush.xpose.msk.msrb.mxu2 %vm301_vm0, %v1053_v54 }
 0xc69   :  { %3329 = vmatmul.msk.f32.vlgmr.msrb.gmra.mxu2 %vm301_vm0, %v1027_v60 }
 0xcd0   :  { %v1092_v63 = vpop.xlane.xlu0 %1091 }
 0xcd8   :  { %v1095_v0 = vpop.xlane.xlu1 %1094 }
 0xcec   :  { %v1122_v61 = vpop.f32.mrf.mxu2 }
 0xced   :  { %v1125_v62 = vperm.slane %v1122_v61, 0 }
 0xcef   :  { %v1126_v1 = vadd.f32 %v1125_v62, %v1092_v63  ;;  %v1127_v2 = vadd.f32 %v1125_v62, %v1095_v0 }
 0xcf1   :  { %v1130_v3 = vmul.f32 0.2, %v1126_v1  ;;  %v1131_v4 = vmul.f32 0.2, %v1127_v2  ;;  %vm1128_vm11 = vcmp.gt.f32.partialorder %v1126_v1, 0.0  ;;  %vm1129_vm12 = vcmp.gt.f32.partialorder %v1127_v2, 0.0 }
 0xcf3   :  { %v1132_v5 = vsel %vm1128_vm11, %v1126_v1, %v1130_v3  ;;  %v1133_v6 = vsel %vm1129_vm12, %v1127_v2, %v1131_v4  ;;  %v3523_v3 = vld [vmem:[%s5152_s28] ss:$0 sm:$0xff] }
 0xcf4   :  { %v1134_v7 = vadd.f32 %v1132_v5, %v4349_v22  ;;  %v1135_v8 = vadd.f32 %v1133_v6, %v4358_v29 }
 0xcf6   :  { %v1136_v9 = vsel %vm408_vm3, %v1134_v7, -inf  ;;  %v1139_v11 = vsel %vm408_vm3, %v1135_v8, -inf }
 0xcf7   :  { %1137 = vmax.xlane.f32.xlu2 %v1136_v9  ;;  %1140 = vmax.xlane.f32.xlu0 %v1139_v11 }
 0xd6a   :  { %v1138_v12 = vpop.xlane.xlu2 %1137  ;;  %v1141_v13 = vpop.xlane.xlu0 %1140 }
 0xd6b   :  { %v1142_v14 = vsub.f32 %v1134_v7, %v1138_v12  ;;  %v1143_v16 = vsub.f32 %v1135_v8, %v1141_v13  ;;  %v3524_v7 = vld [vmem:[%s5153_s6] ss:$0 sm:$0xff] }
 0xd6d   :  { %v1144_v17 = vmul.f32 1.442695, %v1142_v14  ;;  %v1146_v18 = vmul.f32 1.442695, %v1143_v16 }
 0xd6f   :  { %3580 = vpow2.f32 %v1144_v17 }
 0xd70   :  { %3582 = vpow2.f32 %v1146_v18 }
 0xd75   :  { %v3581_v19 = vpop.eup %3580 }
 0xd76   :  { %v3583_v20 = vpop.eup %3582  ;;  %v1148_v22 = vsel %vm282_vm1, %v3581_v19, 0.0 }
 0xd77   :  { %v1150_v29 = vsel %vm408_vm3, %v1148_v22, 0.0  ;;  %v1149_v21 = vsel %vm283_vm4, %v3583_v20, 0.0 }
 0xd78   :  { %1151 = vadd.xlane.f32.xlu1 %v1150_v29  ;;  %v1153_v23 = vsel %vm408_vm3, %v1149_v21, 0.0 }
 0xd79   :  { %1154 = vadd.xlane.f32.xlu2 %v1153_v23 }
 0xdeb   :  { %v1152_v25 = vpop.xlane.xlu1 %1151 }
 0xdec   :  { %v1156_v26 = vmax.f32 %v1152_v25, 1e-30  ;;  %v1155_v27 = vpop.xlane.xlu2 %1154 }
 0xded   :  { %v1157_v28 = vmax.f32 %v1155_v27, 1e-30  ;;  %v1258_v27 = vld [vmem:[%s5154_s30] sm:$0xff] }
 0xdee   :  { %3584 = vrcp.f32 %v1156_v26 }
 0xdef   :  { %3586 = vrcp.f32 %v1157_v28 }
 0xdf4   :  { %v3585_v30 = vpop.eup %3584 }
 0xdf5   :  { %v1160_v31 = vmul.f32 %v3585_v30, %v1148_v22  ;;  %v3587_v15 = vpop.eup %3586  ;;  %v1259_v30 = vld [vmem:[%s5154_s30 + $0x8] sm:$0xff] }
 0xdf6   :  { %v1161_v32 = vmul.f32 %v3587_v15, %v1149_v21  ;;  %v1261_v15 = vld [vmem:[%s5154_s30 + $0x18] sm:$0xff] }
 0xdf7   :  { %3330 = vmatmul.msk.f32.vlgmr.msrb.gmra.mxu1 %vm408_vm3, %v1160_v31  ;;  %v1260_v31 = vld [vmem:[%s5154_s30 + $0x10] sm:$0xff] }
 0xdff   :  { %3331 = vmatmul.msk.f32.gmra.mxu1 %vm408_vm3, %v1161_v32  ;;  %v1262_v32 = vld [vmem:[%s5154_s30 + $0x20] sm:$0xff] }
 0xe74   :  { %v1185_v35 = vpop.f32.mrf.mxu1 }
 0xe75   :  { %v1186_v36 = vadd.f32 %v1185_v35, %v1080_v34  ;;  %v1434_v34 = vld [vmem:[#allocation13 + $0x38] sm:$0xff]  ;;  %v1347_v35 = vld [vmem:[#allocation13 + $0x10] sm:$0xff] }
 0xe76   :  { %1452 = vmatpush.msra.mxu0 %v1434_v34  ;;  %1396 = vmatpush.msra.mxu3 %v1347_v35 }
 0xe77   :  { %v1191_v37 = vsel %vm301_vm0, %v1186_v36, 0.0 }
 0xe78   :  { %1192 = vadd.xlane.f32.xlu1 %v1191_v37  ;;  %v1346_v37 = vld [vmem:[#allocation13 + $0x8] sm:$0xff] }
 0xe79   :  { %1397 = vmatpush.msra.mxu3 %v1346_v37 }
 0xe7c   :  { %v1188_v40 = vpop.f32.mrf.mxu1 }
 0xe7d   :  { %v1189_v41 = vadd.f32 %v1188_v40, %v1083_v39  ;;  %v1264_v39 = vld [vmem:[%s5154_s30 + $0x30] sm:$0xff]  ;;  %v1265_v40 = vld [vmem:[%s5154_s30 + $0x38] sm:$0xff] }
 0xe7f   :  { %v1194_v42 = vsel %vm301_vm0, %v1189_v41, 0.0 }
 0xe80   :  { %1195 = vadd.xlane.f32.xlu0 %v1194_v42  ;;  %v1267_v42 = vld [vmem:[%s5154_s30 + $0x48] sm:$0xff] }
 0xeeb   :  { %v1193_v43 = vpop.xlane.xlu1 %1192 }
 0xeec   :  { %v1197_v44 = vmul.f32 %v1193_v43, %v4381_v10  ;;  %v1491_v43 = vld [vmem:[#allocation13 + $0x58] sm:$0xff] }
 0xeed   :  { %1509 = vmatpush.msra.mxu1 %v1491_v43 }
 0xeee   :  { %v1199_v45 = vsub.f32 %v1186_v36, %v1197_v44  ;;  %v1433_v36 = vld [vmem:[#allocation13 + $0x30] sm:$0xff]  ;;  %v1548_v44 = vld [vmem:[#allocation13 + $0x78] sm:$0xff] }
 0xeef   :  { %1453 = vmatpush.msra.mxu0 %v1433_v36 }
 0xef0   :  { %v1201_v46 = vmul.f32 %v1199_v45, %v1199_v45 }
 0xef1   :  { %1454 = vmatpush.msra.mxu0 %v1432_v38 }
 0xef2   :  { %v1203_v47 = vsel %vm301_vm0, %v1201_v46, 0.0  ;;  %v1547_v46 = vld [vmem:[#allocation13 + $0x70] sm:$0xff] }
 0xef3   :  { %v1196_v48 = vpop.xlane.xlu0 %1195  ;;  %1204 = vadd.xlane.f32.xlu0 %v1203_v47  ;;  %v1489_v47 = vld [vmem:[#allocation13 + $0x48] sm:$0xff] }
 0xef4   :  { %v1198_v49 = vmul.f32 %v1196_v48, %v4381_v10  ;;  %v1546_v48 = vld [vmem:[#allocation13 + $0x68] sm:$0xff] }
 0xef6   :  { %v1200_v50 = vsub.f32 %v1189_v41, %v1198_v49  ;;  %v1266_v41 = vld [vmem:[%s5154_s30 + $0x40] sm:$0xff]  ;;  %v1345_v49 = vld [vmem:[#allocation13] sm:$0xff] }
 0xef7   :  { %1398 = vmatpush.msra.mxu3 %v1345_v49 }
 0xef8   :  { %v1202_v51 = vmul.f32 %v1200_v50, %v1200_v50 }
 0xefa   :  { %v1206_v52 = vsel %vm301_vm0, %v1202_v51, 0.0  ;;  %v1488_v51 = vld [vmem:[#allocation13 + $0x40] sm:$0xff] }
 0xefb   :  { %1207 = vadd.xlane.f32.xlu2 %v1206_v52  ;;  %v1545_v52 = vld [vmem:[#allocation13 + $0x60] sm:$0xff] }
 0xf66   :  { %v1205_v53 = vpop.xlane.xlu0 %1204 }
 0xf67   :  { %v1209_v54 = vmul.f32 %v1205_v53, %v4381_v10  ;;  %v4517_v53 = vld [vmem:[#allocation14 + $0x18] sm:$0xff] }
 0xf68   :  { %1620 = vmatpush.msrb.mxu3 %v4517_v53 }
 0xf69   :  { %v1211_v55 = vadd.f32 1e-05, %v1209_v54  ;;  %v4521_v54 = vld [vmem:[#allocation14 + $0x38] sm:$0xff] }
 0xf6b   :  { %3588 = vrsqrt.f32 %v1211_v55  ;;  %vm1219_vm4 = vweird.f32 %v1211_v55 }
 0xf6e   :  { %v1208_v56 = vpop.xlane.xlu2 %1207 }
 0xf6f   :  { %v1210_v57 = vmul.f32 %v1208_v56, %v4381_v10 }
 0xf71   :  { %v3589_v58 = vpop.eup %3588  ;;  %v1212_v59 = vadd.f32 1e-05, %v1210_v57  ;;  %v4531_v57 = vld [vmem:[#allocation14 + $0x30] sm:$0xff] }
 0xf72   :  { %v1214_v60 = vmul.f32 %v3589_v58, %v1211_v55  ;;  %vm1220_vm1 = vweird.f32 %v3589_v58  ;;  %v4525_v55 = vld [vmem:[#allocation14 + $0x10] sm:$0xff] }
 0xf73   :  { %3590 = vrsqrt.f32 %v1212_v59  ;;  %vm1221_vm13 = vmor %vm1219_vm4, %vm1220_vm1  ;;  %vm1229_vm15 = vweird.f32 %v1212_v59  ;;  %1621 = vmatpush.msrb.mxu3 %v4525_v55 }
 0xf74   :  { %v1215_v61 = vmul.f32 %v3589_v58, %v1214_v60  ;;  %v4543_v60 = vld [vmem:[#allocation14 + $0x8] sm:$0xff] }
 0xf75   :  { %1622 = vmatpush.msrb.mxu3 %v4543_v60 }
 0xf76   :  { %v1216_v62 = vmul.f32 0.5, %v1215_v61 }
 0xf78   :  { %v1217_v63 = vsub.f32 1.5, %v1216_v62  ;;  %v4549_v62 = vld [vmem:[#allocation14 + $0x28] sm:$0xff] }
 0xf79   :  { %v3591_v0 = vpop.eup %3590 }
 0xf7a   :  { %v1218_v1 = vmul.f32 %v3589_v58, %v1217_v63  ;;  %v1224_v2 = vmul.f32 %v3591_v0, %v1212_v59  ;;  %vm1230_vm14 = vweird.f32 %v3591_v0 }
 0xf7b   :  { %vm1231_vm2 = vmor %vm1229_vm15, %vm1230_vm14 }
 0xf7c   :  { %v1222_v4 = vsel %vm1221_vm13, %v3589_v58, %v1218_v1  ;;  %v1225_v5 = vmul.f32 %v3591_v0, %v1224_v2  ;;  %v4567_v2 = vld [vmem:[#allocation14 + $0x20] sm:$0xff] }
 0xf7d   :  { %v1233_v6 = vmul.f32 %v1222_v4, %v1199_v45  ;;  %v1490_v45 = vld [vmem:[#allocation13 + $0x50] sm:$0xff]  ;;  %v4578_v4 = vld [vmem:[#allocation14 + $0x58] sm:$0xff] }
 0xf7e   :  { %v1226_v10 = vmul.f32 0.5, %v1225_v5  ;;  %1510 = vmatpush.msra.mxu1 %v1490_v45  ;;  %v4580_v5 = vld [vmem:[#allocation14 + $0x78] sm:$0xff]  ;;  %v4692_v45 = vld [vmem:[%s4234_s19] ss:$0 sm:$0xff] }
 0xf7f   :  { %v1238_v8 = vmul.f32 %v3523_v3, %v1233_v6  ;;  %v4584_v6 = vld [vmem:[#allocation14 + $0x50] sm:$0xff] }
 0xf80   :  { %v1227_v9 = vsub.f32 1.5, %v1226_v10  ;;  %1511 = vmatpush.msra.mxu1 %v1489_v47  ;;  %v4590_v10 = vld [vmem:[#allocation14 + $0x48] sm:$0xff]  ;;  %v4695_v47 = vld [vmem:[%s4234_s19 + $0x3] ss:$0 sm:$0xff] }
 0xf81   :  { %v1243_v11 = vadd.f32 %v3524_v7, %v1238_v8  ;;  %v4592_v8 = vld [vmem:[#allocation14 + $0x68] sm:$0xff] }
 0xf82   :  { %v1228_v12 = vmul.f32 %v3591_v0, %v1227_v9  ;;  %1512 = vmatpush.msra.mxu1 %v1488_v51 }
 0xf83   :  { %v1247_v16 = vmin.f32 %v1243_v11, 0.0  ;;  %vm1245_vm6 = vcmp.gt.f32.partialorder %v1243_v11, 0.0 }
 0xf84   :  { %v1232_v13 = vsel %vm1231_vm2, %v3591_v0, %v1228_v12  ;;  %1793 = vmatpush.msrb.mxu1 %v4517_v53  ;;  %v4559_v0 = vld [vmem:[#allocation14] sm:$0xff] }
 0xf85   :  { %v1234_v14 = vmul.f32 %v1232_v13, %v1200_v50  ;;  %v1249_v19 = vmul.f32 1.442695, %v1247_v16  ;;  %v1431_v50 = vld [vmem:[#allocation13 + $0x20] sm:$0xff]  ;;  %1623 = vmatpush.msrb.mxu3 %v4559_v0  ;;  %v4609_v13 = vld [vmem:[%s5155_s4] sm:$0xff] }
 0xf86   :  { %1455 = vmatpush.msra.mxu0 %v1431_v50  ;;  %1794 = vmatpush.msrb.mxu1 %v4525_v55  ;;  %v4603_v12 = vld [vmem:[#allocation14 + $0x60] sm:$0xff]  ;;  %vm2402_vm7 = vcmp.gt.s32.totalorder %v4609_v13, 4  ;;  %vm2718_vm8 = vcmp.gt.s32.totalorder %v4609_v13, 6  ;;  %vm3034_vm9 = vcmp.gt.s32.totalorder %v4609_v13, 8  ;;  %vm1928_vm11 = vcmp.gt.s32.totalorder %v4609_v13, 1 }
 0xf87   :  { %v1239_v17 = vmul.f32 %v3523_v3, %v1234_v14  ;;  %3592 = vpow2.f32 %v1249_v19  ;;  %v5114_v14 = vmov 0   ;;  %v4054_v19 = vmov 0.0  }
 0xf88   :  { %1645 = vmatpush.msrb.mxu0 %v4521_v54  ;;  %1795 = vmatpush.msrb.mxu1 %v4543_v60  ;;  %vm2244_vm13 = vcmp.gt.s32.totalorder %v4609_v13, 3 }
 0xf89   :  { %v1244_v18 = vadd.f32 %v3524_v7, %v1239_v17  ;;  %v4586_v7 = vld [vmem:[#allocation14 + $0x70] sm:$0xff]  ;;  %3506 = vset.pattern.permute.xlu1 %v5114_v14  ;;  %3507 = vset.pattern.permute.xlu2 %v5114_v14 }
 0xf8a   :  { %1646 = vmatpush.msrb.mxu0 %v4531_v57  ;;  %1796 = vmatpush.msrb.mxu1 %v4559_v0 }
 0xf8b   :  { %v1248_v20 = vmin.f32 %v1244_v18, 0.0  ;;  %vm1246_vm5 = vcmp.gt.f32.partialorder %v1244_v18, 0.0  ;;  %3508 = vset.pattern.permute.xlu0 %v5114_v14 }
 0xf8c   :  { %1647 = vmatpush.msrb.mxu0 %v4549_v62 }
 0xf8d   :  { %v1251_v22 = vmul.f32 1.442695, %v1248_v20  ;;  %v3593_v29 = vpop.eup %3592  ;;  %v2403_v20 = vsel %vm2402_vm7, 1, %v5114_v14 }
 0xf8e   :  { %v3332_v25 = vadd.f32 -1.0, %v3593_v29  ;;  %1648 = vmatpush.msrb.mxu0 %v4567_v2  ;;  %v3035_v29 = vsel %vm3034_vm9, 1, %v5114_v14 }
 0xf8f   :  { %3594 = vpow2.f32 %v1251_v22  ;;  %v2719_v22 = vsel %vm2718_vm8, 1, %v5114_v14 }
 0xf90   :  { %v1255_v28 = vsel %vm1245_vm6, %v1243_v11, %v3332_v25  ;;  %v4601_v11 = vld [vmem:[#allocation14 + $0x40] sm:$0xff] }
 0xf95   :  { %v3595_v21 = vpop.eup %3594 }
 0xf96   :  { %v3333_v23 = vadd.f32 -1.0, %v3595_v21 }
 0xf98   :  { %v1256_v26 = vsel %vm1246_vm5, %v1244_v18, %v3333_v23 }
 0xf99   :  { %1312 = vmatpush.msra.mxu2 %v1256_v26 }
 0xf9b   :  { %1313 = vmatpush.msra.mxu2 %v1255_v28 }
 0xf9c   :  { %3334 = vmatmul.msk.f32.vlgmr.msra.gmra.mxu2 %vm408_vm3, %v1258_v27 }
 0xf9d   :  { %1566 = vmatpush.msrb.mxu2 %v1548_v44 }
 0xf9f   :  { %1567 = vmatpush.msrb.mxu2 %v1547_v46 }
 0xfa1   :  { %1568 = vmatpush.msrb.mxu2 %v1546_v48 }
 0xfa3   :  { %1569 = vmatpush.msrb.mxu2 %v1545_v52 }
 0xfa4   :  { %3335 = vmatmul.msk.f32.gmra.mxu2 %vm408_vm3, %v1259_v30 }
 0xfa5   :  { %2761 = vmatpush.msra.mxu2 %v4521_v54 }
 0xfa7   :  { %2762 = vmatpush.msra.mxu2 %v4531_v57 }
 0xfa9   :  { %2763 = vmatpush.msra.mxu2 %v4549_v62 }
 0xfab   :  { %2764 = vmatpush.msra.mxu2 %v4567_v2 }
 0xfac   :  { %3336 = vmatmul.msk.f32.gmra.mxu2 %vm408_vm3, %v1260_v31 }
 0xfb4   :  { %3337 = vmatmul.msk.f32.gmra.mxu2 %vm408_vm3, %v1261_v15 }
 0xfbc   :  { %3338 = vmatmul.msk.f32.gmra.mxu2 %vm408_vm3, %v1262_v32 }
 0xfc4   :  { %3339 = vmatmul.msk.f32.gmra.mxu2 %vm408_vm3, %v1263_v24 }
 0xfcc   :  { %3340 = vmatmul.msk.f32.gmra.mxu2 %vm408_vm3, %v1264_v39 }
 0xfd4   :  { %3341 = vmatmul.msk.f32.gmra.mxu2 %vm408_vm3, %v1265_v40 }
 0xfdc   :  { %3342 = vmatmul.msk.f32.gmra.mxu2 %vm408_vm3, %v1266_v41  ;;  %v4686_v41 = vld [vmem:[%s4234_s19 + $0x1] ss:$0 sm:$0xff] }
 0xfe4   :  { %3343 = vmatmul.msk.f32.gmra.mxu2 %vm408_vm3, %v1267_v42  ;;  %vm1770_vm3 = vcmp.gt.s32.totalorder %v4609_v13, 0 }
 0xfe5   :  { %v1771_v16 = vsel %vm1770_vm3, 1, %v5114_v14  ;;  %vm2560_vm3 = vcmp.gt.s32.totalorder %v4609_v13, 5 }
 0xfe6   :  { %1773 = vperm.xlu1 %3506, %v1771_v16  }
 0xfee   :  { %2405 = vperm.xlu1 %3506, %v2403_v20  }
 0xff6   :  { %2721 = vperm.xlu1 %3506, %v2719_v22  }
 0xffe   :  { %3037 = vperm.xlu1 %3506, %v3035_v29  }
0x101f   :  { %v1315_v56 = vpop.f32.mrf.mxu2 }
0x1020   :  { %3344 = vmatmul.msk.f32.vlgmr.msra.gmra.mxu3 %vm301_vm0, %v1315_v56  ;;  %3355 = vmatmul.msk.f32.vlgmr.msra.gmra.mxu0 %vm301_vm0, %v1315_v56 }
0x1021   :  { %3366 = vmatmul.msk.f32.vlgmr.msra.gmra.mxu1 %vm301_vm0, %v1315_v56  ;;  %3377 = vmatmul.msk.f32.vlgmr.msrb.gmra.mxu2 %vm301_vm0, %v1315_v56 }
0x1022   :  { %2919 = vmatpush.msrb.mxu2 %v4521_v54  ;;  %1670 = vmatpush.msra.mxu3 %v4578_v4 }
0x1023   :  { %1695 = vmatpush.msra.mxu0 %v4580_v5  ;;  %1853 = vmatpush.msra.mxu1 %v4580_v5 }
0x1024   :  { %2920 = vmatpush.msrb.mxu2 %v4531_v57  ;;  %1671 = vmatpush.msra.mxu3 %v4584_v6 }
0x1025   :  { %1696 = vmatpush.msra.mxu0 %v4586_v7  ;;  %1854 = vmatpush.msra.mxu1 %v4586_v7 }
0x1026   :  { %2921 = vmatpush.msrb.mxu2 %v4549_v62  ;;  %1672 = vmatpush.msra.mxu3 %v4590_v10 }
0x1027   :  { %v1318_v58 = vpop.f32.mrf.mxu2  ;;  %1697 = vmatpush.msra.mxu0 %v4592_v8  ;;  %1855 = vmatpush.msra.mxu1 %v4592_v8 }
0x1028   :  { %3345 = vmatmul.msk.f32.gmra.mxu3 %vm301_vm0, %v1318_v58  ;;  %3356 = vmatmul.msk.f32.gmra.mxu0 %vm301_vm0, %v1318_v58 }
0x1029   :  { %3367 = vmatmul.msk.f32.gmra.mxu1 %vm301_vm0, %v1318_v58  ;;  %3378 = vmatmul.msk.f32.gmra.mxu2 %vm301_vm0, %v1318_v58 }
0x102a   :  { %2922 = vmatpush.msrb.mxu2 %v4567_v2  ;;  %1673 = vmatpush.msra.mxu3 %v4601_v11 }
0x102b   :  { %1698 = vmatpush.msra.mxu0 %v4603_v12  ;;  %1856 = vmatpush.msra.mxu1 %v4603_v12 }
0x102f   :  { %v1321_v59 = vpop.f32.mrf.mxu2 }
0x1030   :  { %3346 = vmatmul.msk.f32.gmra.mxu3 %vm301_vm0, %v1321_v59  ;;  %3357 = vmatmul.msk.f32.gmra.mxu0 %vm301_vm0, %v1321_v59 }
0x1031   :  { %3368 = vmatmul.msk.f32.gmra.mxu1 %vm301_vm0, %v1321_v59  ;;  %3379 = vmatmul.msk.f32.gmra.mxu2 %vm301_vm0, %v1321_v59 }
0x1037   :  { %v1324_v61 = vpop.f32.mrf.mxu2 }
0x1038   :  { %3347 = vmatmul.msk.f32.gmra.mxu3 %vm301_vm0, %v1324_v61  ;;  %3358 = vmatmul.msk.f32.gmra.mxu0 %vm301_vm0, %v1324_v61 }
0x1039   :  { %3369 = vmatmul.msk.f32.gmra.mxu1 %vm301_vm0, %v1324_v61  ;;  %3380 = vmatmul.msk.f32.gmra.mxu2 %vm301_vm0, %v1324_v61 }
0x103f   :  { %v1327_v63 = vpop.f32.mrf.mxu2 }
0x1040   :  { %3348 = vmatmul.msk.f32.gmra.mxu3 %vm301_vm0, %v1327_v63  ;;  %3359 = vmatmul.msk.f32.gmra.mxu0 %vm301_vm0, %v1327_v63 }
0x1041   :  { %3370 = vmatmul.msk.f32.gmra.mxu1 %vm301_vm0, %v1327_v63  ;;  %3381 = vmatmul.msk.f32.gmra.mxu2 %vm301_vm0, %v1327_v63 }
0x1047   :  { %v1330_v1 = vpop.f32.mrf.mxu2 }
0x1048   :  { %3349 = vmatmul.msk.f32.gmra.mxu3 %vm301_vm0, %v1330_v1  ;;  %3360 = vmatmul.msk.f32.gmra.mxu0 %vm301_vm0, %v1330_v1 }
0x1049   :  { %3371 = vmatmul.msk.f32.gmra.mxu1 %vm301_vm0, %v1330_v1  ;;  %3382 = vmatmul.msk.f32.gmra.mxu2 %vm301_vm0, %v1330_v1 }
0x104f   :  { %v1333_v3 = vpop.f32.mrf.mxu2 }
0x1050   :  { %3350 = vmatmul.msk.f32.gmra.mxu3 %vm301_vm0, %v1333_v3  ;;  %3361 = vmatmul.msk.f32.gmra.mxu0 %vm301_vm0, %v1333_v3 }
0x1051   :  { %3372 = vmatmul.msk.f32.gmra.mxu1 %vm301_vm0, %v1333_v3  ;;  %3383 = vmatmul.msk.f32.gmra.mxu2 %vm301_vm0, %v1333_v3 }
0x1057   :  { %v1336_v9 = vpop.f32.mrf.mxu2 }
0x1058   :  { %3351 = vmatmul.msk.f32.gmra.mxu3 %vm301_vm0, %v1336_v9  ;;  %3362 = vmatmul.msk.f32.gmra.mxu0 %vm301_vm0, %v1336_v9 }
0x1059   :  { %3373 = vmatmul.msk.f32.gmra.mxu1 %vm301_vm0, %v1336_v9  ;;  %3384 = vmatmul.msk.f32.gmra.mxu2 %vm301_vm0, %v1336_v9 }
0x105f   :  { %v1339_v17 = vpop.f32.mrf.mxu2 }
0x1060   :  { %3352 = vmatmul.msk.f32.gmra.mxu3 %vm301_vm0, %v1339_v17  ;;  %3363 = vmatmul.msk.f32.gmra.mxu0 %vm301_vm0, %v1339_v17 }
0x1061   :  { %3374 = vmatmul.msk.f32.gmra.mxu1 %vm301_vm0, %v1339_v17  ;;  %3385 = vmatmul.msk.f32.gmra.mxu2 %vm301_vm0, %v1339_v17 }
0x1067   :  { %v1342_v18 = vpop.f32.mrf.mxu2 }
0x1068   :  { %3353 = vmatmul.msk.f32.gmra.mxu3 %vm301_vm0, %v1342_v18  ;;  %3364 = vmatmul.msk.f32.gmra.mxu0 %vm301_vm0, %v1342_v18 }
0x1069   :  { %3375 = vmatmul.msk.f32.gmra.mxu1 %vm301_vm0, %v1342_v18  ;;  %3386 = vmatmul.msk.f32.gmra.mxu2 %vm301_vm0, %v1342_v18 }
0x1070   :  { %1624 = vmatmul.f32.vlgmr.msrb.gmra.mxu3 %v4054_v19  ;;  %1649 = vmatmul.f32.vlgmr.msrb.gmra.mxu0 %v4054_v19 }
0x1071   :  { %1813 = vmatpush.msrb.mxu3 %v4521_v54  ;;  %1833 = vmatpush.msrb.mxu0 %v4578_v4 }
0x1073   :  { %1814 = vmatpush.msrb.mxu3 %v4531_v57  ;;  %1834 = vmatpush.msrb.mxu0 %v4584_v6 }
0x1075   :  { %1815 = vmatpush.msrb.mxu3 %v4549_v62  ;;  %1835 = vmatpush.msrb.mxu0 %v4590_v10 }
0x1077   :  { %1816 = vmatpush.msrb.mxu3 %v4567_v2  ;;  %1836 = vmatpush.msrb.mxu0 %v4601_v11 }
0x1078   :  { %1674 = vmatmul.f32.vlgmr.msra.gmra.mxu3 %v4054_v19  ;;  %1699 = vmatmul.f32.vlgmr.msra.gmra.mxu0 %v4054_v19  ;;  %v4700_v19 = vld [vmem:[%s4234_s19 + $0x2] ss:$0 sm:$0xff] }
0x1079   :  { %1951 = vmatpush.msra.mxu3 %v4517_v53  ;;  %1971 = vmatpush.msra.mxu0 %v4521_v54 }
0x107b   :  { %1952 = vmatpush.msra.mxu3 %v4525_v55  ;;  %1972 = vmatpush.msra.mxu0 %v4531_v57 }
0x107d   :  { %1953 = vmatpush.msra.mxu3 %v4543_v60  ;;  %1973 = vmatpush.msra.mxu0 %v4549_v62 }
0x107f   :  { %1954 = vmatpush.msra.mxu3 %v4559_v0  ;;  %1974 = vmatpush.msra.mxu0 %v4567_v2 }
0x109d   :  { %v1457_v21 = vpop.f32.mrf.mxu0 }
0x109e   :  { %v1458_v43 = vadd.f32 %v4686_v41, %v1457_v21  ;;  %v1514_v22 = vpop.f32.mrf.mxu1 }
0x10a3   :  { %v1400_v23 = vpop.f32.mrf.mxu3 }
0x10a4   :  { %v1571_v49 = vpop.f32.mrf.mxu2  ;;  %v1401_v50 = vadd.f32 %v4692_v45, %v1400_v23 }
0x10a5   :  { %v4651_v25 = vpop.f32.mrf.mxu0  ;;  %v1572_v52 = vadd.f32 %v4695_v47, %v1571_v49 }
0x10ab   :  { %v4653_v26 = vpop.f32.mrf.mxu3 }
0x10ad   :  { %v4655_v27 = vpop.f32.mrf.mxu0 }
0x10b3   :  { %v4657_v28 = vpop.f32.mrf.mxu3 }
0x10b5   :  { %v4659_v30 = vpop.f32.mrf.mxu0 }
0x10bb   :  { %v4661_v31 = vpop.f32.mrf.mxu3 }
0x10bd   :  { %v4663_v15 = vpop.f32.mrf.mxu0 }
0x10c3   :  { %v4665_v32 = vpop.f32.mrf.mxu3 }
0x10c5   :  { %v4667_v24 = vpop.f32.mrf.mxu0 }
0x10cb   :  { %v4669_v33 = vpop.f32.mrf.mxu3 }
0x10cd   :  { %v4671_v34 = vpop.f32.mrf.mxu0 }
0x10d3   :  { %v4673_v35 = vpop.f32.mrf.mxu3 }
0x10d5   :  { %v4675_v36 = vpop.f32.mrf.mxu0 }
0x10db   :  { %v4677_v37 = vpop.f32.mrf.mxu3 }
0x10dd   :  { %v4679_v38 = vpop.f32.mrf.mxu0 }
0x10de   :  { %5156 = vst [vmem:[#allocation43_spill] sm:$0xff] %v4679_v38 }
0x10e3   :  { %v4681_v39 = vpop.f32.mrf.mxu3 }
0x10e4   :  { %5157 = vst [vmem:[#allocation44_spill] sm:$0xff] %v4681_v39 }
0x10e5   :  { %v4683_v40 = vpop.f32.mrf.mxu0 }
0x10e6   :  { %5158 = vst [vmem:[#allocation45_spill] sm:$0xff] %v4683_v40 }
0x10eb   :  { %v4688_v42 = vpop.f32.mrf.mxu3 }
0x10ec   :  { %5159 = vst [vmem:[#allocation46_spill] sm:$0xff] %v4688_v42 }
0x10ed   :  { %v1650_v44 = vpop.f32.mrf.mxu0 }
0x10ee   :  { %v1723_v46 = vadd.f32 %v1650_v44, %v1458_v43  ;;  %v1515_v43 = vadd.f32 %v4700_v19, %v1514_v22 }
0x10f0   :  { %v3388_v48 = vmul.f32 -1.442695, %v1723_v46 }
0x10f2   :  { %3596 = vpow2.f32 %v3388_v48 }
0x10f3   :  { %v1625_v51 = vpop.f32.mrf.mxu3 }
0x10f4   :  { %v1703_v56 = vadd.f32 %v1625_v51, %v1401_v50 }
0x10f5   :  { %v1700_v58 = vpop.f32.mrf.mxu0 }
0x10f6   :  { %v3387_v59 = vmul.f32 -1.442695, %v1703_v56  ;;  %v1745_v61 = vadd.f32 %v1700_v58, %v1572_v52  ;;  %v1929_v56 = vsel %vm1928_vm11, 1, %v5114_v14  ;;  %vm2876_vm11 = vcmp.gt.s32.totalorder %v4609_v13, 7 }
0x10f7   :  { %1931 = vperm.xlu2 %3507, %v1929_v56  }
0x10f8   :  { %v3597_v63 = vpop.eup %3596  ;;  %3598 = vpow2.f32 %v3387_v59  ;;  %v3389_v1 = vmul.f32 -1.442695, %v1745_v61 }
0x10f9   :  { %v1727_v3 = vadd.f32 1.0, %v3597_v63 }
0x10fa   :  { %3600 = vpow2.f32 %v3389_v1 }
0x10fb   :  { %3602 = vrcp.f32 %v1727_v3  ;;  %v1675_v23 = vpop.f32.mrf.mxu3  ;;  %v1739_v52 = vand.u32 2147483648, %v1727_v3  ;;  %vm1733_vm12 = vweird.f32 %v1727_v3  ;;  %v1737_v59 = vand.u32 2147483647, %v1727_v3 }
0x10fc   :  { %v1743_v48 = vadd.f32 %v1675_v23, %v1515_v43  ;;  %v2245_v43 = vsel %vm2244_vm13, 1, %v5114_v14 }
0x10fd   :  { %v1740_v22 = vor.u32 1.1754944e-38, %v1739_v52  ;;  %vm1738_vm15 = vcmp.eq.f32.partialorder %v1737_v59, 8.507059e+37 }
0x10fe   :  { %v3599_v9 = vpop.eup %3598 }
0x10ff   :  { %v1707_v16 = vadd.f32 1.0, %v3599_v9  ;;  %2247 = vperm.xlu2 %3507, %v2245_v43  }
0x1100   :  { %v3601_v17 = vpop.eup %3600 }
0x1101   :  { %v3603_v18 = vpop.eup %3602  ;;  %3604 = vrcp.f32 %v1707_v16  ;;  %v4702_v20 = vadd.f32 1.0, %v3601_v17  ;;  %v1717_v63 = vand.u32 2147483647, %v1707_v16  ;;  %v1719_v1 = vand.u32 2147483648, %v1707_v16 }
0x1102   :  { %v1729_v29 = vmul.f32 %v3603_v18, %v1727_v3  ;;  %vm1734_vm10 = vweird.f32 %v3603_v18  ;;  %vm1713_vm14 = vweird.f32 %v1707_v16 }
0x1103   :  { %3606 = vrcp.f32 %v4702_v20  ;;  %vm1735_vm1 = vmor %vm1733_vm12, %vm1734_vm10  ;;  %v1720_v23 = vor.u32 1.1754944e-38, %v1719_v1  ;;  %vm1718_vm5 = vcmp.eq.f32.partialorder %v1717_v63, 8.507059e+37  ;;  %v1761_v52 = vand.u32 2147483648, %v4702_v20 }
0x1104   :  { %v1730_v21 = vsub.f32 1.0, %v1729_v29  ;;  %3608 = vtanh.f32 %v1743_v48  ;;  %vm1755_vm8 = vweird.f32 %v4702_v20 }
0x1105   :  { %v1762_v1 = vor.u32 1.1754944e-38, %v1761_v52  ;;  %v1461_v52 = vadd.f32 %v4686_v41, %v4651_v25 }
0x1106   :  { %v1731_v44 = vmul.f32 %v3603_v18, %v1730_v21 }
0x1107   :  { %v3605_v46 = vpop.eup %3604 }
0x1108   :  { %v1709_v49 = vmul.f32 %v3605_v46, %v1707_v16  ;;  %v1732_v50 = vadd.f32 %v3603_v18, %v1731_v44  ;;  %vm1714_vm4 = vweird.f32 %v3605_v46 }
0x1109   :  { %v3607_v51 = vpop.eup %3606  ;;  %vm1715_vm2 = vmor %vm1713_vm14, %vm1714_vm4  ;;  %vm2086_vm4 = vcmp.gt.s32.totalorder %v4609_v13, 2 }
0x110a   :  { %v1710_v58 = vsub.f32 1.0, %v1709_v49  ;;  %v1751_v61 = vmul.f32 %v3607_v51, %v4702_v20  ;;  %v1736_v17 = vsel %vm1735_vm1, %v3603_v18, %v1732_v50  ;;  %v3609_v48 = vpop.eup %3608  ;;  %v1774_v18 = vpop.permute.xlu1 %1773  ;;  %vm1756_vm7 = vweird.f32 %v3607_v51 }
0x110b   :  { %v1741_v3 = vsel %vm1738_vm15, %v1740_v22, %v1736_v17  ;;  %vm1775_vm6 = vcmp.eq.s32.totalorder %v1774_v18, 1  ;;  %vm1757_vm9 = vmor %vm1755_vm8, %vm1756_vm7 }
0x110c   :  { %v1711_v9 = vmul.f32 %v3605_v46, %v1710_v58  ;;  %v1752_v29 = vsub.f32 1.0, %v1751_v61  ;;  %v1765_v58 = vmul.f32 0.0, %v1741_v3  ;;  %v2561_v61 = vsel %vm2560_vm3, 1, %v5114_v14 }
0x110d   :  { %2563 = vperm.xlu2 %3507, %v2561_v61  }
0x110e   :  { %v1712_v21 = vadd.f32 %v3605_v46, %v1711_v9  ;;  %v1753_v56 = vmul.f32 %v3607_v51, %v1752_v29  ;;  %v2877_v29 = vsel %vm2876_vm11, 1, %v5114_v14 }
0x1110   :  { %v1716_v44 = vsel %vm1715_vm2, %v3605_v46, %v1712_v21  ;;  %v1754_v16 = vadd.f32 %v3607_v51, %v1753_v56  ;;  %v1759_v46 = vand.u32 2147483647, %v4702_v20  ;;  %v1517_v20 = vpop.f32.mrf.mxu1  ;;  %v1404_v56 = vadd.f32 %v4692_v45, %v4653_v26 }
0x1111   :  { %v1721_v49 = vsel %vm1718_vm5, %v1720_v23, %v1716_v44  ;;  %vm3192_vm2 = vcmp.gt.s32.totalorder %v4609_v13, 9 }
0x1112   :  { %v1766_v40 = vmul.f32 %v3609_v48, %v1721_v49  ;;  %v1758_v63 = vsel %vm1757_vm9, %v3607_v51, %v1754_v16  ;;  %vm1760_vm10 = vcmp.eq.f32.partialorder %v1759_v46, 8.507059e+37  ;;  %v1574_v16 = vpop.f32.mrf.mxu2 }
0x1113   :  { %v1763_v9 = vsel %vm1760_vm10, %v1762_v1, %v1758_v63  ;;  %v1575_v61 = vadd.f32 %v4695_v47, %v1574_v16 }
0x1114   :  { %v1767_v50 = vadd.f32 %v1766_v40, %v1765_v58 }
0x1115   :  { %2879 = vperm.xlu2 %3507, %v2877_v29  }
0x1116   :  { %3610 = vtanh.f32 %v1767_v50  ;;  %v4714_v59 = vsel %vm1775_vm6, %v1767_v50, 0.0 }
0x1118   :  { %v4748_v51 = vpop.f32.mrf.mxu1 }
0x111c   :  { %v3611_v40 = vpop.eup %3610 }
0x111d   :  { %v1769_v17 = vmul.f32 %v3611_v40, %v1763_v9 }
0x111f   :  { %v4721_v22 = vsel %vm1775_vm6, %v1769_v17, 0.0 }
0x1120   :  { %3390 = vmatmul.msk.f32.vlgmr.msrb.gmra.mxu1 %vm301_vm0, %v4721_v22  ;;  %3391 = vmatmul.msk.f32.vlgmr.msrb.gmra.mxu3 %vm301_vm0, %v4721_v22  ;;  %v4750_v21 = vpop.f32.mrf.mxu1 }
0x1121   :  { %3392 = vmatmul.msk.f32.vlgmr.msrb.gmra.mxu0 %vm301_vm0, %v4721_v22  ;;  %1991 = vmatpush.msrb.mxu1 %v4578_v4 }
0x1122   :  { %2011 = vmatpush.msrb.mxu3 %v4580_v5  ;;  %2109 = vmatpush.msrb.mxu0 %v4517_v53 }
0x1123   :  { %1992 = vmatpush.msrb.mxu1 %v4584_v6 }
0x1124   :  { %2012 = vmatpush.msrb.mxu3 %v4586_v7  ;;  %2110 = vmatpush.msrb.mxu0 %v4525_v55 }
0x1125   :  { %1993 = vmatpush.msrb.mxu1 %v4590_v10 }
0x1126   :  { %2013 = vmatpush.msrb.mxu3 %v4592_v8  ;;  %2111 = vmatpush.msrb.mxu0 %v4543_v60 }
0x1127   :  { %1994 = vmatpush.msrb.mxu1 %v4601_v11 }
0x1128   :  { %3393 = vmatmul.msk.f32.vlgmr.msra.gmra.mxu1 %vm301_vm0, %v4721_v22  ;;  %2014 = vmatpush.msrb.mxu3 %v4603_v12  ;;  %v4752_v23 = vpop.f32.mrf.mxu1 }
0x1129   :  { %2129 = vmatpush.msra.mxu1 %v4521_v54  ;;  %2112 = vmatpush.msrb.mxu0 %v4559_v0 }
0x112b   :  { %2130 = vmatpush.msra.mxu1 %v4531_v57 }
0x112d   :  { %2131 = vmatpush.msra.mxu1 %v4549_v62 }
0x112f   :  { %2132 = vmatpush.msra.mxu1 %v4567_v2 }
0x1130   :  { %v4754_v3 = vpop.f32.mrf.mxu1 }
0x1138   :  { %v4756_v43 = vpop.f32.mrf.mxu1 }
0x1140   :  { %v4758_v44 = vpop.f32.mrf.mxu1 }
0x1148   :  { %v4760_v48 = vpop.f32.mrf.mxu1 }
0x1149   :  { %5160 = vst [vmem:[#allocation47_spill] sm:$0xff] %v4760_v48 }
0x1150   :  { %v4762_v49 = vpop.f32.mrf.mxu1 }
0x1151   :  { %5161 = vst [vmem:[#allocation48_spill] sm:$0xff] %v4762_v49 }
0x119d   :  { %v1798_v58 = vpop.f32.mrf.mxu1 }
0x119e   :  { %v1861_v18 = vadd.f32 %v1798_v58, %v1404_v56  ;;  %v1838_v56 = vpop.f32.mrf.mxu0  ;;  %v1518_v58 = vadd.f32 %v4700_v19, %v1517_v20 }
0x11a0   :  { %v3394_v50 = vmul.f32 -1.442695, %v1861_v18  ;;  %v1901_v49 = vadd.f32 %v1838_v56, %v1518_v58 }
0x11a2   :  { %3612 = vpow2.f32 %v3394_v50 }
0x11a3   :  { %v1818_v46 = vpop.f32.mrf.mxu3 }
0x11a4   :  { %v1881_v63 = vadd.f32 %v1818_v46, %v1461_v52 }
0x11a5   :  { %v1858_v1 = vpop.f32.mrf.mxu1 }
0x11a6   :  { %v3395_v40 = vmul.f32 -1.442695, %v1881_v63  ;;  %v1903_v9 = vadd.f32 %v1858_v1, %v1575_v61 }
0x11a8   :  { %v3613_v17 = vpop.eup %3612  ;;  %3614 = vpow2.f32 %v3395_v40  ;;  %v3396_v29 = vmul.f32 -1.442695, %v1903_v9 }
0x11a9   :  { %v1865_v14 = vadd.f32 1.0, %v3613_v17 }
0x11aa   :  { %3616 = vpow2.f32 %v3396_v29 }
0x11ab   :  { %3618 = vrcp.f32 %v1865_v14  ;;  %v1877_v61 = vand.u32 2147483648, %v1865_v14  ;;  %v1875_v1 = vand.u32 2147483647, %v1865_v14  ;;  %vm1871_vm1 = vweird.f32 %v1865_v14 }
0x11ad   :  { %v1878_v29 = vor.u32 1.1754944e-38, %v1877_v61  ;;  %vm1876_vm14 = vcmp.eq.f32.partialorder %v1875_v1, 8.507059e+37 }
0x11ae   :  { %v3615_v26 = vpop.eup %3614 }
0x11af   :  { %v1885_v18 = vadd.f32 1.0, %v3615_v26  ;;  %v5162_v26 = vmov 0  }
0x11b0   :  { %v3617_v25 = vpop.eup %3616  ;;  %v2087_v56 = vsel %vm2086_vm4, 1, %v5162_v26 }
0x11b1   :  { %v3619_v50 = vpop.eup %3618  ;;  %3620 = vrcp.f32 %v1885_v18  ;;  %v1907_v16 = vadd.f32 1.0, %v3617_v25  ;;  %2089 = vperm.xlu0 %3508, %v2087_v56   ;;  %v1895_v42 = vand.u32 2147483647, %v1885_v18  ;;  %v1897_v48 = vand.u32 2147483648, %v1885_v18  ;;  %v1932_v56 = vpop.permute.xlu2 %1931 }
0x11b2   :  { %v1867_v52 = vmul.f32 %v3619_v50, %v1865_v14  ;;  %vm1872_vm12 = vweird.f32 %v3619_v50  ;;  %vm1891_vm5 = vweird.f32 %v1885_v18  ;;  %vm1933_vm7 = vcmp.eq.s32.totalorder %v1932_v56, 1 }
0x11b3   :  { %3622 = vrcp.f32 %v1907_v16  ;;  %vm1873_vm13 = vmor %vm1871_vm1, %vm1872_vm12  ;;  %v1898_v61 = vor.u32 1.1754944e-38, %v1897_v48  ;;  %vm1896_vm3 = vcmp.eq.f32.partialorder %v1895_v42, 8.507059e+37  ;;  %v1919_v13 = vand.u32 2147483648, %v1907_v16 }
0x11b4   :  { %v1868_v46 = vsub.f32 1.0, %v1867_v52  ;;  %3624 = vtanh.f32 %v1901_v49  ;;  %vm1913_vm9 = vweird.f32 %v1907_v16  ;;  %v1917_v48 = vand.u32 2147483647, %v1907_v16 }
0x11b5   :  { %v1920_v42 = vor.u32 1.1754944e-38, %v1919_v13 }
0x11b6   :  { %v1869_v63 = vmul.f32 %v3619_v50, %v1868_v46  ;;  %vm1918_vm11 = vcmp.eq.f32.partialorder %v1917_v48, 8.507059e+37 }
0x11b7   :  { %v3621_v40 = vpop.eup %3620 }
0x11b8   :  { %v1870_v9 = vadd.f32 %v3619_v50, %v1869_v63  ;;  %v1887_v17 = vmul.f32 %v3621_v40, %v1885_v18  ;;  %vm1892_vm15 = vweird.f32 %v3621_v40 }
0x11b9   :  { %v3623_v20 = vpop.eup %3622  ;;  %vm1893_vm6 = vmor %vm1891_vm5, %vm1892_vm15 }
0x11ba   :  { %v1874_v58 = vsel %vm1873_vm13, %v3619_v50, %v1870_v9  ;;  %v1888_v25 = vsub.f32 1.0, %v1887_v17  ;;  %v1909_v52 = vmul.f32 %v3623_v20, %v1907_v16  ;;  %v3625_v49 = vpop.eup %3624  ;;  %v3193_v50 = vsel %vm3192_vm2, 1, %v5162_v26 }
0x11bb   :  { %v1879_v46 = vsel %vm1876_vm14, %v1878_v29, %v1874_v58  ;;  %3195 = vperm.xlu0 %3508, %v3193_v50   ;;  %vm1914_vm8 = vweird.f32 %v3623_v20 }
0x11bc   :  { %v1924_v38 = vmul.f32 %v3625_v49, %v1879_v46  ;;  %v1889_v63 = vmul.f32 %v3621_v40, %v1888_v25  ;;  %v1910_v14 = vsub.f32 1.0, %v1909_v52  ;;  %vm1915_vm10 = vmor %vm1913_vm9, %vm1914_vm8  ;;  %v1407_v49 = vadd.f32 %v4692_v45, %v4657_v28 }
0x11be   :  { %v1890_v39 = vadd.f32 %v3621_v40, %v1889_v63  ;;  %v1911_v17 = vmul.f32 %v3623_v20, %v1910_v14 }
0x11c0   :  { %v1894_v1 = vsel %vm1893_vm6, %v3621_v40, %v1890_v39  ;;  %v1912_v25 = vadd.f32 %v3623_v20, %v1911_v17 }
0x11c1   :  { %v1899_v9 = vsel %vm1896_vm3, %v1898_v61, %v1894_v1  ;;  %v1577_v61 = vpop.f32.mrf.mxu2 }
0x11c2   :  { %v1923_v29 = vmul.f32 %v1899_v9, %v4714_v59  ;;  %v1916_v39 = vsel %vm1915_vm10, %v3623_v20, %v1912_v25  ;;  %v1578_v9 = vadd.f32 %v4695_v47, %v1577_v61 }
0x11c3   :  { %v1921_v26 = vsel %vm1918_vm11, %v1920_v42, %v1916_v39  ;;  %v1521_v39 = vadd.f32 %v4700_v19, %v4748_v51 }
0x11c4   :  { %v1925_v58 = vadd.f32 %v1924_v38, %v1923_v29 }
0x11c6   :  { %3626 = vtanh.f32 %v1925_v58  ;;  %v4777_v18 = vsel %vm1933_vm7, %v1925_v58, %v4714_v59  ;;  %v1464_v59 = vadd.f32 %v4686_v41, %v4655_v27 }
0x11cc   :  { %v3627_v40 = vpop.eup %3626 }
0x11cd   :  { %v1927_v52 = vmul.f32 %v3627_v40, %v1921_v26 }
0x11cf   :  { %v4781_v38 = vsel %vm1933_vm7, %v1927_v52, %v4721_v22 }
0x11d0   :  { %3397 = vmatmul.msk.f32.vlgmr.msra.gmra.mxu3 %vm301_vm0, %v4781_v38  ;;  %3398 = vmatmul.msk.f32.vlgmr.msra.gmra.mxu0 %vm301_vm0, %v4781_v38 }
0x11d1   :  { %3399 = vmatmul.msk.f32.vlgmr.msrb.gmra.mxu1 %vm301_vm0, %v4781_v38  ;;  %2149 = vmatpush.msra.mxu3 %v4578_v4 }
0x11d2   :  { %2169 = vmatpush.msra.mxu0 %v4580_v5  ;;  %2267 = vmatpush.msrb.mxu1 %v4517_v53 }
0x11d3   :  { %2150 = vmatpush.msra.mxu3 %v4584_v6 }
0x11d4   :  { %2170 = vmatpush.msra.mxu0 %v4586_v7  ;;  %2268 = vmatpush.msrb.mxu1 %v4525_v55 }
0x11d5   :  { %2151 = vmatpush.msra.mxu3 %v4590_v10 }
0x11d6   :  { %2171 = vmatpush.msra.mxu0 %v4592_v8  ;;  %2269 = vmatpush.msrb.mxu1 %v4543_v60 }
0x11d7   :  { %2152 = vmatpush.msra.mxu3 %v4601_v11 }
0x11d8   :  { %3400 = vmatmul.msk.f32.vlgmr.msrb.gmra.mxu3 %vm301_vm0, %v4781_v38  ;;  %2172 = vmatpush.msra.mxu0 %v4603_v12 }
0x11d9   :  { %2287 = vmatpush.msrb.mxu3 %v4521_v54  ;;  %2270 = vmatpush.msrb.mxu1 %v4559_v0 }
0x11db   :  { %2288 = vmatpush.msrb.mxu3 %v4531_v57 }
0x11dd   :  { %2289 = vmatpush.msrb.mxu3 %v4549_v62 }
0x11df   :  { %2290 = vmatpush.msrb.mxu3 %v4567_v2 }
0x124d   :  { %v1976_v22 = vpop.f32.mrf.mxu0 }
0x124e   :  { %v2039_v16 = vadd.f32 %v1976_v22, %v1464_v59  ;;  %v1996_v48 = vpop.f32.mrf.mxu1 }
0x124f   :  { %v2059_v22 = vadd.f32 %v1996_v48, %v1521_v39 }
0x1250   :  { %v3402_v20 = vmul.f32 -1.442695, %v2039_v16 }
0x1252   :  { %3628 = vpow2.f32 %v3402_v20 }
0x1253   :  { %v1956_v46 = vpop.f32.mrf.mxu3 }
0x1254   :  { %v2019_v63 = vadd.f32 %v1956_v46, %v1407_v49 }
0x1256   :  { %v3401_v14 = vmul.f32 -1.442695, %v2019_v63 }
0x1258   :  { %v3629_v50 = vpop.eup %3628  ;;  %3630 = vpow2.f32 %v3401_v14 }
0x1259   :  { %v2043_v1 = vadd.f32 1.0, %v3629_v50 }
0x125b   :  { %3632 = vrcp.f32 %v2043_v1  ;;  %v2016_v17 = vpop.f32.mrf.mxu3  ;;  %v2055_v42 = vand.u32 2147483648, %v2043_v1  ;;  %v2053_v52 = vand.u32 2147483647, %v2043_v1  ;;  %vm2049_vm1 = vweird.f32 %v2043_v1 }
0x125c   :  { %v2061_v56 = vadd.f32 %v2016_v17, %v1578_v9 }
0x125d   :  { %v2056_v46 = vor.u32 1.1754944e-38, %v2055_v42  ;;  %vm2054_vm13 = vcmp.eq.f32.partialorder %v2053_v52, 8.507059e+37 }
0x125e   :  { %v3631_v27 = vpop.eup %3630  ;;  %v3403_v29 = vmul.f32 -1.442695, %v2061_v56 }
0x125f   :  { %v2023_v58 = vadd.f32 1.0, %v3631_v27 }
0x1260   :  { %3634 = vpow2.f32 %v3403_v29 }
0x1261   :  { %v3633_v25 = vpop.eup %3632  ;;  %3636 = vrcp.f32 %v2023_v58  ;;  %v2035_v61 = vand.u32 2147483648, %v2023_v58  ;;  %v2033_v9 = vand.u32 2147483647, %v2023_v58  ;;  %vm2029_vm15 = vweird.f32 %v2023_v58 }
0x1262   :  { %v2045_v28 = vmul.f32 %v3633_v25, %v2043_v1  ;;  %vm2050_vm12 = vweird.f32 %v3633_v25 }
0x1263   :  { %vm2051_vm4 = vmor %vm2049_vm1, %vm2050_vm12  ;;  %v2036_v29 = vor.u32 1.1754944e-38, %v2035_v61  ;;  %vm2034_vm5 = vcmp.eq.f32.partialorder %v2033_v9, 8.507059e+37 }
0x1264   :  { %v2046_v13 = vsub.f32 1.0, %v2045_v28  ;;  %v2090_v28 = vpop.permute.xlu0 %2089 }
0x1265   :  { %vm2091_vm6 = vcmp.eq.s32.totalorder %v2090_v28, 1 }
0x1266   :  { %v3635_v40 = vpop.eup %3634  ;;  %v2047_v26 = vmul.f32 %v3633_v25, %v2046_v13 }
0x1267   :  { %v3637_v59 = vpop.eup %3636  ;;  %v2065_v16 = vadd.f32 1.0, %v3635_v40 }
0x1268   :  { %v2025_v20 = vmul.f32 %v3637_v59, %v2023_v58  ;;  %v2048_v49 = vadd.f32 %v3633_v25, %v2047_v26  ;;  %vm2030_vm14 = vweird.f32 %v3637_v59 }
0x1269   :  { %3638 = vrcp.f32 %v2065_v16  ;;  %vm2031_vm2 = vmor %vm2029_vm15, %vm2030_vm14  ;;  %vm2071_vm7 = vweird.f32 %v2065_v16 }
0x126a   :  { %v2026_v63 = vsub.f32 1.0, %v2025_v20  ;;  %v2052_v14 = vsel %vm2051_vm4, %v3633_v25, %v2048_v49  ;;  %3640 = vtanh.f32 %v2059_v22  ;;  %v2077_v22 = vand.u32 2147483648, %v2065_v16 }
0x126b   :  { %v2057_v51 = vsel %vm2054_vm13, %v2056_v46, %v2052_v14  ;;  %v2075_v20 = vand.u32 2147483647, %v2065_v16 }
0x126c   :  { %v2027_v50 = vmul.f32 %v3637_v59, %v2026_v63  ;;  %v2081_v17 = vmul.f32 %v2057_v51, %v4777_v18  ;;  %v2078_v49 = vor.u32 1.1754944e-38, %v2077_v22 }
0x126d   :  { %vm2076_vm9 = vcmp.eq.f32.partialorder %v2075_v20, 8.507059e+37 }
0x126e   :  { %v2028_v56 = vadd.f32 %v3637_v59, %v2027_v50 }
0x126f   :  { %v3639_v27 = vpop.eup %3638 }
0x1270   :  { %v2067_v1 = vmul.f32 %v3639_v27, %v2065_v16  ;;  %v2032_v13 = vsel %vm2031_vm2, %v3637_v59, %v2028_v56  ;;  %v3641_v48 = vpop.eup %3640  ;;  %vm2072_vm3 = vweird.f32 %v3639_v27  ;;  %v1524_v16 = vadd.f32 %v4700_v19, %v4750_v21 }
0x1271   :  { %v2037_v25 = vsel %vm2034_vm5, %v2036_v29, %v2032_v13  ;;  %vm2073_vm8 = vmor %vm2071_vm7, %vm2072_vm3 }
0x1272   :  { %v2068_v39 = vsub.f32 1.0, %v2067_v1  ;;  %v2082_v42 = vmul.f32 %v3641_v48, %v2037_v25 }
0x1274   :  { %v2069_v40 = vmul.f32 %v3639_v27, %v2068_v39  ;;  %v2083_v26 = vadd.f32 %v2082_v42, %v2081_v17 }
0x1276   :  { %v2070_v52 = vadd.f32 %v3639_v27, %v2069_v40  ;;  %3642 = vtanh.f32 %v2083_v26  ;;  %v4817_v58 = vsel %vm2091_vm6, %v2083_v26, %v4777_v18 }
0x1278   :  { %v2074_v59 = vsel %vm2073_vm8, %v3639_v27, %v2070_v52 }
0x1279   :  { %v2079_v63 = vsel %vm2076_vm9, %v2078_v49, %v2074_v59 }
0x127c   :  { %v3643_v46 = vpop.eup %3642 }
0x127d   :  { %v2085_v14 = vmul.f32 %v3643_v46, %v2079_v63 }
0x127f   :  { %v4821_v61 = vsel %vm2091_vm6, %v2085_v14, %v4781_v38 }
0x1280   :  { %3404 = vmatmul.msk.f32.vlgmr.msrb.gmra.mxu0 %vm301_vm0, %v4821_v61  ;;  %3405 = vmatmul.msk.f32.vlgmr.msra.gmra.mxu1 %vm301_vm0, %v4821_v61 }
0x1281   :  { %3406 = vmatmul.msk.f32.vlgmr.msra.gmra.mxu3 %vm301_vm0, %v4821_v61  ;;  %2307 = vmatpush.msrb.mxu0 %v4578_v4 }
0x1282   :  { %2327 = vmatpush.msra.mxu1 %v4580_v5  ;;  %2425 = vmatpush.msra.mxu3 %v4517_v53  ;;  %v1467_v53 = vadd.f32 %v4686_v41, %v4659_v30 }
0x1283   :  { %2308 = vmatpush.msrb.mxu0 %v4584_v6 }
0x1284   :  { %2328 = vmatpush.msra.mxu1 %v4586_v7  ;;  %2426 = vmatpush.msra.mxu3 %v4525_v55  ;;  %v1410_v55 = vadd.f32 %v4692_v45, %v4661_v31 }
0x1285   :  { %2309 = vmatpush.msrb.mxu0 %v4590_v10  ;;  %v1580_v10 = vpop.f32.mrf.mxu2 }
0x1286   :  { %2329 = vmatpush.msra.mxu1 %v4592_v8  ;;  %2427 = vmatpush.msra.mxu3 %v4543_v60 }
0x1287   :  { %2310 = vmatpush.msrb.mxu0 %v4601_v11 }
0x1288   :  { %3407 = vmatmul.msk.f32.vlgmr.msra.gmra.mxu0 %vm301_vm0, %v4821_v61  ;;  %2330 = vmatpush.msra.mxu1 %v4603_v12 }
0x1289   :  { %2445 = vmatpush.msra.mxu0 %v4521_v54  ;;  %2428 = vmatpush.msra.mxu3 %v4559_v0 }
0x128b   :  { %2446 = vmatpush.msra.mxu0 %v4531_v57  ;;  %v1581_v57 = vadd.f32 %v4695_v47, %v1580_v10 }
0x128d   :  { %2447 = vmatpush.msra.mxu0 %v4549_v62 }
0x128f   :  { %2448 = vmatpush.msra.mxu0 %v4567_v2 }
0x12fd   :  { %v2114_v60 = vpop.f32.mrf.mxu0  ;;  %v2134_v4 = vpop.f32.mrf.mxu1 }
0x12fe   :  { %v2177_v5 = vadd.f32 %v2114_v60, %v1410_v55  ;;  %v2197_v6 = vadd.f32 %v2134_v4, %v1467_v53 }
0x1300   :  { %v3408_v7 = vmul.f32 -1.442695, %v2177_v5  ;;  %v3409_v54 = vmul.f32 -1.442695, %v2197_v6  ;;  %v2248_v6 = vpop.permute.xlu2 %2247 }
0x1301   :  { %vm2249_vm2 = vcmp.eq.s32.totalorder %v2248_v6, 1 }
0x1302   :  { %3644 = vpow2.f32 %v3408_v7 }
0x1303   :  { %3646 = vpow2.f32 %v3409_v54 }
0x1304   :  { %v2154_v31 = vpop.f32.mrf.mxu3 }
0x1305   :  { %v2174_v62 = vpop.f32.mrf.mxu0  ;;  %v2217_v9 = vadd.f32 %v2154_v31, %v1524_v16  ;;  %v4870_v31 = vld [vmem:[#allocation14 + $0x78] sm:$0xff] }
0x1306   :  { %v2219_v0 = vadd.f32 %v2174_v62, %v1581_v57  ;;  %v4873_v16 = vld [vmem:[#allocation14 + $0x18] sm:$0xff] }
0x1308   :  { %v3645_v2 = vpop.eup %3644  ;;  %v3410_v8 = vmul.f32 -1.442695, %v2219_v0 }
0x1309   :  { %v3647_v18 = vpop.eup %3646  ;;  %v2181_v30 = vadd.f32 1.0, %v3645_v2 }
0x130a   :  { %v2201_v38 = vadd.f32 1.0, %v3647_v18  ;;  %3648 = vpow2.f32 %v3410_v8 }
0x130b   :  { %3650 = vrcp.f32 %v2181_v30  ;;  %v2193_v13 = vand.u32 2147483648, %v2181_v30  ;;  %v2191_v39 = vand.u32 2147483647, %v2181_v30  ;;  %vm2187_vm12 = vweird.f32 %v2181_v30 }
0x130c   :  { %3652 = vrcp.f32 %v2201_v38  ;;  %v2213_v48 = vand.u32 2147483648, %v2201_v38  ;;  %v2211_v40 = vand.u32 2147483647, %v2201_v38  ;;  %vm2207_vm1 = vweird.f32 %v2201_v38 }
0x130d   :  { %v2194_v52 = vor.u32 1.1754944e-38, %v2193_v13  ;;  %vm2192_vm14 = vcmp.eq.f32.partialorder %v2191_v39, 8.507059e+37  ;;  %v1583_v39 = vpop.f32.mrf.mxu2 }
0x130e   :  { %v2214_v20 = vor.u32 1.1754944e-38, %v2213_v48  ;;  %vm2212_vm15 = vcmp.eq.f32.partialorder %v2211_v40, 8.507059e+37 }
0x1310   :  { %v3649_v51 = vpop.eup %3648 }
0x1311   :  { %v3651_v50 = vpop.eup %3650  ;;  %v2223_v17 = vadd.f32 1.0, %v3649_v51  ;;  %v4879_v51 = vld [vmem:[#allocation14 + $0x70] sm:$0xff] }
0x1312   :  { %v3653_v56 = vpop.eup %3652  ;;  %v2183_v27 = vmul.f32 %v3651_v50, %v2181_v30  ;;  %vm2188_vm10 = vweird.f32 %v3651_v50 }
0x1313   :  { %v2203_v29 = vmul.f32 %v3653_v56, %v2201_v38  ;;  %3654 = vrcp.f32 %v2223_v17  ;;  %vm2208_vm11 = vweird.f32 %v3653_v56  ;;  %vm2189_vm4 = vmor %vm2187_vm12, %vm2188_vm10  ;;  %v2235_v57 = vand.u32 2147483648, %v2223_v17 }
0x1314   :  { %v2184_v1 = vsub.f32 1.0, %v2183_v27  ;;  %3656 = vtanh.f32 %v2217_v9  ;;  %vm2209_vm13 = vmor %vm2207_vm1, %vm2208_vm11  ;;  %vm2229_vm6 = vweird.f32 %v2223_v17  ;;  %v2233_v62 = vand.u32 2147483647, %v2223_v17  ;;  %v4885_v9 = vld [vmem:[#allocation14 + $0x48] sm:$0xff]  ;;  %v4898_v27 = vld [vmem:[#allocation14 + $0x38] sm:$0xff] }
0x1315   :  { %v2204_v28 = vsub.f32 1.0, %v2203_v29  ;;  %v2236_v2 = vor.u32 1.1754944e-38, %v2235_v57  ;;  %v4901_v29 = vld [vmem:[#allocation14] sm:$0xff] }
0x1316   :  { %v2185_v25 = vmul.f32 %v3651_v50, %v2184_v1  ;;  %vm2234_vm7 = vcmp.eq.f32.partialorder %v2233_v62, 8.507059e+37  ;;  %v4904_v1 = vld [vmem:[#allocation14 + $0x30] sm:$0xff] }
0x1317   :  { %v2205_v42 = vmul.f32 %v3653_v56, %v2204_v28  ;;  %v4907_v28 = vld [vmem:[#allocation14 + $0x28] sm:$0xff] }
0x1318   :  { %v2186_v21 = vadd.f32 %v3651_v50, %v2185_v25 }
0x1319   :  { %v3655_v26 = vpop.eup %3654  ;;  %v2206_v22 = vadd.f32 %v3653_v56, %v2205_v42  ;;  %v1470_v42 = vadd.f32 %v4686_v41, %v4663_v15 }
0x131a   :  { %v2190_v59 = vsel %vm2189_vm4, %v3651_v50, %v2186_v21  ;;  %v2225_v49 = vmul.f32 %v3655_v26, %v2223_v17  ;;  %v3657_v46 = vpop.eup %3656  ;;  %vm2230_vm5 = vweird.f32 %v3655_v26  ;;  %v4882_v50 = vld [vmem:[#allocation14 + $0x10] sm:$0xff]  ;;  %v4888_v17 = vld [vmem:[#allocation14 + $0x68] sm:$0xff]  ;;  %v1584_v21 = vadd.f32 %v4695_v47, %v1583_v39 }
0x131b   :  { %v2195_v63 = vsel %vm2192_vm14, %v2194_v52, %v2190_v59  ;;  %v2210_v14 = vsel %vm2209_vm13, %v3653_v56, %v2206_v22  ;;  %vm2231_vm3 = vmor %vm2229_vm6, %vm2230_vm5  ;;  %v4891_v56 = vld [vmem:[#allocation14 + $0x8] sm:$0xff] }
0x131c   :  { %v2215_v53 = vsel %vm2212_vm15, %v2214_v20, %v2210_v14  ;;  %v2240_v55 = vmul.f32 %v3657_v46, %v2195_v63  ;;  %v2226_v60 = vsub.f32 1.0, %v2225_v49  ;;  %v1527_v63 = vadd.f32 %v4700_v19, %v4752_v23 }
0x131d   :  { %v2239_v4 = vmul.f32 %v2215_v53, %v4817_v58 }
0x131e   :  { %v2227_v5 = vmul.f32 %v3655_v26, %v2226_v60 }
0x131f   :  { %v2241_v7 = vadd.f32 %v2240_v55, %v2239_v4 }
0x1320   :  { %v2228_v54 = vadd.f32 %v3655_v26, %v2227_v5 }
0x1321   :  { %3658 = vtanh.f32 %v2241_v7  ;;  %v4856_v10 = vsel %vm2249_vm2, %v2241_v7, %v4817_v58  ;;  %v4867_v58 = vld [vmem:[#allocation14 + $0x58] sm:$0xff] }
0x1322   :  { %v2232_v0 = vsel %vm2231_vm3, %v3655_v26, %v2228_v54 }
0x1323   :  { %v2237_v18 = vsel %vm2234_vm7, %v2236_v2, %v2232_v0 }
0x1327   :  { %v3659_v8 = vpop.eup %3658 }
0x1328   :  { %v2243_v30 = vmul.f32 %v3659_v8, %v2237_v18 }
0x132a   :  { %v4859_v38 = vsel %vm2249_vm2, %v2243_v30, %v4821_v61  ;;  %v4876_v61 = vld [vmem:[#allocation14 + $0x50] sm:$0xff] }
0x132b   :  { %3411 = vmatmul.msk.f32.vlgmr.msrb.gmra.mxu1 %vm301_vm0, %v4859_v38  ;;  %3412 = vmatmul.msk.f32.vlgmr.msrb.gmra.mxu3 %vm301_vm0, %v4859_v38 }
0x132c   :  { %3413 = vmatmul.msk.f32.vlgmr.msrb.gmra.mxu0 %vm301_vm0, %v4859_v38  ;;  %2465 = vmatpush.msrb.mxu1 %v4867_v58 }
0x132d   :  { %2485 = vmatpush.msrb.mxu3 %v4870_v31  ;;  %2583 = vmatpush.msrb.mxu0 %v4873_v16 }
0x132e   :  { %2466 = vmatpush.msrb.mxu1 %v4876_v61 }
0x132f   :  { %2486 = vmatpush.msrb.mxu3 %v4879_v51  ;;  %2584 = vmatpush.msrb.mxu0 %v4882_v50 }
0x1330   :  { %2467 = vmatpush.msrb.mxu1 %v4885_v9 }
0x1331   :  { %2487 = vmatpush.msrb.mxu3 %v4888_v17  ;;  %2585 = vmatpush.msrb.mxu0 %v4891_v56 }
0x1332   :  { %2468 = vmatpush.msrb.mxu1 %v4601_v11  ;;  %v4910_v11 = vld [vmem:[#allocation14 + $0x20] sm:$0xff] }
0x1333   :  { %3414 = vmatmul.msk.f32.vlgmr.msra.gmra.mxu1 %vm301_vm0, %v4859_v38  ;;  %2488 = vmatpush.msrb.mxu3 %v4603_v12  ;;  %v1413_v12 = vadd.f32 %v4692_v45, %v4665_v32 }
0x1334   :  { %2603 = vmatpush.msra.mxu1 %v4898_v27  ;;  %2586 = vmatpush.msrb.mxu0 %v4901_v29 }
0x1336   :  { %2604 = vmatpush.msra.mxu1 %v4904_v1 }
0x1338   :  { %2605 = vmatpush.msra.mxu1 %v4907_v28 }
0x133a   :  { %2606 = vmatpush.msra.mxu1 %v4910_v11 }
0x13a8   :  { %v2272_v13 = vpop.f32.mrf.mxu1 }
0x13a9   :  { %v2335_v48 = vadd.f32 %v2272_v13, %v1413_v12  ;;  %v2312_v45 = vpop.f32.mrf.mxu0 }
0x13aa   :  { %v2375_v53 = vadd.f32 %v2312_v45, %v1527_v63 }
0x13ab   :  { %v3415_v25 = vmul.f32 -1.442695, %v2335_v48 }
0x13ad   :  { %3660 = vpow2.f32 %v3415_v25 }
0x13ae   :  { %v2292_v40 = vpop.f32.mrf.mxu3 }
0x13af   :  { %v2355_v26 = vadd.f32 %v2292_v40, %v1470_v42 }
0x13b0   :  { %v2332_v52 = vpop.f32.mrf.mxu1 }
0x13b1   :  { %v3416_v22 = vmul.f32 -1.442695, %v2355_v26  ;;  %v2377_v20 = vadd.f32 %v2332_v52, %v1584_v21 }
0x13b3   :  { %v3661_v59 = vpop.eup %3660  ;;  %3662 = vpow2.f32 %v3416_v22  ;;  %v3417_v49 = vmul.f32 -1.442695, %v2377_v20  ;;  %v2406_v22 = vpop.permute.xlu1 %2405 }
0x13b4   :  { %v2339_v46 = vadd.f32 1.0, %v3661_v59  ;;  %vm2407_vm14 = vcmp.eq.s32.totalorder %v2406_v22, 1 }
0x13b5   :  { %3664 = vpow2.f32 %v3417_v49 }
0x13b6   :  { %3666 = vrcp.f32 %v2339_v46  ;;  %v2351_v4 = vand.u32 2147483648, %v2339_v46  ;;  %v2349_v6 = vand.u32 2147483647, %v2339_v46  ;;  %vm2345_vm9 = vweird.f32 %v2339_v46 }
0x13b8   :  { %v2352_v19 = vor.u32 1.1754944e-38, %v2351_v4  ;;  %vm2350_vm11 = vcmp.eq.f32.partialorder %v2349_v6, 8.507059e+37  ;;  %v4961_v6 = vld [vmem:[%s4234_s19] ss:$0 sm:$0xff] }
0x13b9   :  { %v3663_v32 = vpop.eup %3662 }
0x13ba   :  { %v2359_v15 = vadd.f32 1.0, %v3663_v32 }
0x13bb   :  { %v3665_v41 = vpop.eup %3664 }
0x13bc   :  { %v3667_v14 = vpop.eup %3666  ;;  %3668 = vrcp.f32 %v2359_v15  ;;  %v2381_v55 = vadd.f32 1.0, %v3665_v41  ;;  %v2371_v18 = vand.u32 2147483648, %v2359_v15  ;;  %v2369_v48 = vand.u32 2147483647, %v2359_v15 }
0x13bd   :  { %v2341_v47 = vmul.f32 %v3667_v14, %v2339_v46  ;;  %vm2346_vm8 = vweird.f32 %v3667_v14  ;;  %vm2365_vm1 = vweird.f32 %v2359_v15 }
0x13be   :  { %3670 = vrcp.f32 %v2381_v55  ;;  %vm2347_vm10 = vmor %vm2345_vm9, %vm2346_vm8  ;;  %v2372_v42 = vor.u32 1.1754944e-38, %v2371_v18  ;;  %vm2370_vm13 = vcmp.eq.f32.partialorder %v2369_v48, 8.507059e+37  ;;  %v2393_v49 = vand.u32 2147483648, %v2381_v55 }
0x13bf   :  { %v2342_v60 = vsub.f32 1.0, %v2341_v47  ;;  %3672 = vtanh.f32 %v2375_v53  ;;  %vm2387_vm2 = vweird.f32 %v2381_v55  ;;  %v2391_v32 = vand.u32 2147483647, %v2381_v55  ;;  %v4956_v47 = vld [vmem:[%s4234_s19 + $0x1] ss:$0 sm:$0xff] }
0x13c0   :  { %v2394_v63 = vor.u32 1.1754944e-38, %v2393_v49 }
0x13c1   :  { %v2343_v5 = vmul.f32 %v3667_v14, %v2342_v60  ;;  %vm2392_vm6 = vcmp.eq.f32.partialorder %v2391_v32, 8.507059e+37 }
0x13c2   :  { %v3669_v7 = vpop.eup %3668 }
0x13c3   :  { %v2344_v54 = vadd.f32 %v3667_v14, %v2343_v5  ;;  %v2361_v57 = vmul.f32 %v3669_v7, %v2359_v15  ;;  %vm2366_vm12 = vweird.f32 %v3669_v7 }
0x13c4   :  { %v3671_v23 = vpop.eup %3670  ;;  %vm2367_vm4 = vmor %vm2365_vm1, %vm2366_vm12 }
0x13c5   :  { %v2348_v62 = vsel %vm2347_vm10, %v3667_v14, %v2344_v54  ;;  %v2362_v0 = vsub.f32 1.0, %v2361_v57  ;;  %v3673_v2 = vpop.eup %3672  ;;  %v2383_v30 = vmul.f32 %v3671_v23, %v2381_v55  ;;  %vm2388_vm15 = vweird.f32 %v3671_v23 }
0x13c6   :  { %v2353_v8 = vsel %vm2350_vm11, %v2352_v19, %v2348_v62  ;;  %vm2389_vm5 = vmor %vm2387_vm2, %vm2388_vm15  ;;  %v1473_v55 = vadd.f32 %v4956_v47, %v4667_v24 }
0x13c7   :  { %v2398_v12 = vmul.f32 %v3673_v2, %v2353_v8  ;;  %v2363_v13 = vmul.f32 %v3669_v7, %v2362_v0  ;;  %v2384_v25 = vsub.f32 1.0, %v2383_v30  ;;  %v4966_v2 = vld [vmem:[%s4234_s19 + $0x3] ss:$0 sm:$0xff] }
0x13c9   :  { %v2364_v39 = vadd.f32 %v3669_v7, %v2363_v13  ;;  %v2385_v26 = vmul.f32 %v3671_v23, %v2384_v25 }
0x13cb   :  { %v2368_v40 = vsel %vm2367_vm4, %v3669_v7, %v2364_v39  ;;  %v2386_v59 = vadd.f32 %v3671_v23, %v2385_v26  ;;  %v1416_v7 = vadd.f32 %v4961_v6, %v4669_v33 }
0x13cc   :  { %v2373_v21 = vsel %vm2370_vm13, %v2372_v42, %v2368_v40  ;;  %v4970_v42 = vld [vmem:[%s4234_s19 + $0x2] ss:$0 sm:$0xff]  ;;  %s4055_s19 = smov [#allocation16]  }
0x13cd   :  { %v2397_v52 = vmul.f32 %v2373_v21, %v4856_v10  ;;  %v2390_v45 = vsel %vm2389_vm5, %v3671_v23, %v2386_v59  ;;  %v1586_v23 = vpop.f32.mrf.mxu2  ;;  %v1530_v40 = vadd.f32 %v4970_v42, %v4754_v3 }
0x13ce   :  { %v2395_v41 = vsel %vm2392_vm6, %v2394_v63, %v2390_v45  ;;  %v1587_v24 = vadd.f32 %v4966_v2, %v1586_v23 }
0x13cf   :  { %v2399_v20 = vadd.f32 %v2398_v12, %v2397_v52 }
0x13d1   :  { %3674 = vtanh.f32 %v2399_v20  ;;  %v4922_v46 = vsel %vm2407_vm14, %v2399_v20, %v4856_v10  ;;  %v4942_v10 = vld [vmem:[#allocation14 + $0x40] sm:$0xff] }
0x13d7   :  { %v3675_v15 = vpop.eup %3674 }
0x13d8   :  { %v2401_v14 = vmul.f32 %v3675_v15, %v2395_v41 }
0x13da   :  { %v4925_v53 = vsel %vm2407_vm14, %v2401_v14, %v4859_v38  ;;  %v4947_v38 = vld [vmem:[#allocation14 + $0x60] sm:$0xff] }
0x13db   :  { %3418 = vmatmul.msk.f32.vlgmr.msra.gmra.mxu3 %vm301_vm0, %v4925_v53  ;;  %3419 = vmatmul.msk.f32.vlgmr.msra.gmra.mxu0 %vm301_vm0, %v4925_v53 }
0x13dc   :  { %3420 = vmatmul.msk.f32.vlgmr.msrb.gmra.mxu1 %vm301_vm0, %v4925_v53  ;;  %2623 = vmatpush.msra.mxu3 %v4867_v58 }
0x13dd   :  { %2643 = vmatpush.msra.mxu0 %v4870_v31  ;;  %2741 = vmatpush.msrb.mxu1 %v4873_v16 }
0x13de   :  { %2624 = vmatpush.msra.mxu3 %v4876_v61 }
0x13df   :  { %2644 = vmatpush.msra.mxu0 %v4879_v51  ;;  %2742 = vmatpush.msrb.mxu1 %v4882_v50 }
0x13e0   :  { %2625 = vmatpush.msra.mxu3 %v4885_v9 }
0x13e1   :  { %2645 = vmatpush.msra.mxu0 %v4888_v17  ;;  %2743 = vmatpush.msrb.mxu1 %v4891_v56 }
0x13e2   :  { %2626 = vmatpush.msra.mxu3 %v4942_v10 }
0x13e3   :  { %3421 = vmatmul.msk.f32.vlgmr.msrb.gmra.mxu3 %vm301_vm0, %v4925_v53  ;;  %2646 = vmatpush.msra.mxu0 %v4947_v38 }
0x13e4   :  { %2781 = vmatpush.msrb.mxu3 %v4867_v58  ;;  %2744 = vmatpush.msrb.mxu1 %v4901_v29 }
0x13e6   :  { %2782 = vmatpush.msrb.mxu3 %v4876_v61 }
0x13e8   :  { %2783 = vmatpush.msrb.mxu3 %v4885_v9 }
0x13ea   :  { %2784 = vmatpush.msrb.mxu3 %v4942_v10 }
0x1458   :  { %v2450_v60 = vpop.f32.mrf.mxu0 }
0x1459   :  { %v2513_v4 = vadd.f32 %v2450_v60, %v1473_v55  ;;  %v2470_v39 = vpop.f32.mrf.mxu1 }
0x145a   :  { %v2533_v59 = vadd.f32 %v2470_v39, %v1530_v40 }
0x145b   :  { %v3423_v5 = vmul.f32 -1.442695, %v2513_v4 }
0x145d   :  { %3676 = vpow2.f32 %v3423_v5 }
0x145e   :  { %v2430_v54 = vpop.f32.mrf.mxu3 }
0x145f   :  { %v2493_v57 = vadd.f32 %v2430_v54, %v1416_v7 }
0x1461   :  { %v3422_v19 = vmul.f32 -1.442695, %v2493_v57 }
0x1463   :  { %v3677_v62 = vpop.eup %3676  ;;  %3678 = vpow2.f32 %v3422_v19 }
0x1464   :  { %v2517_v0 = vadd.f32 1.0, %v3677_v62 }
0x1466   :  { %3680 = vrcp.f32 %v2517_v0  ;;  %v2490_v8 = vpop.f32.mrf.mxu3  ;;  %v2529_v21 = vand.u32 2147483648, %v2517_v0  ;;  %v2527_v22 = vand.u32 2147483647, %v2517_v0  ;;  %vm2523_vm7 = vweird.f32 %v2517_v0 }
0x1467   :  { %v2535_v18 = vadd.f32 %v2490_v8, %v1587_v24  ;;  %v2564_v8 = vpop.permute.xlu2 %2563 }
0x1468   :  { %v2530_v63 = vor.u32 1.1754944e-38, %v2529_v21  ;;  %vm2528_vm9 = vcmp.eq.f32.partialorder %v2527_v22, 8.507059e+37  ;;  %vm2565_vm4 = vcmp.eq.s32.totalorder %v2564_v8, 1 }
0x1469   :  { %v3679_v30 = vpop.eup %3678  ;;  %v3424_v12 = vmul.f32 -1.442695, %v2535_v18 }
0x146a   :  { %v2497_v13 = vadd.f32 1.0, %v3679_v30 }
0x146b   :  { %3682 = vpow2.f32 %v3424_v12 }
0x146c   :  { %v3681_v33 = vpop.eup %3680  ;;  %3684 = vrcp.f32 %v2497_v13  ;;  %v2509_v3 = vand.u32 2147483648, %v2497_v13  ;;  %v2507_v4 = vand.u32 2147483647, %v2497_v13  ;;  %vm2503_vm11 = vweird.f32 %v2497_v13 }
0x146d   :  { %v2519_v48 = vmul.f32 %v3681_v33, %v2517_v0  ;;  %vm2524_vm3 = vweird.f32 %v3681_v33 }
0x146e   :  { %vm2525_vm8 = vmor %vm2523_vm7, %vm2524_vm3  ;;  %v2510_v54 = vor.u32 1.1754944e-38, %v2509_v3  ;;  %vm2508_vm1 = vcmp.eq.f32.partialorder %v2507_v4, 8.507059e+37 }
0x146f   :  { %v2520_v25 = vsub.f32 1.0, %v2519_v48 }
0x1471   :  { %v3683_v26 = vpop.eup %3682  ;;  %v2521_v52 = vmul.f32 %v3681_v33, %v2520_v25 }
0x1472   :  { %v3685_v20 = vpop.eup %3684  ;;  %v2539_v49 = vadd.f32 1.0, %v3683_v26 }
0x1473   :  { %v2522_v32 = vadd.f32 %v3681_v33, %v2521_v52  ;;  %v2499_v45 = vmul.f32 %v3685_v20, %v2497_v13  ;;  %vm2504_vm10 = vweird.f32 %v3685_v20 }
0x1474   :  { %3686 = vrcp.f32 %v2539_v49  ;;  %vm2505_vm12 = vmor %vm2503_vm11, %vm2504_vm10  ;;  %vm2545_vm14 = vweird.f32 %v2539_v49  ;;  %v2549_v48 = vand.u32 2147483647, %v2539_v49 }
0x1475   :  { %v2526_v15 = vsel %vm2525_vm8, %v3681_v33, %v2522_v32  ;;  %v2500_v41 = vsub.f32 1.0, %v2499_v45  ;;  %3688 = vtanh.f32 %v2533_v59  ;;  %v2551_v33 = vand.u32 2147483648, %v2539_v49 }
0x1476   :  { %v2531_v14 = vsel %vm2528_vm9, %v2530_v63, %v2526_v15  ;;  %vm2550_vm2 = vcmp.eq.f32.partialorder %v2549_v48, 8.507059e+37  ;;  %v1589_v63 = vpop.f32.mrf.mxu2 }
0x1477   :  { %v2555_v55 = vmul.f32 %v2531_v14, %v4922_v46  ;;  %v2501_v60 = vmul.f32 %v3685_v20, %v2500_v41  ;;  %v2552_v39 = vor.u32 1.1754944e-38, %v2551_v33  ;;  %v1590_v15 = vadd.f32 %v4966_v2, %v1589_v63 }
0x1479   :  { %v2502_v5 = vadd.f32 %v3685_v20, %v2501_v60 }
0x147a   :  { %v3687_v7 = vpop.eup %3686 }
0x147b   :  { %v2506_v57 = vsel %vm2505_vm12, %v3685_v20, %v2502_v5  ;;  %v2541_v19 = vmul.f32 %v3687_v7, %v2539_v49  ;;  %v3689_v23 = vpop.eup %3688  ;;  %vm2546_vm13 = vweird.f32 %v3687_v7  ;;  %v1533_v5 = vadd.f32 %v4970_v42, %v4756_v43 }
0x147c   :  { %v2511_v62 = vsel %vm2508_vm1, %v2510_v54, %v2506_v57  ;;  %vm2547_vm15 = vmor %vm2545_vm14, %vm2546_vm13 }
0x147d   :  { %v2556_v0 = vmul.f32 %v3689_v23, %v2511_v62  ;;  %v2542_v24 = vsub.f32 1.0, %v2541_v19 }
0x147f   :  { %v2557_v18 = vadd.f32 %v2556_v0, %v2555_v55  ;;  %v2543_v30 = vmul.f32 %v3687_v7, %v2542_v24 }
0x1481   :  { %v2544_v12 = vadd.f32 %v3687_v7, %v2543_v30  ;;  %3690 = vtanh.f32 %v2557_v18  ;;  %v4976_v13 = vsel %vm2565_vm4, %v2557_v18, %v4922_v46  ;;  %v1476_v46 = vadd.f32 %v4956_v47, %v4671_v34 }
0x1483   :  { %v2548_v25 = vsel %vm2547_vm15, %v3687_v7, %v2544_v12 }
0x1484   :  { %v2553_v21 = vsel %vm2550_vm2, %v2552_v39, %v2548_v25 }
0x1487   :  { %v3691_v40 = vpop.eup %3690 }
0x1488   :  { %v2559_v26 = vmul.f32 %v3691_v40, %v2553_v21 }
0x148a   :  { %v4979_v52 = vsel %vm2565_vm4, %v2559_v26, %v4925_v53  ;;  %v1419_v53 = vadd.f32 %v4961_v6, %v4673_v35 }
0x148b   :  { %3425 = vmatmul.msk.f32.vlgmr.msrb.gmra.mxu0 %vm301_vm0, %v4979_v52  ;;  %3426 = vmatmul.msk.f32.vlgmr.msra.gmra.mxu1 %vm301_vm0, %v4979_v52 }
0x148c   :  { %3427 = vmatmul.msk.f32.vlgmr.msra.gmra.mxu3 %vm301_vm0, %v4979_v52  ;;  %2801 = vmatpush.msrb.mxu0 %v4870_v31 }
0x148d   :  { %2899 = vmatpush.msra.mxu1 %v4873_v16  ;;  %2939 = vmatpush.msra.mxu3 %v4867_v58 }
0x148e   :  { %2802 = vmatpush.msrb.mxu0 %v4879_v51 }
0x148f   :  { %2900 = vmatpush.msra.mxu1 %v4882_v50  ;;  %2940 = vmatpush.msra.mxu3 %v4876_v61 }
0x1490   :  { %2803 = vmatpush.msrb.mxu0 %v4888_v17 }
0x1491   :  { %2901 = vmatpush.msra.mxu1 %v4891_v56  ;;  %2941 = vmatpush.msra.mxu3 %v4885_v9 }
0x1492   :  { %2804 = vmatpush.msrb.mxu0 %v4947_v38 }
0x1493   :  { %3428 = vmatmul.msk.f32.vlgmr.msra.gmra.mxu0 %vm301_vm0, %v4979_v52  ;;  %2902 = vmatpush.msra.mxu1 %v4901_v29 }
0x1494   :  { %2959 = vmatpush.msra.mxu0 %v4870_v31  ;;  %2942 = vmatpush.msra.mxu3 %v4942_v10 }
0x1496   :  { %2960 = vmatpush.msra.mxu0 %v4879_v51 }
0x1498   :  { %2961 = vmatpush.msra.mxu0 %v4888_v17 }
0x149a   :  { %2962 = vmatpush.msra.mxu0 %v4947_v38 }
0x1508   :  { %v2588_v22 = vpop.f32.mrf.mxu0  ;;  %v2608_v20 = vpop.f32.mrf.mxu1 }
0x1509   :  { %v2651_v59 = vadd.f32 %v2588_v22, %v1419_v53  ;;  %v2671_v49 = vadd.f32 %v2608_v20, %v1476_v46 }
0x150b   :  { %v3429_v32 = vmul.f32 -1.442695, %v2651_v59  ;;  %v3430_v45 = vmul.f32 -1.442695, %v2671_v49 }
0x150d   :  { %3692 = vpow2.f32 %v3429_v32 }
0x150e   :  { %3694 = vpow2.f32 %v3430_v45 }
0x150f   :  { %v2628_v35 = vpop.f32.mrf.mxu3 }
0x1510   :  { %v2648_v41 = vpop.f32.mrf.mxu0  ;;  %v2691_v57 = vadd.f32 %v2628_v35, %v1533_v5 }
0x1511   :  { %v2693_v14 = vadd.f32 %v2648_v41, %v1590_v15  ;;  %v2722_v41 = vpop.permute.xlu1 %2721 }
0x1512   :  { %vm2723_vm12 = vcmp.eq.s32.totalorder %v2722_v41, 1 }
0x1513   :  { %v3693_v3 = vpop.eup %3692  ;;  %v3431_v55 = vmul.f32 -1.442695, %v2693_v14 }
0x1514   :  { %v3695_v60 = vpop.eup %3694  ;;  %v2655_v34 = vadd.f32 1.0, %v3693_v3 }
0x1515   :  { %v2675_v4 = vadd.f32 1.0, %v3695_v60  ;;  %3696 = vpow2.f32 %v3431_v55 }
0x1516   :  { %3698 = vrcp.f32 %v2655_v34  ;;  %v2667_v18 = vand.u32 2147483648, %v2655_v34  ;;  %v2665_v33 = vand.u32 2147483647, %v2655_v34  ;;  %vm2661_vm3 = vweird.f32 %v2655_v34 }
0x1517   :  { %3700 = vrcp.f32 %v2675_v4  ;;  %v2687_v30 = vand.u32 2147483648, %v2675_v4  ;;  %v2685_v25 = vand.u32 2147483647, %v2675_v4  ;;  %vm2681_vm7 = vweird.f32 %v2675_v4 }
0x1518   :  { %v2668_v40 = vor.u32 1.1754944e-38, %v2667_v18  ;;  %vm2666_vm10 = vcmp.eq.f32.partialorder %v2665_v33, 8.507059e+37 }
0x1519   :  { %v2688_v26 = vor.u32 1.1754944e-38, %v2687_v30  ;;  %vm2686_vm11 = vcmp.eq.f32.partialorder %v2685_v25, 8.507059e+37 }
0x151b   :  { %v3697_v7 = vpop.eup %3696 }
0x151c   :  { %v3699_v54 = vpop.eup %3698  ;;  %v2697_v19 = vadd.f32 1.0, %v3697_v7 }
0x151d   :  { %v3701_v23 = vpop.eup %3700  ;;  %v2657_v62 = vmul.f32 %v3699_v54, %v2655_v34  ;;  %vm2662_vm5 = vweird.f32 %v3699_v54 }
0x151e   :  { %v2677_v0 = vmul.f32 %v3701_v23, %v2675_v4  ;;  %3702 = vrcp.f32 %v2697_v19  ;;  %vm2682_vm6 = vweird.f32 %v3701_v23  ;;  %vm2663_vm8 = vmor %vm2661_vm3, %vm2662_vm5  ;;  %v2709_v55 = vand.u32 2147483648, %v2697_v19 }
0x151f   :  { %v2658_v24 = vsub.f32 1.0, %v2657_v62  ;;  %3704 = vtanh.f32 %v2691_v57  ;;  %vm2683_vm9 = vmor %vm2681_vm7, %vm2682_vm6  ;;  %vm2703_vm4 = vweird.f32 %v2697_v19  ;;  %v2707_v34 = vand.u32 2147483647, %v2697_v19 }
0x1520   :  { %v2678_v8 = vsub.f32 1.0, %v2677_v0  ;;  %v2710_v35 = vor.u32 1.1754944e-38, %v2709_v55  ;;  %v1536_v62 = vadd.f32 %v4970_v42, %v4758_v44 }
0x1521   :  { %v2659_v12 = vmul.f32 %v3699_v54, %v2658_v24  ;;  %vm2708_vm14 = vcmp.eq.f32.partialorder %v2707_v34, 8.507059e+37 }
0x1522   :  { %v2679_v48 = vmul.f32 %v3701_v23, %v2678_v8 }
0x1523   :  { %v2660_v43 = vadd.f32 %v3699_v54, %v2659_v12 }
0x1524   :  { %v3703_v39 = vpop.eup %3702  ;;  %v2680_v21 = vadd.f32 %v3701_v23, %v2679_v48 }
0x1525   :  { %v2664_v46 = vsel %vm2663_vm8, %v3699_v54, %v2660_v43  ;;  %v2699_v53 = vmul.f32 %v3703_v39, %v2697_v19  ;;  %v3705_v22 = vpop.eup %3704  ;;  %vm2704_vm1 = vweird.f32 %v3703_v39 }
0x1526   :  { %v2669_v20 = vsel %vm2666_vm10, %v2668_v40, %v2664_v46  ;;  %v2684_v59 = vsel %vm2683_vm9, %v3701_v23, %v2680_v21  ;;  %vm2705_vm13 = vmor %vm2703_vm4, %vm2704_vm1 }
0x1527   :  { %v2689_v49 = vsel %vm2686_vm11, %v2688_v26, %v2684_v59  ;;  %v2714_v32 = vmul.f32 %v3705_v22, %v2669_v20  ;;  %v2700_v45 = vsub.f32 1.0, %v2699_v53 }
0x1528   :  { %v2713_v63 = vmul.f32 %v2689_v49, %v4976_v13 }
0x1529   :  { %v2701_v15 = vmul.f32 %v3703_v39, %v2700_v45 }
0x152a   :  { %v2715_v14 = vadd.f32 %v2714_v32, %v2713_v63 }
0x152b   :  { %v2702_v3 = vadd.f32 %v3703_v39, %v2701_v15 }
0x152c   :  { %3706 = vtanh.f32 %v2715_v14  ;;  %v5014_v60 = vsel %vm2723_vm12, %v2715_v14, %v4976_v13 }
0x152d   :  { %v2706_v4 = vsel %vm2705_vm13, %v3703_v39, %v2702_v3  ;;  %v2880_v3 = vpop.permute.xlu2 %2879 }
0x152e   :  { %v2711_v7 = vsel %vm2708_vm14, %v2710_v35, %v2706_v4  ;;  %vm2881_vm10 = vcmp.eq.s32.totalorder %v2880_v3, 1 }
0x1532   :  { %v3707_v5 = vpop.eup %3706 }
0x1533   :  { %v2717_v54 = vmul.f32 %v3707_v5, %v2711_v7 }
0x1535   :  { %v5017_v57 = vsel %vm2723_vm12, %v2717_v54, %v4979_v52 }
0x1536   :  { %3432 = vmatmul.msk.f32.vlgmr.msrb.gmra.mxu1 %vm301_vm0, %v5017_v57  ;;  %3433 = vmatmul.msk.f32.vlgmr.msra.gmra.mxu2 %vm301_vm0, %v5017_v57 }
0x1537   :  { %3434 = vmatmul.msk.f32.vlgmr.msrb.gmra.mxu3 %vm301_vm0, %v5017_v57  ;;  %3435 = vmatmul.msk.f32.vlgmr.msrb.gmra.mxu0 %vm301_vm0, %v5017_v57 }
0x1538   :  { %3057 = vmatpush.msrb.mxu1 %v4873_v16  ;;  %3077 = vmatpush.msra.mxu2 %v4898_v27 }
0x1539   :  { %3097 = vmatpush.msrb.mxu3 %v4867_v58  ;;  %3117 = vmatpush.msrb.mxu0 %v4870_v31  ;;  %v1592_v58 = vpop.f32.mrf.mxu2 }
0x153a   :  { %3058 = vmatpush.msrb.mxu1 %v4882_v50  ;;  %3078 = vmatpush.msra.mxu2 %v4904_v1  ;;  %v1479_v1 = vadd.f32 %v4956_v47, %v4675_v36 }
0x153b   :  { %3098 = vmatpush.msrb.mxu3 %v4876_v61  ;;  %3118 = vmatpush.msrb.mxu0 %v4879_v51  ;;  %v1422_v61 = vadd.f32 %v4961_v6, %v4677_v37  ;;  %v1593_v51 = vadd.f32 %v4966_v2, %v1592_v58 }
0x153c   :  { %3059 = vmatpush.msrb.mxu1 %v4891_v56  ;;  %3079 = vmatpush.msra.mxu2 %v4907_v28 }
0x153d   :  { %3099 = vmatpush.msrb.mxu3 %v4885_v9  ;;  %3119 = vmatpush.msrb.mxu0 %v4888_v17 }
0x153e   :  { %3060 = vmatpush.msrb.mxu1 %v4901_v29  ;;  %3080 = vmatpush.msra.mxu2 %v4910_v11 }
0x153f   :  { %3100 = vmatpush.msrb.mxu3 %v4942_v10  ;;  %3120 = vmatpush.msrb.mxu0 %v4947_v38 }
0x1541   :  { %v5043_v31 = vpop.f32.mrf.mxu2 }
0x1549   :  { %v5045_v16 = vpop.f32.mrf.mxu2 }
0x15b3   :  { %v2746_v50 = vpop.f32.mrf.mxu1 }
0x15b4   :  { %v2809_v9 = vadd.f32 %v2746_v50, %v1422_v61  ;;  %v2806_v17 = vpop.f32.mrf.mxu0 }
0x15b5   :  { %v2851_v56 = vadd.f32 %v2806_v17, %v1593_v51 }
0x15b6   :  { %v3436_v27 = vmul.f32 -1.442695, %v2809_v9 }
0x15b7   :  { %v3438_v29 = vmul.f32 -1.442695, %v2851_v56  ;;  %v1596_v56 = vadd.f32 %v4966_v2, %v5043_v31 }
0x15b8   :  { %3708 = vpow2.f32 %v3436_v27 }
0x15b9   :  { %3710 = vpow2.f32 %v3438_v29  ;;  %v2766_v28 = vpop.f32.mrf.mxu2 }
0x15ba   :  { %v2829_v11 = vadd.f32 %v2766_v28, %v1479_v1  ;;  %v2786_v23 = vpop.f32.mrf.mxu3 }
0x15bb   :  { %v2849_v36 = vadd.f32 %v2786_v23, %v1536_v62 }
0x15bc   :  { %v3437_v10 = vmul.f32 -1.442695, %v2829_v11 }
0x15be   :  { %v3709_v38 = vpop.eup %3708  ;;  %3712 = vpow2.f32 %v3437_v10  ;;  %v5164_v10 = vld [vmem:[#allocation43_spill] sm:$0xff] }
0x15bf   :  { %v3711_v13 = vpop.eup %3710  ;;  %v2813_v37 = vadd.f32 1.0, %v3709_v38  ;;  %v1482_v38 = vadd.f32 %v4956_v47, %v5164_v10 }
0x15c0   :  { %v2855_v52 = vadd.f32 1.0, %v3711_v13 }
0x15c1   :  { %3714 = vrcp.f32 %v2813_v37  ;;  %v2825_v30 = vand.u32 2147483648, %v2813_v37  ;;  %v2823_v48 = vand.u32 2147483647, %v2813_v37  ;;  %vm2819_vm2 = vweird.f32 %v2813_v37 }
0x15c2   :  { %3716 = vrcp.f32 %v2855_v52  ;;  %v2867_v35 = vand.u32 2147483648, %v2855_v52  ;;  %vm2861_vm12 = vweird.f32 %v2855_v52  ;;  %v2865_v7 = vand.u32 2147483647, %v2855_v52 }
0x15c3   :  { %v2826_v44 = vor.u32 1.1754944e-38, %v2825_v30  ;;  %vm2824_vm6 = vcmp.eq.f32.partialorder %v2823_v48, 8.507059e+37 }
0x15c4   :  { %v3713_v19 = vpop.eup %3712  ;;  %v2868_v58 = vor.u32 1.1754944e-38, %v2867_v35  ;;  %vm2866_vm4 = vcmp.eq.f32.partialorder %v2865_v7, 8.507059e+37  ;;  %v3038_v35 = vpop.permute.xlu1 %3037 }
0x15c5   :  { %v2833_v0 = vadd.f32 1.0, %v3713_v19 }
0x15c7   :  { %v3715_v24 = vpop.eup %3714  ;;  %3718 = vrcp.f32 %v2833_v0  ;;  %v2845_v53 = vand.u32 2147483648, %v2833_v0  ;;  %v2843_v59 = vand.u32 2147483647, %v2833_v0  ;;  %vm2839_vm7 = vweird.f32 %v2833_v0 }
0x15c8   :  { %v2815_v8 = vmul.f32 %v3715_v24, %v2813_v37  ;;  %3720 = vtanh.f32 %v2849_v36  ;;  %v3717_v12 = vpop.eup %3716  ;;  %vm2820_vm15 = vweird.f32 %v3715_v24  ;;  %v5165_v36 = vld [vmem:[#allocation47_spill] sm:$0xff] }
0x15c9   :  { %v2857_v40 = vmul.f32 %v3717_v12, %v2855_v52  ;;  %vm2821_vm5 = vmor %vm2819_vm2, %vm2820_vm15  ;;  %v2846_v63 = vor.u32 1.1754944e-38, %v2845_v53  ;;  %vm2844_vm9 = vcmp.eq.f32.partialorder %v2843_v59, 8.507059e+37  ;;  %vm2862_vm11 = vweird.f32 %v3717_v12 }
0x15ca   :  { %v2816_v18 = vsub.f32 1.0, %v2815_v8  ;;  %vm2863_vm1 = vmor %vm2861_vm12, %vm2862_vm11  ;;  %v1539_v8 = vadd.f32 %v4970_v42, %v5165_v36 }
0x15cb   :  { %v2858_v32 = vsub.f32 1.0, %v2857_v40 }
0x15cc   :  { %v2817_v33 = vmul.f32 %v3715_v24, %v2816_v18 }
0x15cd   :  { %v3719_v25 = vpop.eup %3718  ;;  %v2859_v41 = vmul.f32 %v3717_v12, %v2858_v32 }
0x15ce   :  { %v2835_v43 = vmul.f32 %v3719_v25, %v2833_v0  ;;  %v2818_v39 = vadd.f32 %v3715_v24, %v2817_v33  ;;  %v3721_v46 = vpop.eup %3720  ;;  %vm2840_vm3 = vweird.f32 %v3719_v25 }
0x15cf   :  { %vm2841_vm8 = vmor %vm2839_vm7, %vm2840_vm3  ;;  %v2860_v4 = vadd.f32 %v3717_v12, %v2859_v41 }
0x15d0   :  { %v2836_v21 = vsub.f32 1.0, %v2835_v43  ;;  %v2822_v26 = vsel %vm2821_vm5, %v3715_v24, %v2818_v39 }
0x15d1   :  { %v2827_v22 = vsel %vm2824_vm6, %v2826_v44, %v2822_v26  ;;  %v2864_v54 = vsel %vm2863_vm1, %v3717_v12, %v2860_v4 }
0x15d2   :  { %v2837_v20 = vmul.f32 %v3719_v25, %v2836_v21  ;;  %v2872_v49 = vmul.f32 %v3721_v46, %v2827_v22  ;;  %v2869_v51 = vsel %vm2866_vm4, %v2868_v58, %v2864_v54 }
0x15d4   :  { %v2838_v45 = vadd.f32 %v3719_v25, %v2837_v20 }
0x15d6   :  { %v2842_v15 = vsel %vm2841_vm8, %v3719_v25, %v2838_v45  ;;  %vm3039_vm8 = vcmp.eq.s32.totalorder %v3038_v35, 1 }
0x15d7   :  { %v2847_v14 = vsel %vm2844_vm9, %v2846_v63, %v2842_v15 }
0x15d8   :  { %v2871_v55 = vmul.f32 %v2847_v14, %v5014_v60 }
0x15da   :  { %v2873_v34 = vadd.f32 %v2872_v49, %v2871_v55 }
0x15dc   :  { %3722 = vtanh.f32 %v2873_v34  ;;  %v5056_v5 = vsel %vm2881_vm10, %v2873_v34, %v5014_v60  ;;  %v5163_v60 = vld [vmem:[#allocation44_spill] sm:$0xff] }
0x15dd   :  { %v1425_v17 = vadd.f32 %v4961_v6, %v5163_v60 }
0x15e2   :  { %v3723_v61 = vpop.eup %3722 }
0x15e3   :  { %v2875_v50 = vmul.f32 %v3723_v61, %v2869_v51 }
0x15e5   :  { %v5059_v9 = vsel %vm2881_vm10, %v2875_v50, %v5017_v57 }
0x15e6   :  { %3439 = vmatmul.msk.f32.vlgmr.msra.gmra.mxu1 %vm301_vm0, %v5059_v9  ;;  %3440 = vmatmul.msk.f32.vlgmr.msrb.gmra.mxu2 %vm301_vm0, %v5059_v9 }
0x15e7   :  { %3441 = vmatmul.msk.f32.vlgmr.msra.gmra.mxu3 %vm301_vm0, %v5059_v9  ;;  %3442 = vmatmul.msk.f32.vlgmr.msra.gmra.mxu0 %vm301_vm0, %v5059_v9 }
0x1663   :  { %v2904_v57 = vpop.f32.mrf.mxu1 }
0x1664   :  { %v2967_v27 = vadd.f32 %v2904_v57, %v1425_v17  ;;  %v2964_v29 = vpop.f32.mrf.mxu0 }
0x1665   :  { %v3009_v1 = vadd.f32 %v2964_v29, %v1596_v56 }
0x1666   :  { %v3443_v28 = vmul.f32 -1.442695, %v2967_v27 }
0x1667   :  { %v3445_v11 = vmul.f32 -1.442695, %v3009_v1 }
0x1668   :  { %3724 = vpow2.f32 %v3443_v28 }
0x1669   :  { %3726 = vpow2.f32 %v3445_v11  ;;  %v2924_v13 = vpop.f32.mrf.mxu2 }
0x166a   :  { %v2987_v37 = vadd.f32 %v2924_v13, %v1482_v38  ;;  %v2944_v24 = vpop.f32.mrf.mxu3 }
0x166b   :  { %v3007_v12 = vadd.f32 %v2944_v24, %v1539_v8  ;;  %v3199_v8 = vld [vmem:[%s4239_s20] sm:$0xff] }
0x166c   :  { %v3444_v52 = vmul.f32 -1.442695, %v2987_v37 }
0x166e   :  { %v3725_v19 = vpop.eup %3724  ;;  %3728 = vpow2.f32 %v3444_v52  ;;  %v5167_v52 = vld [vmem:[#allocation45_spill] sm:$0xff] }
0x166f   :  { %v3727_v23 = vpop.eup %3726  ;;  %v2971_v62 = vadd.f32 1.0, %v3725_v19  ;;  %v1485_v19 = vadd.f32 %v4956_v47, %v5167_v52 }
0x1670   :  { %v3013_v31 = vadd.f32 1.0, %v3727_v23 }
0x1671   :  { %3730 = vrcp.f32 %v2971_v62  ;;  %v2983_v25 = vand.u32 2147483648, %v2971_v62  ;;  %v2981_v40 = vand.u32 2147483647, %v2971_v62  ;;  %vm2977_vm14 = vweird.f32 %v2971_v62 }
0x1672   :  { %3732 = vrcp.f32 %v3013_v31  ;;  %v3025_v61 = vand.u32 2147483648, %v3013_v31  ;;  %vm3019_vm10 = vweird.f32 %v3013_v31  ;;  %v3023_v50 = vand.u32 2147483647, %v3013_v31 }
0x1673   :  { %v2984_v53 = vor.u32 1.1754944e-38, %v2983_v25  ;;  %vm2982_vm2 = vcmp.eq.f32.partialorder %v2981_v40, 8.507059e+37 }
0x1674   :  { %v3729_v0 = vpop.eup %3728  ;;  %v3026_v17 = vor.u32 1.1754944e-38, %v3025_v61  ;;  %vm3024_vm12 = vcmp.eq.f32.partialorder %v3023_v50, 8.507059e+37 }
0x1675   :  { %v2991_v18 = vadd.f32 1.0, %v3729_v0  ;;  %v3201_v0 = vld [vmem:[%s4239_s20 + $0x10] sm:$0xff] }
0x1677   :  { %v3731_v30 = vpop.eup %3730  ;;  %3734 = vrcp.f32 %v2991_v18  ;;  %v3003_v49 = vand.u32 2147483648, %v2991_v18  ;;  %v3001_v63 = vand.u32 2147483647, %v2991_v18  ;;  %vm2997_vm6 = vweird.f32 %v2991_v18 }
0x1678   :  { %v2973_v33 = vmul.f32 %v3731_v30, %v2971_v62  ;;  %3736 = vtanh.f32 %v3007_v12  ;;  %v3733_v43 = vpop.eup %3732  ;;  %vm2978_vm13 = vweird.f32 %v3731_v30 }
0x1679   :  { %v3015_v46 = vmul.f32 %v3733_v43, %v3013_v31  ;;  %vm2979_vm15 = vmor %vm2977_vm14, %vm2978_vm13  ;;  %v3004_v3 = vor.u32 1.1754944e-38, %v3003_v49  ;;  %vm3002_vm7 = vcmp.eq.f32.partialorder %v3001_v63, 8.507059e+37  ;;  %vm3020_vm9 = vweird.f32 %v3733_v43 }
0x167a   :  { %v2974_v48 = vsub.f32 1.0, %v2973_v33  ;;  %vm3021_vm11 = vmor %vm3019_vm10, %vm3020_vm9 }
0x167b   :  { %v3016_v41 = vsub.f32 1.0, %v3015_v46 }
0x167c   :  { %v2975_v39 = vmul.f32 %v3731_v30, %v2974_v48 }
0x167d   :  { %v3735_v44 = vpop.eup %3734  ;;  %v3017_v34 = vmul.f32 %v3733_v43, %v3016_v41 }
0x167e   :  { %v2993_v21 = vmul.f32 %v3735_v44, %v2991_v18  ;;  %v2976_v26 = vadd.f32 %v3731_v30, %v2975_v39  ;;  %v3737_v59 = vpop.eup %3736  ;;  %vm2998_vm5 = vweird.f32 %v3735_v44 }
0x167f   :  { %vm2999_vm3 = vmor %vm2997_vm6, %vm2998_vm5  ;;  %v3018_v58 = vadd.f32 %v3733_v43, %v3017_v34 }
0x1680   :  { %v2994_v22 = vsub.f32 1.0, %v2993_v21  ;;  %v2980_v20 = vsel %vm2979_vm15, %v3731_v30, %v2976_v26 }
0x1681   :  { %v2985_v32 = vsel %vm2982_vm2, %v2984_v53, %v2980_v20  ;;  %v3022_v60 = vsel %vm3021_vm11, %v3733_v43, %v3018_v58  ;;  %v5168_v43 = vld [vmem:[#allocation48_spill] sm:$0xff]  ;;  %vm3230_vm11 = vcmask 64512  }
0x1682   :  { %v2995_v45 = vmul.f32 %v3735_v44, %v2994_v22  ;;  %v3030_v15 = vmul.f32 %v3737_v59, %v2985_v32  ;;  %v3027_v57 = vsel %vm3024_vm12, %v3026_v17, %v3022_v60  ;;  %v1542_v39 = vadd.f32 %v4970_v42, %v5168_v43 }
0x1684   :  { %v2996_v14 = vadd.f32 %v3735_v44, %v2995_v45 }
0x1686   :  { %v3000_v55 = vsel %vm2999_vm3, %v3735_v44, %v2996_v14 }
0x1687   :  { %v3005_v4 = vsel %vm3002_vm7, %v3004_v3, %v3000_v55 }
0x1688   :  { %v3029_v7 = vmul.f32 %v3005_v4, %v5056_v5 }
0x168a   :  { %v3031_v54 = vadd.f32 %v3030_v15, %v3029_v7 }
0x168c   :  { %3738 = vtanh.f32 %v3031_v54  ;;  %v5079_v51 = vsel %vm3039_vm8, %v3031_v54, %v5056_v5  ;;  %v5166_v5 = vld [vmem:[#allocation46_spill] sm:$0xff] }
0x168d   :  { %v1428_v1 = vadd.f32 %v4961_v6, %v5166_v5  ;;  %v3202_v6 = vld [vmem:[%s4239_s20 + $0x18] sm:$0xff] }
0x168e   :  { %3222 = vmatpush.msra.mxu1 %v3202_v6 }
0x1690   :  { %3223 = vmatpush.msra.mxu1 %v3201_v0 }
0x1692   :  { %v3739_v56 = vpop.eup %3738 }
0x1693   :  { %v3033_v27 = vmul.f32 %v3739_v56, %v3027_v57 }
0x1695   :  { %v5082_v29 = vsel %vm3039_vm8, %v3033_v27, %v5059_v9  ;;  %v1599_v9 = vadd.f32 %v4966_v2, %v5045_v16  ;;  %v3200_v16 = vld [vmem:[%s4239_s20 + $0x8] sm:$0xff]  ;;  %v3196_v27 = vpop.permute.xlu0 %3195  ;;  %s3237_s20 = sshll.u32 %s4055_s19, 4  ;;  %s3238_s20 = int_to_ptr.vmem [resolvable:$true] %s3237_s20 }
0x1696   :  { %3446 = vmatmul.msk.f32.vlgmr.msrb.gmra.mxu1 %vm301_vm0, %v5082_v29  ;;  %3447 = vmatmul.msk.f32.vlgmr.msra.gmra.mxu2 %vm301_vm0, %v5082_v29  ;;  %vm3197_vm10 = vcmp.eq.s32.totalorder %v3196_v27, 1 }
0x1697   :  { %3448 = vmatmul.msk.f32.vlgmr.msrb.gmra.mxu3 %vm301_vm0, %v5082_v29  ;;  %3449 = vmatmul.msk.f32.vlgmr.msrb.gmra.mxu0 %vm301_vm0, %v5082_v29 }
0x1698   :  { %3224 = vmatpush.msra.mxu1 %v3200_v16 }
0x169a   :  { %3225 = vmatpush.msra.mxu1 %v3199_v8 }
0x1713   :  { %v3062_v28 = vpop.f32.mrf.mxu1 }
0x1714   :  { %v3125_v11 = vadd.f32 %v3062_v28, %v1428_v1  ;;  %v3122_v10 = vpop.f32.mrf.mxu0  ;;  %v3529_v28 = vld [vmem:[%s4244_s14] ss:$0 sm:$0xff] }
0x1715   :  { %v3167_v38 = vadd.f32 %v3122_v10, %v1599_v9 }
0x1716   :  { %v3450_v13 = vmul.f32 -1.442695, %v3125_v11 }
0x1717   :  { %v3452_v37 = vmul.f32 -1.442695, %v3167_v38 }
0x1718   :  { %3740 = vpow2.f32 %v3450_v13 }
0x1719   :  { %3742 = vpow2.f32 %v3452_v37  ;;  %v3082_v23 = vpop.f32.mrf.mxu2 }
0x171a   :  { %v3145_v62 = vadd.f32 %v3082_v23, %v1485_v19  ;;  %v3102_v25 = vpop.f32.mrf.mxu3 }
0x171b   :  { %v3165_v26 = vadd.f32 %v3102_v25, %v1542_v39 }
0x171c   :  { %v3451_v31 = vmul.f32 -1.442695, %v3145_v62 }
0x171e   :  { %v3741_v2 = vpop.eup %3740  ;;  %3744 = vpow2.f32 %v3451_v31 }
0x171f   :  { %v3743_v24 = vpop.eup %3742  ;;  %v3129_v36 = vadd.f32 1.0, %v3741_v2 }
0x1720   :  { %v3171_v18 = vadd.f32 1.0, %v3743_v24 }
0x1721   :  { %3746 = vrcp.f32 %v3129_v36  ;;  %v3141_v20 = vand.u32 2147483648, %v3129_v36  ;;  %vm3135_vm4 = vweird.f32 %v3129_v36  ;;  %v3139_v49 = vand.u32 2147483647, %v3129_v36 }
0x1722   :  { %3748 = vrcp.f32 %v3171_v18  ;;  %v3183_v60 = vand.u32 2147483648, %v3171_v18  ;;  %vm3177_vm7 = vweird.f32 %v3171_v18  ;;  %v3181_v17 = vand.u32 2147483647, %v3171_v18 }
0x1723   :  { %v3142_v41 = vor.u32 1.1754944e-38, %v3141_v20  ;;  %vm3140_vm2 = vcmp.eq.f32.partialorder %v3139_v49, 8.507059e+37 }
0x1724   :  { %v3745_v47 = vpop.eup %3744  ;;  %v3184_v57 = vor.u32 1.1754944e-38, %v3183_v60  ;;  %vm3182_vm9 = vcmp.eq.f32.partialorder %v3181_v17, 8.507059e+37 }
0x1725   :  { %v3149_v30 = vadd.f32 1.0, %v3745_v47 }
0x1727   :  { %v3747_v12 = vpop.eup %3746  ;;  %3750 = vrcp.f32 %v3149_v30  ;;  %v3161_v32 = vand.u32 2147483648, %v3149_v30  ;;  %v3159_v15 = vand.u32 2147483647, %v3149_v30  ;;  %vm3155_vm15 = vweird.f32 %v3149_v30 }
0x1728   :  { %v3131_v33 = vmul.f32 %v3747_v12, %v3129_v36  ;;  %v3749_v40 = vpop.eup %3748  ;;  %vm3136_vm1 = vweird.f32 %v3747_v12  ;;  %3752 = vtanh.f32 %v3165_v26 }
0x1729   :  { %v3173_v22 = vmul.f32 %v3749_v40, %v3171_v18  ;;  %vm3137_vm13 = vmor %vm3135_vm4, %vm3136_vm1  ;;  %v3162_v3 = vor.u32 1.1754944e-38, %v3161_v32  ;;  %vm3160_vm6 = vcmp.eq.f32.partialorder %v3159_v15, 8.507059e+37  ;;  %vm3178_vm3 = vweird.f32 %v3749_v40 }
0x172a   :  { %v3132_v48 = vsub.f32 1.0, %v3131_v33  ;;  %vm3179_vm8 = vmor %vm3177_vm7, %vm3178_vm3 }
0x172b   :  { %v3174_v42 = vsub.f32 1.0, %v3173_v22 }
0x172c   :  { %v3133_v44 = vmul.f32 %v3747_v12, %v3132_v48 }
0x172d   :  { %v3751_v21 = vpop.eup %3750  ;;  %v3175_v35 = vmul.f32 %v3749_v40, %v3174_v42 }
0x172e   :  { %v3151_v46 = vmul.f32 %v3751_v21, %v3149_v30  ;;  %v3134_v53 = vadd.f32 %v3747_v12, %v3133_v44  ;;  %vm3156_vm14 = vweird.f32 %v3751_v21  ;;  %v3753_v4 = vpop.eup %3752 }
0x172f   :  { %vm3157_vm5 = vmor %vm3155_vm15, %vm3156_vm14  ;;  %v3176_v50 = vadd.f32 %v3749_v40, %v3175_v35 }
0x1730   :  { %v3152_v59 = vsub.f32 1.0, %v3151_v46  ;;  %v3138_v63 = vsel %vm3137_vm13, %v3747_v12, %v3134_v53 }
0x1731   :  { %v3143_v55 = vsel %vm3140_vm2, %v3142_v41, %v3138_v63  ;;  %v3180_v56 = vsel %vm3179_vm8, %v3749_v40, %v3176_v50 }
0x1732   :  { %v3153_v45 = vmul.f32 %v3751_v21, %v3152_v59  ;;  %v3188_v58 = vmul.f32 %v3753_v4, %v3143_v55  ;;  %v3185_v1 = vsel %vm3182_vm9, %v3184_v57, %v3180_v56 }
0x1734   :  { %v3154_v14 = vadd.f32 %v3751_v21, %v3153_v45 }
0x1736   :  { %v3158_v34 = vsel %vm3157_vm5, %v3751_v21, %v3154_v14 }
0x1737   :  { %v3163_v7 = vsel %vm3160_vm6, %v3162_v3, %v3158_v34 }
0x1738   :  { %v3187_v54 = vmul.f32 %v3163_v7, %v5079_v51 }
0x173a   :  { %v3189_v61 = vadd.f32 %v3188_v58, %v3187_v54 }
0x173c   :  { %3754 = vtanh.f32 %v3189_v61 }
0x1742   :  { %v3755_v5 = vpop.eup %3754 }
0x1743   :  { %v3191_v9 = vmul.f32 %v3755_v5, %v3185_v1 }
0x1745   :  { %v3198_v51 = vsel %vm3197_vm10, %v3191_v9, %v5082_v29 }
0x1746   :  { %3453 = vmatmul.msk.f32.vlgmr.msra.gmra.mxu1 %vm301_vm0, %v3198_v51 }
0x17c3   :  { %v3227_v11 = vpop.f32.mrf.mxu1 }
0x17c4   :  { %v3228_v10 = vadd.f32 %v3529_v28, %v3227_v11 }
0x17c6   :  { %3231 = vst.msk [vmem:[#allocation16] sm:$0xff] %vm3230_vm11, %v3228_v10 }
0x17c7   :  { %3991 = shalt.err (!%p3988_p2)
}
0x17c8   :  { %3242 = dma.vmem_to_hbm [thread:$0]  %s3238_s20, 128, %s3240_s2, [#allocation4]  }
0x17c9   :  { %4002 = dma.done.wait [#allocation4], 128  }
0x17ca   :  { %4003 = vsyncadd [#allocation4], 4294967168 }
0x17cb   :  { %3247 = vsyncpa [#allocation3], 1 }
0x17cc   :  { %3248 = vsyncpa [#allocation6], 1 }
0x17cd   :  { %3249 = vsyncpa [#allocation9], 1 }
0x17ce   :  { %3250 = vsyncpa [#allocation12], 1 }
0x17cf   :  { %3251 = vsyncpa [#allocation15], 1 }
0x17d0   :  { %3252 = vsyncpa [#allocation4], 1 }

</bundles_post_ra>
